<compile_context>
chip_gen: v7x
topology: tpu7x:2x2x1
jax: 0.10.0
libtpu: 0.0.40
codegen_flags: <defaults>
</compile_context>

<pallas_src>
import jax
import jax.numpy as jnp
from jax.experimental import pallas as pl
from jax.experimental.pallas import tpu as pltpu

# Small, forward-consistent shapes.
B = 2            # batch
T = 8            # sequence length
V = 16           # vocab_size (LSTM input size and fc output size)
H = 32           # n_hidden
L = 2            # n_layers (2-layer structure is hard-coded in the kernel)
G = 4 * H        # 128 gate lanes -> exactly one 128-lane group


def _lstm_act(gates, c):
    """Gate activations + state update in the padded 128-lane frame.

    gates : (B, G) pre-activation for all four gates (exact in every lane).
    c     : (B, G) cell state; only lanes [0, H) are meaningful.
    Returns (h_new, c_new), exact in lanes [0, H); lanes >= H carry bounded
    junk that every downstream consumer kills with zero-padded weight rows.
    """
    s = jax.nn.sigmoid(gates)                # one EUP pass over all four gates
    th = jnp.tanh(gates)                     # one EUP pass over all four gates
    # PyTorch lane order [ i | f | g | o ]; rotate each gate block onto lanes
    # [0, H) with the XLU (jnp.roll semantics: lane k -> (k + shift) mod 128).
    i_g = s
    f_g = pltpu.roll(s, G - H, axis=1)       # lanes [0,H) <- sigmoid(f)
    g_g = pltpu.roll(th, G - 2 * H, axis=1)  # lanes [0,H) <- tanh(g)
    o_g = pltpu.roll(s, G - 3 * H, axis=1)   # lanes [0,H) <- sigmoid(o)
    c_new = f_g * c + i_g * g_g
    h_new = o_g * jnp.tanh(c_new)
    return h_new, c_new


def charrnn_kernel(x_ref, h0_ref, c0_ref,
                   w_ih0_ref, w_hh0_ref, b0_ref,
                   w_ih1_ref, w_hh1_ref, b1_ref,
                   w_fc_ref, b_fc_ref,
                   out_ref, hn_ref, cn_ref):
    f32 = jnp.float32

    # Layer-0 input-side gates for every timestep (bias folded).  (T*B, G) f32
    # is only 2 vregs, so it stays in registers - no scratch, no per-step
    # VMEM reloads inside the serial recurrence.
    gin0 = (jnp.dot(x_ref[...], w_ih0_ref[...], preferred_element_type=f32)
            + b0_ref[...])

    b1 = b1_ref[...]
    b_fc = b_fc_ref[...]

    h0s, c0s = h0_ref[0], c0_ref[0]          # layer-0 running state (B, G)
    h1s, c1s = h0_ref[1], c0_ref[1]          # layer-1 running state (B, G)

    # Wavefronted, fully-unrolled recurrence (T is static).  Layer-1 step t and
    # its fc projection are independent of layer-0 step t+1, so the scheduler
    # can pipeline them against the next layer-0 recurrent matmul.
    for t in range(T):
        # ---- layer 0, step t ----
        g0 = gin0[t * B:(t + 1) * B, :] + jnp.dot(
            h0s, w_hh0_ref[...], preferred_element_type=f32)
        h0s, c0s = _lstm_act(g0, c0s)

        # ---- layer 1, step t (inter-layer dropout = identity in eval) ----
        # Split rather than fused (B, 256) contraction: the h1_{t-1} half is
        # off the cross-layer critical path and can overlap layer-0 step t.
        g1 = (jnp.dot(h0s, w_ih1_ref[...], preferred_element_type=f32)
              + jnp.dot(h1s, w_hh1_ref[...], preferred_element_type=f32)
              + b1)
        h1s, c1s = _lstm_act(g1, c1s)

        # ---- fc projection streamed into the loop (off the dependency chain).
        # Lane-dense (B, 128) rows; zero-padded w_fc rows/cols kill junk lanes.
        out_ref[t * B:(t + 1) * B, :] = (
            jnp.dot(h1s, w_fc_ref[...], preferred_element_type=f32) + b_fc)

    # Final states: lane-dense padded stores; the wrapper slices [:, :, :H].
    hn_ref[...] = jnp.stack([h0s, h1s])
    cn_ref[...] = jnp.stack([c0s, c1s])


def prepare_params(params):
    """One-time weight preparation (transpose / zero-pad / bias fold).

    Call once, outside the per-forward hot path, and reuse the result; this
    removes ~320 KiB of per-call padded-weight materialization from the
    latency-bound forward.
    """
    (w_ih0, w_hh0, b_ih0, b_hh0,
     w_ih1, w_hh1, b_ih1, b_hh1,
     w_fc, b_fc) = params
    f32 = jnp.float32

    def pad_rows(w_t):                       # (H, G) -> (G, G), zero rows >= H
        return jnp.zeros((G, w_t.shape[1]), f32).at[:w_t.shape[0], :].set(w_t)

    w_ih0_t = jnp.asarray(w_ih0.T, f32)                       # (V, G)
    w_hh0_p = pad_rows(jnp.asarray(w_hh0.T, f32))             # (G, G)
    b0 = (b_ih0 + b_hh0).reshape(1, G).astype(f32)
    w_ih1_p = pad_rows(jnp.asarray(w_ih1.T, f32))             # (G, G)
    w_hh1_p = pad_rows(jnp.asarray(w_hh1.T, f32))             # (G, G)
    b1 = (b_ih1 + b_hh1).reshape(1, G).astype(f32)
    w_fc_pad = jnp.zeros((G, G), f32).at[:H, :V].set(jnp.asarray(w_fc.T, f32))
    b_fc_pad = jnp.zeros((1, G), f32).at[0, :V].set(jnp.asarray(b_fc, f32))
    return (w_ih0_t, w_hh0_p, b0, w_ih1_p, w_hh1_p, b1, w_fc_pad, b_fc_pad)


@jax.jit
def charrnn_forward(x, hidden, prep):
    """x: (B, T, V) batch_first; hidden: ((L,B,H), (L,B,H)); prep: prepare_params(...).

    Returns (out (B*T, V), (hn, cn)) matching the PyTorch module's forward
    (eval mode).
    """
    h0, c0 = hidden
    (w_ih0_t, w_hh0_p, b0, w_ih1_p, w_hh1_p, b1, w_fc_pad, b_fc_pad) = prep
    f32 = jnp.float32

    # Time-major flattened input rows (row = t*B + b), padded 128-lane states.
    x_flat = jnp.transpose(x, (1, 0, 2)).reshape(T * B, V)
    h0_pad = jnp.zeros((L, B, G), f32).at[:, :, :H].set(h0)
    c0_pad = jnp.zeros((L, B, G), f32).at[:, :, :H].set(c0)

    kernel_args = (
        x_flat, h0_pad, c0_pad,
        w_ih0_t, w_hh0_p, b0,
        w_ih1_p, w_hh1_p, b1,
        w_fc_pad, b_fc_pad,
    )

    # NOTE(scale-up): for realistic sizes, cast matmul operands to bf16 (f32
    # accumulation) and add a batch grid axis with
    # dimension_semantics=("parallel",).  At B=2 / H=32 the kernel is pure
    # latency, so fp32 / grid-less (single TensorCore, incl. on v7x) is best.
    vmem = pl.BlockSpec(memory_space=pltpu.MemorySpace.VMEM)
    out_slab, hn_pad, cn_pad = pl.pallas_call(
        charrnn_kernel,
        out_shape=(
            jax.ShapeDtypeStruct((T * B, G), f32),   # lane-dense logits slab
            jax.ShapeDtypeStruct((L, B, G), f32),    # lane-dense hn slab
            jax.ShapeDtypeStruct((L, B, G), f32),    # lane-dense cn slab
        ),
        in_specs=[vmem] * len(kernel_args),
        out_specs=(vmem, vmem, vmem),
    )(*kernel_args)

    # Slab rows are (t, b)-ordered; PyTorch's .view(-1, H) row order is (b, t).
    out = (out_slab[:, :V].reshape(T, B, V)
           .transpose(1, 0, 2).reshape(B * T, V))
    return out, (hn_pad[:, :, :H], cn_pad[:, :, :H])


def charrnn_ref(x, hidden, params):
    """Pure-JAX reference of the PyTorch forward (eval mode)."""
    (w_ih0, w_hh0, b_ih0, b_hh0,
     w_ih1, w_hh1, b_ih1, b_hh1,
     w_fc, b_fc) = params
    h0, c0 = hidden

    def cell(xt, h, c, w_ih, w_hh, b_ih, b_hh):
        gates = xt @ w_ih.T + b_ih + h @ w_hh.T + b_hh
        i, f, g, o = jnp.split(gates, 4, axis=-1)
        i, f, g, o = jax.nn.sigmoid(i), jax.nn.sigmoid(f), jnp.tanh(g), jax.nn.sigmoid(o)
        c = f * c + i * g
        h = o * jnp.tanh(c)
        return h, c

    h_a, c_a = h0[0], c0[0]
    h_b, c_b = h0[1], c0[1]
    outs = []
    for t in range(T):
        xt = x[:, t, :]
        h_a, c_a = cell(xt, h_a, c_a, w_ih0, w_hh0, b_ih0, b_hh0)
        h_b, c_b = cell(h_a, h_b, c_b, w_ih1, w_hh1, b_ih1, b_hh1)
        outs.append(h_b)
    r = jnp.stack(outs, axis=1)                        # (B, T, H)
    out = r.reshape(-1, H) @ w_fc.T + b_fc             # (B*T, V)
    return out, (jnp.stack([h_a, h_b]), jnp.stack([c_a, c_b]))


def init_params(key):
    """Deterministic init, PyTorch-style U(-1/sqrt(H), 1/sqrt(H))."""
    bound = 1.0 / jnp.sqrt(jnp.float32(H))
    shapes = [
        (4 * H, V), (4 * H, H), (4 * H,), (4 * H,),    # layer 0
        (4 * H, H), (4 * H, H), (4 * H,), (4 * H,),    # layer 1
        (V, H), (V,),                                  # fc
    ]
    keys = jax.random.split(key, len(shapes))
    return tuple(
        jax.random.uniform(k, s, jnp.float32, -bound, bound)
        for k, s in zip(keys, shapes)
    )


if __name__ == "__main__":
    key = jax.random.PRNGKey(0)
    k_x, k_p = jax.random.split(key)

    # Any float input of width V is valid for nn.LSTM (one-hot chars in practice).
    x = jax.random.normal(k_x, (B, T, V), jnp.float32)
    hidden = (jnp.zeros((L, B, H), jnp.float32),       # init_hidden()
              jnp.zeros((L, B, H), jnp.float32))
    params = init_params(k_p)
    prep = prepare_params(params)                      # one-time weight prep

    out, (hn, cn) = charrnn_forward(x, hidden, prep)
    jax.block_until_ready((out, hn, cn))

    out_r, (hn_r, cn_r) = charrnn_ref(x, hidden, params)
    assert out.shape == (B * T, V)
    assert jnp.allclose(out, out_r, atol=1e-4, rtol=1e-4)
    assert jnp.allclose(hn, hn_r, atol=1e-4, rtol=1e-4)
    assert jnp.allclose(cn, cn_r, atol=1e-4, rtol=1e-4)

    print("KERNEL_OK")
</pallas_src>

<mosaic_0001>
module attributes {stable_mosaic.version = 11 : i64} {
  func.func @charrnn_kernel(%arg0: memref<16x16xf32, #tpu.memory_space<vmem>>, %arg1: memref<2x2x128xf32, #tpu.memory_space<vmem>>, %arg2: memref<2x2x128xf32, #tpu.memory_space<vmem>>, %arg3: memref<16x128xf32, #tpu.memory_space<vmem>>, %arg4: memref<128x128xf32, #tpu.memory_space<vmem>>, %arg5: memref<1x128xf32, #tpu.memory_space<vmem>>, %arg6: memref<128x128xf32, #tpu.memory_space<vmem>>, %arg7: memref<128x128xf32, #tpu.memory_space<vmem>>, %arg8: memref<1x128xf32, #tpu.memory_space<vmem>>, %arg9: memref<128x128xf32, #tpu.memory_space<vmem>>, %arg10: memref<1x128xf32, #tpu.memory_space<vmem>>, %arg11: memref<16x128xf32, #tpu.memory_space<vmem>>, %arg12: memref<2x2x128xf32, #tpu.memory_space<vmem>>, %arg13: memref<2x2x128xf32, #tpu.memory_space<vmem>>) attributes {dimension_semantics = [], scalar_prefetch = 0 : i64, scratch_operands = 0 : i64, tpu.core_type = #tpu.core_type<tc>} {
    %c0 = arith.constant 0 : index
    %c0_0 = arith.constant 0 : index
    %0 = vector.load %arg0[%c0, %c0_0] : memref<16x16xf32, #tpu.memory_space<vmem>>, vector<16x16xf32>
    %c0_1 = arith.constant 0 : index
    %c0_2 = arith.constant 0 : index
    %1 = vector.load %arg3[%c0_1, %c0_2] : memref<16x128xf32, #tpu.memory_space<vmem>>, vector<16x128xf32>
    %cst = arith.constant dense<0.000000e+00> : vector<16x128xf32>
    %2 = tpu.matmul %0, %1, %cst {dimension_numbers = #tpu.dot_dimension_numbers<[1], [0], [0], [1], [0, 0, 1, 1], [], []>} : vector<16x16xf32>, vector<16x128xf32>, vector<16x128xf32> -> vector<16x128xf32>
    %c0_3 = arith.constant 0 : index
    %c0_4 = arith.constant 0 : index
    %3 = vector.load %arg5[%c0_3, %c0_4] : memref<1x128xf32, #tpu.memory_space<vmem>>, vector<1x128xf32>
    %4 = vector.broadcast %3 : vector<1x128xf32> to vector<16x128xf32>
    %5 = arith.addf %2, %4 : vector<16x128xf32>
    %c0_5 = arith.constant 0 : index
    %c0_6 = arith.constant 0 : index
    %6 = vector.load %arg8[%c0_5, %c0_6] : memref<1x128xf32, #tpu.memory_space<vmem>>, vector<1x128xf32>
    %c0_7 = arith.constant 0 : index
    %c0_8 = arith.constant 0 : index
    %7 = vector.load %arg10[%c0_7, %c0_8] : memref<1x128xf32, #tpu.memory_space<vmem>>, vector<1x128xf32>
    %c0_9 = arith.constant 0 : index
    %c0_10 = arith.constant 0 : index
    %c0_11 = arith.constant 0 : index
    %8 = vector.load %arg1[%c0_9, %c0_10, %c0_11] : memref<2x2x128xf32, #tpu.memory_space<vmem>>, vector<1x2x128xf32>
    %9 = vector.shape_cast %8 : vector<1x2x128xf32> to vector<2x128xf32>
    %c0_12 = arith.constant 0 : index
    %c0_13 = arith.constant 0 : index
    %c0_14 = arith.constant 0 : index
    %10 = vector.load %arg2[%c0_12, %c0_13, %c0_14] : memref<2x2x128xf32, #tpu.memory_space<vmem>>, vector<1x2x128xf32>
    %11 = vector.shape_cast %10 : vector<1x2x128xf32> to vector<2x128xf32>
    %c1 = arith.constant 1 : index
    %c0_15 = arith.constant 0 : index
    %c0_16 = arith.constant 0 : index
    %12 = vector.load %arg1[%c1, %c0_15, %c0_16] : memref<2x2x128xf32, #tpu.memory_space<vmem>>, vector<1x2x128xf32>
    %13 = vector.shape_cast %12 : vector<1x2x128xf32> to vector<2x128xf32>
    %c1_17 = arith.constant 1 : index
    %c0_18 = arith.constant 0 : index
    %c0_19 = arith.constant 0 : index
    %14 = vector.load %arg2[%c1_17, %c0_18, %c0_19] : memref<2x2x128xf32, #tpu.memory_space<vmem>>, vector<1x2x128xf32>
    %15 = vector.shape_cast %14 : vector<1x2x128xf32> to vector<2x128xf32>
    %16 = vector.extract_strided_slice %5 {offsets = [0, 0], sizes = [2, 128], strides = [1, 1]} : vector<16x128xf32> to vector<2x128xf32>
    %c0_20 = arith.constant 0 : index
    %c0_21 = arith.constant 0 : index
    %17 = vector.load %arg4[%c0_20, %c0_21] : memref<128x128xf32, #tpu.memory_space<vmem>>, vector<128x128xf32>
    %cst_22 = arith.constant dense<0.000000e+00> : vector<2x128xf32>
    %18 = tpu.matmul %9, %17, %cst_22 {dimension_numbers = #tpu.dot_dimension_numbers<[1], [0], [0], [1], [0, 0, 1, 1], [], []>} : vector<2x128xf32>, vector<128x128xf32>, vector<2x128xf32> -> vector<2x128xf32>
    %19 = arith.addf %16, %18 : vector<2x128xf32>
    %20 = arith.negf %19 : vector<2x128xf32>
    %21 = math.exp %20 : vector<2x128xf32>
    %cst_23 = arith.constant 1.000000e+00 : f32
    %22 = vector.broadcast %cst_23 : f32 to vector<2x128xf32>
    %23 = arith.addf %22, %21 : vector<2x128xf32>
    %24 = arith.divf %22, %23 : vector<2x128xf32>
    %25 = math.tanh %19 : vector<2x128xf32>
    %c96_i32 = arith.constant 96 : i32
    %26 = tpu.dynamic_rotate %24 by %c96_i32 dim 1 : vector<2x128xf32>, i32 -> vector<2x128xf32>
    %c64_i32 = arith.constant 64 : i32
    %27 = tpu.dynamic_rotate %25 by %c64_i32 dim 1 : vector<2x128xf32>, i32 -> vector<2x128xf32>
    %c32_i32 = arith.constant 32 : i32
    %28 = tpu.dynamic_rotate %24 by %c32_i32 dim 1 : vector<2x128xf32>, i32 -> vector<2x128xf32>
    %29 = arith.mulf %26, %11 : vector<2x128xf32>
    %30 = arith.mulf %24, %27 : vector<2x128xf32>
    %31 = arith.addf %29, %30 : vector<2x128xf32>
    %32 = math.tanh %31 : vector<2x128xf32>
    %33 = arith.mulf %28, %32 : vector<2x128xf32>
    %c0_24 = arith.constant 0 : index
    %c0_25 = arith.constant 0 : index
    %34 = vector.load %arg6[%c0_24, %c0_25] : memref<128x128xf32, #tpu.memory_space<vmem>>, vector<128x128xf32>
    %cst_26 = arith.constant dense<0.000000e+00> : vector<2x128xf32>
    %35 = tpu.matmul %33, %34, %cst_26 {dimension_numbers = #tpu.dot_dimension_numbers<[1], [0], [0], [1], [0, 0, 1, 1], [], []>} : vector<2x128xf32>, vector<128x128xf32>, vector<2x128xf32> -> vector<2x128xf32>
    %c0_27 = arith.constant 0 : index
    %c0_28 = arith.constant 0 : index
    %36 = vector.load %arg7[%c0_27, %c0_28] : memref<128x128xf32, #tpu.memory_space<vmem>>, vector<128x128xf32>
    %cst_29 = arith.constant dense<0.000000e+00> : vector<2x128xf32>
    %37 = tpu.matmul %13, %36, %cst_29 {dimension_numbers = #tpu.dot_dimension_numbers<[1], [0], [0], [1], [0, 0, 1, 1], [], []>} : vector<2x128xf32>, vector<128x128xf32>, vector<2x128xf32> -> vector<2x128xf32>
    %38 = arith.addf %35, %37 : vector<2x128xf32>
    %39 = vector.broadcast %6 : vector<1x128xf32> to vector<2x128xf32>
    %40 = arith.addf %38, %39 : vector<2x128xf32>
    %41 = arith.negf %40 : vector<2x128xf32>
    %42 = math.exp %41 : vector<2x128xf32>
    %cst_30 = arith.constant 1.000000e+00 : f32
    %43 = vector.broadcast %cst_30 : f32 to vector<2x128xf32>
    %44 = arith.addf %43, %42 : vector<2x128xf32>
    %45 = arith.divf %43, %44 : vector<2x128xf32>
    %46 = math.tanh %40 : vector<2x128xf32>
    %c96_i32_31 = arith.constant 96 : i32
    %47 = tpu.dynamic_rotate %45 by %c96_i32_31 dim 1 : vector<2x128xf32>, i32 -> vector<2x128xf32>
    %c64_i32_32 = arith.constant 64 : i32
    %48 = tpu.dynamic_rotate %46 by %c64_i32_32 dim 1 : vector<2x128xf32>, i32 -> vector<2x128xf32>
    %c32_i32_33 = arith.constant 32 : i32
    %49 = tpu.dynamic_rotate %45 by %c32_i32_33 dim 1 : vector<2x128xf32>, i32 -> vector<2x128xf32>
    %50 = arith.mulf %47, %15 : vector<2x128xf32>
    %51 = arith.mulf %45, %48 : vector<2x128xf32>
    %52 = arith.addf %50, %51 : vector<2x128xf32>
    %53 = math.tanh %52 : vector<2x128xf32>
    %54 = arith.mulf %49, %53 : vector<2x128xf32>
    %c0_34 = arith.constant 0 : index
    %c0_35 = arith.constant 0 : index
    %55 = vector.load %arg9[%c0_34, %c0_35] : memref<128x128xf32, #tpu.memory_space<vmem>>, vector<128x128xf32>
    %cst_36 = arith.constant dense<0.000000e+00> : vector<2x128xf32>
    %56 = tpu.matmul %54, %55, %cst_36 {dimension_numbers = #tpu.dot_dimension_numbers<[1], [0], [0], [1], [0, 0, 1, 1], [], []>} : vector<2x128xf32>, vector<128x128xf32>, vector<2x128xf32> -> vector<2x128xf32>
    %57 = vector.broadcast %7 : vector<1x128xf32> to vector<2x128xf32>
    %58 = arith.addf %56, %57 : vector<2x128xf32>
    %c0_37 = arith.constant 0 : index
    %c0_38 = arith.constant 0 : index
    %59 = vector.load %arg11[%c0_37, %c0_38] : memref<16x128xf32, #tpu.memory_space<vmem>>, vector<2x128xf32>
    tpu.vector_store %arg11[%c0_37, %c0_38], %58 {strides = array<i32>} : memref<16x128xf32, #tpu.memory_space<vmem>>, vector<2x128xf32>,
    %60 = vector.extract_strided_slice %5 {offsets = [2, 0], sizes = [2, 128], strides = [1, 1]} : vector<16x128xf32> to vector<2x128xf32>
    %c0_39 = arith.constant 0 : index
    %c0_40 = arith.constant 0 : index
    %61 = vector.load %arg4[%c0_39, %c0_40] : memref<128x128xf32, #tpu.memory_space<vmem>>, vector<128x128xf32>
    %cst_41 = arith.constant dense<0.000000e+00> : vector<2x128xf32>
    %62 = tpu.matmul %33, %61, %cst_41 {dimension_numbers = #tpu.dot_dimension_numbers<[1], [0], [0], [1], [0, 0, 1, 1], [], []>} : vector<2x128xf32>, vector<128x128xf32>, vector<2x128xf32> -> vector<2x128xf32>
    %63 = arith.addf %60, %62 : vector<2x128xf32>
    %64 = arith.negf %63 : vector<2x128xf32>
    %65 = math.exp %64 : vector<2x128xf32>
    %cst_42 = arith.constant 1.000000e+00 : f32
    %66 = vector.broadcast %cst_42 : f32 to vector<2x128xf32>
    %67 = arith.addf %66, %65 : vector<2x128xf32>
    %68 = arith.divf %66, %67 : vector<2x128xf32>
    %69 = math.tanh %63 : vector<2x128xf32>
    %c96_i32_43 = arith.constant 96 : i32
    %70 = tpu.dynamic_rotate %68 by %c96_i32_43 dim 1 : vector<2x128xf32>, i32 -> vector<2x128xf32>
    %c64_i32_44 = arith.constant 64 : i32
    %71 = tpu.dynamic_rotate %69 by %c64_i32_44 dim 1 : vector<2x128xf32>, i32 -> vector<2x128xf32>
    %c32_i32_45 = arith.constant 32 : i32
    %72 = tpu.dynamic_rotate %68 by %c32_i32_45 dim 1 : vector<2x128xf32>, i32 -> vector<2x128xf32>
    %73 = arith.mulf %70, %31 : vector<2x128xf32>
    %74 = arith.mulf %68, %71 : vector<2x128xf32>
    %75 = arith.addf %73, %74 : vector<2x128xf32>
    %76 = math.tanh %75 : vector<2x128xf32>
    %77 = arith.mulf %72, %76 : vector<2x128xf32>
    %c0_46 = arith.constant 0 : index
    %c0_47 = arith.constant 0 : index
    %78 = vector.load %arg6[%c0_46, %c0_47] : memref<128x128xf32, #tpu.memory_space<vmem>>, vector<128x128xf32>
    %cst_48 = arith.constant dense<0.000000e+00> : vector<2x128xf32>
    %79 = tpu.matmul %77, %78, %cst_48 {dimension_numbers = #tpu.dot_dimension_numbers<[1], [0], [0], [1], [0, 0, 1, 1], [], []>} : vector<2x128xf32>, vector<128x128xf32>, vector<2x128xf32> -> vector<2x128xf32>
    %c0_49 = arith.constant 0 : index
    %c0_50 = arith.constant 0 : index
    %80 = vector.load %arg7[%c0_49, %c0_50] : memref<128x128xf32, #tpu.memory_space<vmem>>, vector<128x128xf32>
    %cst_51 = arith.constant dense<0.000000e+00> : vector<2x128xf32>
    %81 = tpu.matmul %54, %80, %cst_51 {dimension_numbers = #tpu.dot_dimension_numbers<[1], [0], [0], [1], [0, 0, 1, 1], [], []>} : vector<2x128xf32>, vector<128x128xf32>, vector<2x128xf32> -> vector<2x128xf32>
    %82 = arith.addf %79, %81 : vector<2x128xf32>
    %83 = vector.broadcast %6 : vector<1x128xf32> to vector<2x128xf32>
    %84 = arith.addf %82, %83 : vector<2x128xf32>
    %85 = arith.negf %84 : vector<2x128xf32>
    %86 = math.exp %85 : vector<2x128xf32>
    %cst_52 = arith.constant 1.000000e+00 : f32
    %87 = vector.broadcast %cst_52 : f32 to vector<2x128xf32>
    %88 = arith.addf %87, %86 : vector<2x128xf32>
    %89 = arith.divf %87, %88 : vector<2x128xf32>
    %90 = math.tanh %84 : vector<2x128xf32>
    %c96_i32_53 = arith.constant 96 : i32
    %91 = tpu.dynamic_rotate %89 by %c96_i32_53 dim 1 : vector<2x128xf32>, i32 -> vector<2x128xf32>
    %c64_i32_54 = arith.constant 64 : i32
    %92 = tpu.dynamic_rotate %90 by %c64_i32_54 dim 1 : vector<2x128xf32>, i32 -> vector<2x128xf32>
    %c32_i32_55 = arith.constant 32 : i32
    %93 = tpu.dynamic_rotate %89 by %c32_i32_55 dim 1 : vector<2x128xf32>, i32 -> vector<2x128xf32>
    %94 = arith.mulf %91, %52 : vector<2x128xf32>
    %95 = arith.mulf %89, %92 : vector<2x128xf32>
    %96 = arith.addf %94, %95 : vector<2x128xf32>
    %97 = math.tanh %96 : vector<2x128xf32>
    %98 = arith.mulf %93, %97 : vector<2x128xf32>
    %c0_56 = arith.constant 0 : index
    %c0_57 = arith.constant 0 : index
    %99 = vector.load %arg9[%c0_56, %c0_57] : memref<128x128xf32, #tpu.memory_space<vmem>>, vector<128x128xf32>
    %cst_58 = arith.constant dense<0.000000e+00> : vector<2x128xf32>
    %100 = tpu.matmul %98, %99, %cst_58 {dimension_numbers = #tpu.dot_dimension_numbers<[1], [0], [0], [1], [0, 0, 1, 1], [], []>} : vector<2x128xf32>, vector<128x128xf32>, vector<2x128xf32> -> vector<2x128xf32>
    %101 = vector.broadcast %7 : vector<1x128xf32> to vector<2x128xf32>
    %102 = arith.addf %100, %101 : vector<2x128xf32>
    %c2 = arith.constant 2 : index
    %c0_59 = arith.constant 0 : index
    %103 = vector.load %arg11[%c2, %c0_59] : memref<16x128xf32, #tpu.memory_space<vmem>>, vector<2x128xf32>
    tpu.vector_store %arg11[%c2, %c0_59], %102 {strides = array<i32>} : memref<16x128xf32, #tpu.memory_space<vmem>>, vector<2x128xf32>,
    %104 = vector.extract_strided_slice %5 {offsets = [4, 0], sizes = [2, 128], strides = [1, 1]} : vector<16x128xf32> to vector<2x128xf32>
    %c0_60 = arith.constant 0 : index
    %c0_61 = arith.constant 0 : index
    %105 = vector.load %arg4[%c0_60, %c0_61] : memref<128x128xf32, #tpu.memory_space<vmem>>, vector<128x128xf32>
    %cst_62 = arith.constant dense<0.000000e+00> : vector<2x128xf32>
    %106 = tpu.matmul %77, %105, %cst_62 {dimension_numbers = #tpu.dot_dimension_numbers<[1], [0], [0], [1], [0, 0, 1, 1], [], []>} : vector<2x128xf32>, vector<128x128xf32>, vector<2x128xf32> -> vector<2x128xf32>
    %107 = arith.addf %104, %106 : vector<2x128xf32>
    %108 = arith.negf %107 : vector<2x128xf32>
    %109 = math.exp %108 : vector<2x128xf32>
    %cst_63 = arith.constant 1.000000e+00 : f32
    %110 = vector.broadcast %cst_63 : f32 to vector<2x128xf32>
    %111 = arith.addf %110, %109 : vector<2x128xf32>
    %112 = arith.divf %110, %111 : vector<2x128xf32>
    %113 = math.tanh %107 : vector<2x128xf32>
    %c96_i32_64 = arith.constant 96 : i32
    %114 = tpu.dynamic_rotate %112 by %c96_i32_64 dim 1 : vector<2x128xf32>, i32 -> vector<2x128xf32>
    %c64_i32_65 = arith.constant 64 : i32
    %115 = tpu.dynamic_rotate %113 by %c64_i32_65 dim 1 : vector<2x128xf32>, i32 -> vector<2x128xf32>
    %c32_i32_66 = arith.constant 32 : i32
    %116 = tpu.dynamic_rotate %112 by %c32_i32_66 dim 1 : vector<2x128xf32>, i32 -> vector<2x128xf32>
    %117 = arith.mulf %114, %75 : vector<2x128xf32>
    %118 = arith.mulf %112, %115 : vector<2x128xf32>
    %119 = arith.addf %117, %118 : vector<2x128xf32>
    %120 = math.tanh %119 : vector<2x128xf32>
    %121 = arith.mulf %116, %120 : vector<2x128xf32>
    %c0_67 = arith.constant 0 : index
    %c0_68 = arith.constant 0 : index
    %122 = vector.load %arg6[%c0_67, %c0_68] : memref<128x128xf32, #tpu.memory_space<vmem>>, vector<128x128xf32>
    %cst_69 = arith.constant dense<0.000000e+00> : vector<2x128xf32>
    %123 = tpu.matmul %121, %122, %cst_69 {dimension_numbers = #tpu.dot_dimension_numbers<[1], [0], [0], [1], [0, 0, 1, 1], [], []>} : vector<2x128xf32>, vector<128x128xf32>, vector<2x128xf32> -> vector<2x128xf32>
    %c0_70 = arith.constant 0 : index
    %c0_71 = arith.constant 0 : index
    %124 = vector.load %arg7[%c0_70, %c0_71] : memref<128x128xf32, #tpu.memory_space<vmem>>, vector<128x128xf32>
    %cst_72 = arith.constant dense<0.000000e+00> : vector<2x128xf32>
    %125 = tpu.matmul %98, %124, %cst_72 {dimension_numbers = #tpu.dot_dimension_numbers<[1], [0], [0], [1], [0, 0, 1, 1], [], []>} : vector<2x128xf32>, vector<128x128xf32>, vector<2x128xf32> -> vector<2x128xf32>
    %126 = arith.addf %123, %125 : vector<2x128xf32>
    %127 = vector.broadcast %6 : vector<1x128xf32> to vector<2x128xf32>
    %128 = arith.addf %126, %127 : vector<2x128xf32>
    %129 = arith.negf %128 : vector<2x128xf32>
    %130 = math.exp %129 : vector<2x128xf32>
    %cst_73 = arith.constant 1.000000e+00 : f32
    %131 = vector.broadcast %cst_73 : f32 to vector<2x128xf32>
    %132 = arith.addf %131, %130 : vector<2x128xf32>
    %133 = arith.divf %131, %132 : vector<2x128xf32>
    %134 = math.tanh %128 : vector<2x128xf32>
    %c96_i32_74 = arith.constant 96 : i32
    %135 = tpu.dynamic_rotate %133 by %c96_i32_74 dim 1 : vector<2x128xf32>, i32 -> vector<2x128xf32>
    %c64_i32_75 = arith.constant 64 : i32
    %136 = tpu.dynamic_rotate %134 by %c64_i32_75 dim 1 : vector<2x128xf32>, i32 -> vector<2x128xf32>
    %c32_i32_76 = arith.constant 32 : i32
    %137 = tpu.dynamic_rotate %133 by %c32_i32_76 dim 1 : vector<2x128xf32>, i32 -> vector<2x128xf32>
    %138 = arith.mulf %135, %96 : vector<2x128xf32>
    %139 = arith.mulf %133, %136 : vector<2x128xf32>
    %140 = arith.addf %138, %139 : vector<2x128xf32>
    %141 = math.tanh %140 : vector<2x128xf32>
    %142 = arith.mulf %137, %141 : vector<2x128xf32>
    %c0_77 = arith.constant 0 : index
    %c0_78 = arith.constant 0 : index
    %143 = vector.load %arg9[%c0_77, %c0_78] : memref<128x128xf32, #tpu.memory_space<vmem>>, vector<128x128xf32>
    %cst_79 = arith.constant dense<0.000000e+00> : vector<2x128xf32>
    %144 = tpu.matmul %142, %143, %cst_79 {dimension_numbers = #tpu.dot_dimension_numbers<[1], [0], [0], [1], [0, 0, 1, 1], [], []>} : vector<2x128xf32>, vector<128x128xf32>, vector<2x128xf32> -> vector<2x128xf32>
    %145 = vector.broadcast %7 : vector<1x128xf32> to vector<2x128xf32>
    %146 = arith.addf %144, %145 : vector<2x128xf32>
    %c4 = arith.constant 4 : index
    %c0_80 = arith.constant 0 : index
    %147 = vector.load %arg11[%c4, %c0_80] : memref<16x128xf32, #tpu.memory_space<vmem>>, vector<2x128xf32>
    tpu.vector_store %arg11[%c4, %c0_80], %146 {strides = array<i32>} : memref<16x128xf32, #tpu.memory_space<vmem>>, vector<2x128xf32>,
    %148 = vector.extract_strided_slice %5 {offsets = [6, 0], sizes = [2, 128], strides = [1, 1]} : vector<16x128xf32> to vector<2x128xf32>
    %c0_81 = arith.constant 0 : index
    %c0_82 = arith.constant 0 : index
    %149 = vector.load %arg4[%c0_81, %c0_82] : memref<128x128xf32, #tpu.memory_space<vmem>>, vector<128x128xf32>
    %cst_83 = arith.constant dense<0.000000e+00> : vector<2x128xf32>
    %150 = tpu.matmul %121, %149, %cst_83 {dimension_numbers = #tpu.dot_dimension_numbers<[1], [0], [0], [1], [0, 0, 1, 1], [], []>} : vector<2x128xf32>, vector<128x128xf32>, vector<2x128xf32> -> vector<2x128xf32>
    %151 = arith.addf %148, %150 : vector<2x128xf32>
    %152 = arith.negf %151 : vector<2x128xf32>
    %153 = math.exp %152 : vector<2x128xf32>
    %cst_84 = arith.constant 1.000000e+00 : f32
    %154 = vector.broadcast %cst_84 : f32 to vector<2x128xf32>
    %155 = arith.addf %154, %153 : vector<2x128xf32>
    %156 = arith.divf %154, %155 : vector<2x128xf32>
    %157 = math.tanh %151 : vector<2x128xf32>
    %c96_i32_85 = arith.constant 96 : i32
    %158 = tpu.dynamic_rotate %156 by %c96_i32_85 dim 1 : vector<2x128xf32>, i32 -> vector<2x128xf32>
    %c64_i32_86 = arith.constant 64 : i32
    %159 = tpu.dynamic_rotate %157 by %c64_i32_86 dim 1 : vector<2x128xf32>, i32 -> vector<2x128xf32>
    %c32_i32_87 = arith.constant 32 : i32
    %160 = tpu.dynamic_rotate %156 by %c32_i32_87 dim 1 : vector<2x128xf32>, i32 -> vector<2x128xf32>
    %161 = arith.mulf %158, %119 : vector<2x128xf32>
    %162 = arith.mulf %156, %159 : vector<2x128xf32>
    %163 = arith.addf %161, %162 : vector<2x128xf32>
    %164 = math.tanh %163 : vector<2x128xf32>
    %165 = arith.mulf %160, %164 : vector<2x128xf32>
    %c0_88 = arith.constant 0 : index
    %c0_89 = arith.constant 0 : index
    %166 = vector.load %arg6[%c0_88, %c0_89] : memref<128x128xf32, #tpu.memory_space<vmem>>, vector<128x128xf32>
    %cst_90 = arith.constant dense<0.000000e+00> : vector<2x128xf32>
    %167 = tpu.matmul %165, %166, %cst_90 {dimension_numbers = #tpu.dot_dimension_numbers<[1], [0], [0], [1], [0, 0, 1, 1], [], []>} : vector<2x128xf32>, vector<128x128xf32>, vector<2x128xf32> -> vector<2x128xf32>
    %c0_91 = arith.constant 0 : index
    %c0_92 = arith.constant 0 : index
    %168 = vector.load %arg7[%c0_91, %c0_92] : memref<128x128xf32, #tpu.memory_space<vmem>>, vector<128x128xf32>
    %cst_93 = arith.constant dense<0.000000e+00> : vector<2x128xf32>
    %169 = tpu.matmul %142, %168, %cst_93 {dimension_numbers = #tpu.dot_dimension_numbers<[1], [0], [0], [1], [0, 0, 1, 1], [], []>} : vector<2x128xf32>, vector<128x128xf32>, vector<2x128xf32> -> vector<2x128xf32>
    %170 = arith.addf %167, %169 : vector<2x128xf32>
    %171 = vector.broadcast %6 : vector<1x128xf32> to vector<2x128xf32>
    %172 = arith.addf %170, %171 : vector<2x128xf32>
    %173 = arith.negf %172 : vector<2x128xf32>
    %174 = math.exp %173 : vector<2x128xf32>
    %cst_94 = arith.constant 1.000000e+00 : f32
    %175 = vector.broadcast %cst_94 : f32 to vector<2x128xf32>
    %176 = arith.addf %175, %174 : vector<2x128xf32>
    %177 = arith.divf %175, %176 : vector<2x128xf32>
    %178 = math.tanh %172 : vector<2x128xf32>
    %c96_i32_95 = arith.constant 96 : i32
    %179 = tpu.dynamic_rotate %177 by %c96_i32_95 dim 1 : vector<2x128xf32>, i32 -> vector<2x128xf32>
    %c64_i32_96 = arith.constant 64 : i32
    %180 = tpu.dynamic_rotate %178 by %c64_i32_96 dim 1 : vector<2x128xf32>, i32 -> vector<2x128xf32>
    %c32_i32_97 = arith.constant 32 : i32
    %181 = tpu.dynamic_rotate %177 by %c32_i32_97 dim 1 : vector<2x128xf32>, i32 -> vector<2x128xf32>
    %182 = arith.mulf %179, %140 : vector<2x128xf32>
    %183 = arith.mulf %177, %180 : vector<2x128xf32>
    %184 = arith.addf %182, %183 : vector<2x128xf32>
    %185 = math.tanh %184 : vector<2x128xf32>
    %186 = arith.mulf %181, %185 : vector<2x128xf32>
    %c0_98 = arith.constant 0 : index
    %c0_99 = arith.constant 0 : index
    %187 = vector.load %arg9[%c0_98, %c0_99] : memref<128x128xf32, #tpu.memory_space<vmem>>, vector<128x128xf32>
    %cst_100 = arith.constant dense<0.000000e+00> : vector<2x128xf32>
    %188 = tpu.matmul %186, %187, %cst_100 {dimension_numbers = #tpu.dot_dimension_numbers<[1], [0], [0], [1], [0, 0, 1, 1], [], []>} : vector<2x128xf32>, vector<128x128xf32>, vector<2x128xf32> -> vector<2x128xf32>
    %189 = vector.broadcast %7 : vector<1x128xf32> to vector<2x128xf32>
    %190 = arith.addf %188, %189 : vector<2x128xf32>
    %c6 = arith.constant 6 : index
    %c0_101 = arith.constant 0 : index
    %191 = vector.load %arg11[%c6, %c0_101] : memref<16x128xf32, #tpu.memory_space<vmem>>, vector<2x128xf32>
    tpu.vector_store %arg11[%c6, %c0_101], %190 {strides = array<i32>} : memref<16x128xf32, #tpu.memory_space<vmem>>, vector<2x128xf32>,
    %192 = vector.extract_strided_slice %5 {offsets = [8, 0], sizes = [2, 128], strides = [1, 1]} : vector<16x128xf32> to vector<2x128xf32>
    %c0_102 = arith.constant 0 : index
    %c0_103 = arith.constant 0 : index
    %193 = vector.load %arg4[%c0_102, %c0_103] : memref<128x128xf32, #tpu.memory_space<vmem>>, vector<128x128xf32>
    %cst_104 = arith.constant dense<0.000000e+00> : vector<2x128xf32>
    %194 = tpu.matmul %165, %193, %cst_104 {dimension_numbers = #tpu.dot_dimension_numbers<[1], [0], [0], [1], [0, 0, 1, 1], [], []>} : vector<2x128xf32>, vector<128x128xf32>, vector<2x128xf32> -> vector<2x128xf32>
    %195 = arith.addf %192, %194 : vector<2x128xf32>
    %196 = arith.negf %195 : vector<2x128xf32>
    %197 = math.exp %196 : vector<2x128xf32>
    %cst_105 = arith.constant 1.000000e+00 : f32
    %198 = vector.broadcast %cst_105 : f32 to vector<2x128xf32>
    %199 = arith.addf %198, %197 : vector<2x128xf32>
    %200 = arith.divf %198, %199 : vector<2x128xf32>
    %201 = math.tanh %195 : vector<2x128xf32>
    %c96_i32_106 = arith.constant 96 : i32
    %202 = tpu.dynamic_rotate %200 by %c96_i32_106 dim 1 : vector<2x128xf32>, i32 -> vector<2x128xf32>
    %c64_i32_107 = arith.constant 64 : i32
    %203 = tpu.dynamic_rotate %201 by %c64_i32_107 dim 1 : vector<2x128xf32>, i32 -> vector<2x128xf32>
    %c32_i32_108 = arith.constant 32 : i32
    %204 = tpu.dynamic_rotate %200 by %c32_i32_108 dim 1 : vector<2x128xf32>, i32 -> vector<2x128xf32>
    %205 = arith.mulf %202, %163 : vector<2x128xf32>
    %206 = arith.mulf %200, %203 : vector<2x128xf32>
    %207 = arith.addf %205, %206 : vector<2x128xf32>
    %208 = math.tanh %207 : vector<2x128xf32>
    %209 = arith.mulf %204, %208 : vector<2x128xf32>
    %c0_109 = arith.constant 0 : index
    %c0_110 = arith.constant 0 : index
    %210 = vector.load %arg6[%c0_109, %c0_110] : memref<128x128xf32, #tpu.memory_space<vmem>>, vector<128x128xf32>
    %cst_111 = arith.constant dense<0.000000e+00> : vector<2x128xf32>
    %211 = tpu.matmul %209, %210, %cst_111 {dimension_numbers = #tpu.dot_dimension_numbers<[1], [0], [0], [1], [0, 0, 1, 1], [], []>} : vector<2x128xf32>, vector<128x128xf32>, vector<2x128xf32> -> vector<2x128xf32>
    %c0_112 = arith.constant 0 : index
    %c0_113 = arith.constant 0 : index
    %212 = vector.load %arg7[%c0_112, %c0_113] : memref<128x128xf32, #tpu.memory_space<vmem>>, vector<128x128xf32>
    %cst_114 = arith.constant dense<0.000000e+00> : vector<2x128xf32>
    %213 = tpu.matmul %186, %212, %cst_114 {dimension_numbers = #tpu.dot_dimension_numbers<[1], [0], [0], [1], [0, 0, 1, 1], [], []>} : vector<2x128xf32>, vector<128x128xf32>, vector<2x128xf32> -> vector<2x128xf32>
    %214 = arith.addf %211, %213 : vector<2x128xf32>
    %215 = vector.broadcast %6 : vector<1x128xf32> to vector<2x128xf32>
    %216 = arith.addf %214, %215 : vector<2x128xf32>
    %217 = arith.negf %216 : vector<2x128xf32>
    %218 = math.exp %217 : vector<2x128xf32>
    %cst_115 = arith.constant 1.000000e+00 : f32
    %219 = vector.broadcast %cst_115 : f32 to vector<2x128xf32>
    %220 = arith.addf %219, %218 : vector<2x128xf32>
    %221 = arith.divf %219, %220 : vector<2x128xf32>
    %222 = math.tanh %216 : vector<2x128xf32>
    %c96_i32_116 = arith.constant 96 : i32
    %223 = tpu.dynamic_rotate %221 by %c96_i32_116 dim 1 : vector<2x128xf32>, i32 -> vector<2x128xf32>
    %c64_i32_117 = arith.constant 64 : i32
    %224 = tpu.dynamic_rotate %222 by %c64_i32_117 dim 1 : vector<2x128xf32>, i32 -> vector<2x128xf32>
    %c32_i32_118 = arith.constant 32 : i32
    %225 = tpu.dynamic_rotate %221 by %c32_i32_118 dim 1 : vector<2x128xf32>, i32 -> vector<2x128xf32>
    %226 = arith.mulf %223, %184 : vector<2x128xf32>
    %227 = arith.mulf %221, %224 : vector<2x128xf32>
    %228 = arith.addf %226, %227 : vector<2x128xf32>
    %229 = math.tanh %228 : vector<2x128xf32>
    %230 = arith.mulf %225, %229 : vector<2x128xf32>
    %c0_119 = arith.constant 0 : index
    %c0_120 = arith.constant 0 : index
    %231 = vector.load %arg9[%c0_119, %c0_120] : memref<128x128xf32, #tpu.memory_space<vmem>>, vector<128x128xf32>
    %cst_121 = arith.constant dense<0.000000e+00> : vector<2x128xf32>
    %232 = tpu.matmul %230, %231, %cst_121 {dimension_numbers = #tpu.dot_dimension_numbers<[1], [0], [0], [1], [0, 0, 1, 1], [], []>} : vector<2x128xf32>, vector<128x128xf32>, vector<2x128xf32> -> vector<2x128xf32>
    %233 = vector.broadcast %7 : vector<1x128xf32> to vector<2x128xf32>
    %234 = arith.addf %232, %233 : vector<2x128xf32>
    %c8 = arith.constant 8 : index
    %c0_122 = arith.constant 0 : index
    %235 = vector.load %arg11[%c8, %c0_122] : memref<16x128xf32, #tpu.memory_space<vmem>>, vector<2x128xf32>
    tpu.vector_store %arg11[%c8, %c0_122], %234 {strides = array<i32>} : memref<16x128xf32, #tpu.memory_space<vmem>>, vector<2x128xf32>,
    %236 = vector.extract_strided_slice %5 {offsets = [10, 0], sizes = [2, 128], strides = [1, 1]} : vector<16x128xf32> to vector<2x128xf32>
    %c0_123 = arith.constant 0 : index
    %c0_124 = arith.constant 0 : index
    %237 = vector.load %arg4[%c0_123, %c0_124] : memref<128x128xf32, #tpu.memory_space<vmem>>, vector<128x128xf32>
    %cst_125 = arith.constant dense<0.000000e+00> : vector<2x128xf32>
    %238 = tpu.matmul %209, %237, %cst_125 {dimension_numbers = #tpu.dot_dimension_numbers<[1], [0], [0], [1], [0, 0, 1, 1], [], []>} : vector<2x128xf32>, vector<128x128xf32>, vector<2x128xf32> -> vector<2x128xf32>
    %239 = arith.addf %236, %238 : vector<2x128xf32>
    %240 = arith.negf %239 : vector<2x128xf32>
    %241 = math.exp %240 : vector<2x128xf32>
    %cst_126 = arith.constant 1.000000e+00 : f32
    %242 = vector.broadcast %cst_126 : f32 to vector<2x128xf32>
    %243 = arith.addf %242, %241 : vector<2x128xf32>
    %244 = arith.divf %242, %243 : vector<2x128xf32>
    %245 = math.tanh %239 : vector<2x128xf32>
    %c96_i32_127 = arith.constant 96 : i32
    %246 = tpu.dynamic_rotate %244 by %c96_i32_127 dim 1 : vector<2x128xf32>, i32 -> vector<2x128xf32>
    %c64_i32_128 = arith.constant 64 : i32
    %247 = tpu.dynamic_rotate %245 by %c64_i32_128 dim 1 : vector<2x128xf32>, i32 -> vector<2x128xf32>
    %c32_i32_129 = arith.constant 32 : i32
    %248 = tpu.dynamic_rotate %244 by %c32_i32_129 dim 1 : vector<2x128xf32>, i32 -> vector<2x128xf32>
    %249 = arith.mulf %246, %207 : vector<2x128xf32>
    %250 = arith.mulf %244, %247 : vector<2x128xf32>
    %251 = arith.addf %249, %250 : vector<2x128xf32>
    %252 = math.tanh %251 : vector<2x128xf32>
    %253 = arith.mulf %248, %252 : vector<2x128xf32>
    %c0_130 = arith.constant 0 : index
    %c0_131 = arith.constant 0 : index
    %254 = vector.load %arg6[%c0_130, %c0_131] : memref<128x128xf32, #tpu.memory_space<vmem>>, vector<128x128xf32>
    %cst_132 = arith.constant dense<0.000000e+00> : vector<2x128xf32>
    %255 = tpu.matmul %253, %254, %cst_132 {dimension_numbers = #tpu.dot_dimension_numbers<[1], [0], [0], [1], [0, 0, 1, 1], [], []>} : vector<2x128xf32>, vector<128x128xf32>, vector<2x128xf32> -> vector<2x128xf32>
    %c0_133 = arith.constant 0 : index
    %c0_134 = arith.constant 0 : index
    %256 = vector.load %arg7[%c0_133, %c0_134] : memref<128x128xf32, #tpu.memory_space<vmem>>, vector<128x128xf32>
    %cst_135 = arith.constant dense<0.000000e+00> : vector<2x128xf32>
    %257 = tpu.matmul %230, %256, %cst_135 {dimension_numbers = #tpu.dot_dimension_numbers<[1], [0], [0], [1], [0, 0, 1, 1], [], []>} : vector<2x128xf32>, vector<128x128xf32>, vector<2x128xf32> -> vector<2x128xf32>
    %258 = arith.addf %255, %257 : vector<2x128xf32>
    %259 = vector.broadcast %6 : vector<1x128xf32> to vector<2x128xf32>
    %260 = arith.addf %258, %259 : vector<2x128xf32>
    %261 = arith.negf %260 : vector<2x128xf32>
    %262 = math.exp %261 : vector<2x128xf32>
    %cst_136 = arith.constant 1.000000e+00 : f32
    %263 = vector.broadcast %cst_136 : f32 to vector<2x128xf32>
    %264 = arith.addf %263, %262 : vector<2x128xf32>
    %265 = arith.divf %263, %264 : vector<2x128xf32>
    %266 = math.tanh %260 : vector<2x128xf32>
    %c96_i32_137 = arith.constant 96 : i32
    %267 = tpu.dynamic_rotate %265 by %c96_i32_137 dim 1 : vector<2x128xf32>, i32 -> vector<2x128xf32>
    %c64_i32_138 = arith.constant 64 : i32
    %268 = tpu.dynamic_rotate %266 by %c64_i32_138 dim 1 : vector<2x128xf32>, i32 -> vector<2x128xf32>
    %c32_i32_139 = arith.constant 32 : i32
    %269 = tpu.dynamic_rotate %265 by %c32_i32_139 dim 1 : vector<2x128xf32>, i32 -> vector<2x128xf32>
    %270 = arith.mulf %267, %228 : vector<2x128xf32>
    %271 = arith.mulf %265, %268 : vector<2x128xf32>
    %272 = arith.addf %270, %271 : vector<2x128xf32>
    %273 = math.tanh %272 : vector<2x128xf32>
    %274 = arith.mulf %269, %273 : vector<2x128xf32>
    %c0_140 = arith.constant 0 : index
    %c0_141 = arith.constant 0 : index
    %275 = vector.load %arg9[%c0_140, %c0_141] : memref<128x128xf32, #tpu.memory_space<vmem>>, vector<128x128xf32>
    %cst_142 = arith.constant dense<0.000000e+00> : vector<2x128xf32>
    %276 = tpu.matmul %274, %275, %cst_142 {dimension_numbers = #tpu.dot_dimension_numbers<[1], [0], [0], [1], [0, 0, 1, 1], [], []>} : vector<2x128xf32>, vector<128x128xf32>, vector<2x128xf32> -> vector<2x128xf32>
    %277 = vector.broadcast %7 : vector<1x128xf32> to vector<2x128xf32>
    %278 = arith.addf %276, %277 : vector<2x128xf32>
    %c10 = arith.constant 10 : index
    %c0_143 = arith.constant 0 : index
    %279 = vector.load %arg11[%c10, %c0_143] : memref<16x128xf32, #tpu.memory_space<vmem>>, vector<2x128xf32>
    tpu.vector_store %arg11[%c10, %c0_143], %278 {strides = array<i32>} : memref<16x128xf32, #tpu.memory_space<vmem>>, vector<2x128xf32>,
    %280 = vector.extract_strided_slice %5 {offsets = [12, 0], sizes = [2, 128], strides = [1, 1]} : vector<16x128xf32> to vector<2x128xf32>
    %c0_144 = arith.constant 0 : index
    %c0_145 = arith.constant 0 : index
    %281 = vector.load %arg4[%c0_144, %c0_145] : memref<128x128xf32, #tpu.memory_space<vmem>>, vector<128x128xf32>
    %cst_146 = arith.constant dense<0.000000e+00> : vector<2x128xf32>
    %282 = tpu.matmul %253, %281, %cst_146 {dimension_numbers = #tpu.dot_dimension_numbers<[1], [0], [0], [1], [0, 0, 1, 1], [], []>} : vector<2x128xf32>, vector<128x128xf32>, vector<2x128xf32> -> vector<2x128xf32>
    %283 = arith.addf %280, %282 : vector<2x128xf32>
    %284 = arith.negf %283 : vector<2x128xf32>
    %285 = math.exp %284 : vector<2x128xf32>
    %cst_147 = arith.constant 1.000000e+00 : f32
    %286 = vector.broadcast %cst_147 : f32 to vector<2x128xf32>
    %287 = arith.addf %286, %285 : vector<2x128xf32>
    %288 = arith.divf %286, %287 : vector<2x128xf32>
    %289 = math.tanh %283 : vector<2x128xf32>
    %c96_i32_148 = arith.constant 96 : i32
    %290 = tpu.dynamic_rotate %288 by %c96_i32_148 dim 1 : vector<2x128xf32>, i32 -> vector<2x128xf32>
    %c64_i32_149 = arith.constant 64 : i32
    %291 = tpu.dynamic_rotate %289 by %c64_i32_149 dim 1 : vector<2x128xf32>, i32 -> vector<2x128xf32>
    %c32_i32_150 = arith.constant 32 : i32
    %292 = tpu.dynamic_rotate %288 by %c32_i32_150 dim 1 : vector<2x128xf32>, i32 -> vector<2x128xf32>
    %293 = arith.mulf %290, %251 : vector<2x128xf32>
    %294 = arith.mulf %288, %291 : vector<2x128xf32>
    %295 = arith.addf %293, %294 : vector<2x128xf32>
    %296 = math.tanh %295 : vector<2x128xf32>
    %297 = arith.mulf %292, %296 : vector<2x128xf32>
    %c0_151 = arith.constant 0 : index
    %c0_152 = arith.constant 0 : index
    %298 = vector.load %arg6[%c0_151, %c0_152] : memref<128x128xf32, #tpu.memory_space<vmem>>, vector<128x128xf32>
    %cst_153 = arith.constant dense<0.000000e+00> : vector<2x128xf32>
    %299 = tpu.matmul %297, %298, %cst_153 {dimension_numbers = #tpu.dot_dimension_numbers<[1], [0], [0], [1], [0, 0, 1, 1], [], []>} : vector<2x128xf32>, vector<128x128xf32>, vector<2x128xf32> -> vector<2x128xf32>
    %c0_154 = arith.constant 0 : index
    %c0_155 = arith.constant 0 : index
    %300 = vector.load %arg7[%c0_154, %c0_155] : memref<128x128xf32, #tpu.memory_space<vmem>>, vector<128x128xf32>
    %cst_156 = arith.constant dense<0.000000e+00> : vector<2x128xf32>
    %301 = tpu.matmul %274, %300, %cst_156 {dimension_numbers = #tpu.dot_dimension_numbers<[1], [0], [0], [1], [0, 0, 1, 1], [], []>} : vector<2x128xf32>, vector<128x128xf32>, vector<2x128xf32> -> vector<2x128xf32>
    %302 = arith.addf %299, %301 : vector<2x128xf32>
    %303 = vector.broadcast %6 : vector<1x128xf32> to vector<2x128xf32>
    %304 = arith.addf %302, %303 : vector<2x128xf32>
    %305 = arith.negf %304 : vector<2x128xf32>
    %306 = math.exp %305 : vector<2x128xf32>
    %cst_157 = arith.constant 1.000000e+00 : f32
    %307 = vector.broadcast %cst_157 : f32 to vector<2x128xf32>
    %308 = arith.addf %307, %306 : vector<2x128xf32>
    %309 = arith.divf %307, %308 : vector<2x128xf32>
    %310 = math.tanh %304 : vector<2x128xf32>
    %c96_i32_158 = arith.constant 96 : i32
    %311 = tpu.dynamic_rotate %309 by %c96_i32_158 dim 1 : vector<2x128xf32>, i32 -> vector<2x128xf32>
    %c64_i32_159 = arith.constant 64 : i32
    %312 = tpu.dynamic_rotate %310 by %c64_i32_159 dim 1 : vector<2x128xf32>, i32 -> vector<2x128xf32>
    %c32_i32_160 = arith.constant 32 : i32
    %313 = tpu.dynamic_rotate %309 by %c32_i32_160 dim 1 : vector<2x128xf32>, i32 -> vector<2x128xf32>
    %314 = arith.mulf %311, %272 : vector<2x128xf32>
    %315 = arith.mulf %309, %312 : vector<2x128xf32>
    %316 = arith.addf %314, %315 : vector<2x128xf32>
    %317 = math.tanh %316 : vector<2x128xf32>
    %318 = arith.mulf %313, %317 : vector<2x128xf32>
    %c0_161 = arith.constant 0 : index
    %c0_162 = arith.constant 0 : index
    %319 = vector.load %arg9[%c0_161, %c0_162] : memref<128x128xf32, #tpu.memory_space<vmem>>, vector<128x128xf32>
    %cst_163 = arith.constant dense<0.000000e+00> : vector<2x128xf32>
    %320 = tpu.matmul %318, %319, %cst_163 {dimension_numbers = #tpu.dot_dimension_numbers<[1], [0], [0], [1], [0, 0, 1, 1], [], []>} : vector<2x128xf32>, vector<128x128xf32>, vector<2x128xf32> -> vector<2x128xf32>
    %321 = vector.broadcast %7 : vector<1x128xf32> to vector<2x128xf32>
    %322 = arith.addf %320, %321 : vector<2x128xf32>
    %c12 = arith.constant 12 : index
    %c0_164 = arith.constant 0 : index
    %323 = vector.load %arg11[%c12, %c0_164] : memref<16x128xf32, #tpu.memory_space<vmem>>, vector<2x128xf32>
    tpu.vector_store %arg11[%c12, %c0_164], %322 {strides = array<i32>} : memref<16x128xf32, #tpu.memory_space<vmem>>, vector<2x128xf32>,
    %324 = vector.extract_strided_slice %5 {offsets = [14, 0], sizes = [2, 128], strides = [1, 1]} : vector<16x128xf32> to vector<2x128xf32>
    %c0_165 = arith.constant 0 : index
    %c0_166 = arith.constant 0 : index
    %325 = vector.load %arg4[%c0_165, %c0_166] : memref<128x128xf32, #tpu.memory_space<vmem>>, vector<128x128xf32>
    %cst_167 = arith.constant dense<0.000000e+00> : vector<2x128xf32>
    %326 = tpu.matmul %297, %325, %cst_167 {dimension_numbers = #tpu.dot_dimension_numbers<[1], [0], [0], [1], [0, 0, 1, 1], [], []>} : vector<2x128xf32>, vector<128x128xf32>, vector<2x128xf32> -> vector<2x128xf32>
    %327 = arith.addf %324, %326 : vector<2x128xf32>
    %328 = arith.negf %327 : vector<2x128xf32>
    %329 = math.exp %328 : vector<2x128xf32>
    %cst_168 = arith.constant 1.000000e+00 : f32
    %330 = vector.broadcast %cst_168 : f32 to vector<2x128xf32>
    %331 = arith.addf %330, %329 : vector<2x128xf32>
    %332 = arith.divf %330, %331 : vector<2x128xf32>
    %333 = math.tanh %327 : vector<2x128xf32>
    %c96_i32_169 = arith.constant 96 : i32
    %334 = tpu.dynamic_rotate %332 by %c96_i32_169 dim 1 : vector<2x128xf32>, i32 -> vector<2x128xf32>
    %c64_i32_170 = arith.constant 64 : i32
    %335 = tpu.dynamic_rotate %333 by %c64_i32_170 dim 1 : vector<2x128xf32>, i32 -> vector<2x128xf32>
    %c32_i32_171 = arith.constant 32 : i32
    %336 = tpu.dynamic_rotate %332 by %c32_i32_171 dim 1 : vector<2x128xf32>, i32 -> vector<2x128xf32>
    %337 = arith.mulf %334, %295 : vector<2x128xf32>
    %338 = arith.mulf %332, %335 : vector<2x128xf32>
    %339 = arith.addf %337, %338 : vector<2x128xf32>
    %340 = math.tanh %339 : vector<2x128xf32>
    %341 = arith.mulf %336, %340 : vector<2x128xf32>
    %c0_172 = arith.constant 0 : index
    %c0_173 = arith.constant 0 : index
    %342 = vector.load %arg6[%c0_172, %c0_173] : memref<128x128xf32, #tpu.memory_space<vmem>>, vector<128x128xf32>
    %cst_174 = arith.constant dense<0.000000e+00> : vector<2x128xf32>
    %343 = tpu.matmul %341, %342, %cst_174 {dimension_numbers = #tpu.dot_dimension_numbers<[1], [0], [0], [1], [0, 0, 1, 1], [], []>} : vector<2x128xf32>, vector<128x128xf32>, vector<2x128xf32> -> vector<2x128xf32>
    %c0_175 = arith.constant 0 : index
    %c0_176 = arith.constant 0 : index
    %344 = vector.load %arg7[%c0_175, %c0_176] : memref<128x128xf32, #tpu.memory_space<vmem>>, vector<128x128xf32>
    %cst_177 = arith.constant dense<0.000000e+00> : vector<2x128xf32>
    %345 = tpu.matmul %318, %344, %cst_177 {dimension_numbers = #tpu.dot_dimension_numbers<[1], [0], [0], [1], [0, 0, 1, 1], [], []>} : vector<2x128xf32>, vector<128x128xf32>, vector<2x128xf32> -> vector<2x128xf32>
    %346 = arith.addf %343, %345 : vector<2x128xf32>
    %347 = vector.broadcast %6 : vector<1x128xf32> to vector<2x128xf32>
    %348 = arith.addf %346, %347 : vector<2x128xf32>
    %349 = arith.negf %348 : vector<2x128xf32>
    %350 = math.exp %349 : vector<2x128xf32>
    %cst_178 = arith.constant 1.000000e+00 : f32
    %351 = vector.broadcast %cst_178 : f32 to vector<2x128xf32>
    %352 = arith.addf %351, %350 : vector<2x128xf32>
    %353 = arith.divf %351, %352 : vector<2x128xf32>
    %354 = math.tanh %348 : vector<2x128xf32>
    %c96_i32_179 = arith.constant 96 : i32
    %355 = tpu.dynamic_rotate %353 by %c96_i32_179 dim 1 : vector<2x128xf32>, i32 -> vector<2x128xf32>
    %c64_i32_180 = arith.constant 64 : i32
    %356 = tpu.dynamic_rotate %354 by %c64_i32_180 dim 1 : vector<2x128xf32>, i32 -> vector<2x128xf32>
    %c32_i32_181 = arith.constant 32 : i32
    %357 = tpu.dynamic_rotate %353 by %c32_i32_181 dim 1 : vector<2x128xf32>, i32 -> vector<2x128xf32>
    %358 = arith.mulf %355, %316 : vector<2x128xf32>
    %359 = arith.mulf %353, %356 : vector<2x128xf32>
    %360 = arith.addf %358, %359 : vector<2x128xf32>
    %361 = math.tanh %360 : vector<2x128xf32>
    %362 = arith.mulf %357, %361 : vector<2x128xf32>
    %c0_182 = arith.constant 0 : index
    %c0_183 = arith.constant 0 : index
    %363 = vector.load %arg9[%c0_182, %c0_183] : memref<128x128xf32, #tpu.memory_space<vmem>>, vector<128x128xf32>
    %cst_184 = arith.constant dense<0.000000e+00> : vector<2x128xf32>
    %364 = tpu.matmul %362, %363, %cst_184 {dimension_numbers = #tpu.dot_dimension_numbers<[1], [0], [0], [1], [0, 0, 1, 1], [], []>} : vector<2x128xf32>, vector<128x128xf32>, vector<2x128xf32> -> vector<2x128xf32>
    %365 = vector.broadcast %7 : vector<1x128xf32> to vector<2x128xf32>
    %366 = arith.addf %364, %365 : vector<2x128xf32>
    %c14 = arith.constant 14 : index
    %c0_185 = arith.constant 0 : index
    %367 = vector.load %arg11[%c14, %c0_185] : memref<16x128xf32, #tpu.memory_space<vmem>>, vector<2x128xf32>
    tpu.vector_store %arg11[%c14, %c0_185], %366 {strides = array<i32>} : memref<16x128xf32, #tpu.memory_space<vmem>>, vector<2x128xf32>,
    %368 = vector.shape_cast %341 : vector<2x128xf32> to vector<1x2x128xf32>
    %369 = vector.shape_cast %362 : vector<2x128xf32> to vector<1x2x128xf32>
    %370 = tpu.concatenate %368, %369 in 0 : vector<1x2x128xf32>, vector<1x2x128xf32> -> vector<2x2x128xf32>
    %c0_186 = arith.constant 0 : index
    %c0_187 = arith.constant 0 : index
    %c0_188 = arith.constant 0 : index
    %371 = vector.load %arg12[%c0_186, %c0_187, %c0_188] : memref<2x2x128xf32, #tpu.memory_space<vmem>>, vector<2x2x128xf32>
    tpu.vector_store %arg12[%c0_186, %c0_187, %c0_188], %370 {strides = array<i32>} : memref<2x2x128xf32, #tpu.memory_space<vmem>>, vector<2x2x128xf32>,
    %372 = vector.shape_cast %339 : vector<2x128xf32> to vector<1x2x128xf32>
    %373 = vector.shape_cast %360 : vector<2x128xf32> to vector<1x2x128xf32>
    %374 = tpu.concatenate %372, %373 in 0 : vector<1x2x128xf32>, vector<1x2x128xf32> -> vector<2x2x128xf32>
    %c0_189 = arith.constant 0 : index
    %c0_190 = arith.constant 0 : index
    %c0_191 = arith.constant 0 : index
    %375 = vector.load %arg13[%c0_189, %c0_190, %c0_191] : memref<2x2x128xf32, #tpu.memory_space<vmem>>, vector<2x2x128xf32>
    tpu.vector_store %arg13[%c0_189, %c0_190, %c0_191], %374 {strides = array<i32>} : memref<2x2x128xf32, #tpu.memory_space<vmem>>, vector<2x2x128xf32>,
    return
  }
}

</mosaic_0001>

<bundles_post_ra>
// kernel: charrnn_forward.1
= control target key start
LH: loop header
LB: loop body
LE: loop exit
PB: predicated region body
PF: predicated region fallthrough
CT: control target
= control target key end

     0   :  { %19 = vsyncpa [#allocation3], 0  ;;  %s7325_s0 = inlined_call_operand.vmem [shape: f32[16,16], index: 0, kind: input, shape index: {}]   ;;  %s7326_s1 = inlined_call_operand.vmem [shape: f32[2,2,128], index: 1, kind: input, shape index: {}]   ;;  %s7327_s2 = inlined_call_operand.vmem [shape: f32[2,2,128], index: 2, kind: input, shape index: {}]   ;;  %s7328_s3 = inlined_call_operand.vmem [shape: f32[16,128], index: 3, kind: input, shape index: {}]   ;;  %s7329_s4 = inlined_call_operand.hbm [shape: f32[128,128], index: 4, kind: input, shape index: {}]   ;;  %s7330_s5 = inlined_call_operand.vmem [shape: f32[1,128], index: 5, kind: input, shape index: {}]   ;;  %s7331_s6 = inlined_call_operand.hbm [shape: f32[128,128], index: 6, kind: input, shape index: {}]   ;;  %s7332_s7 = inlined_call_operand.hbm [shape: f32[128,128], index: 7, kind: input, shape index: {}]   ;;  %s7333_s8 = inlined_call_operand.vmem [shape: f32[1,128], index: 8, kind: input, shape index: {}]   ;;  %s7334_s9 = inlined_call_operand.hbm [shape: f32[128,128], index: 9, kind: input, shape index: {}]   ;;  %s7335_s10 = inlined_call_operand.vmem [shape: f32[1,128], index: 10, kind: input, shape index: {}]   ;;  %s7336_s11 = inlined_call_operand.vmem [shape: f32[16,128], index: 11, kind: output, shape index: {0}]   ;;  %s7337_s12 = inlined_call_operand.hbm [shape: f32[2,2,128], index: 12, kind: output, shape index: {1}]   ;;  %s7338_s13 = inlined_call_operand.hbm [shape: f32[2,2,128], index: 13, kind: output, shape index: {2}]  }
   0x1   :  { %20 = vsyncpa [#allocation6], 0 }
   0x2   :  { %21 = vsyncpa [#allocation9], 0 }
   0x3   :  { %22 = vsyncpa [#allocation4], 0 }
   0x4   :  { %23 = vsyncpa [#allocation12], 0  ;;  %s6165_s25 = smov [#allocation5]   ;;  %s6166_s27 = smov [#allocation2]  }
   0x5   :  { %s51_s26 = sshll.u32 %s6165_s25, 4  ;;  %s37_s28 = sshll.u32 %s6166_s27, 4  ;;  %s52_s26 = int_to_ptr.vmem [resolvable:$true] %s51_s26  ;;  %s6250_s28 = int_to_ptr.vmem [resolvable:$true] %s37_s28 }
   0x6   :  { %s6023_s14 = scalar_lea.hbm %s7331_s6, 2048 }
   0x7   :  { %p6024_p0 = scmp.ne.s32.totalorder %s7331_s6, %s6023_s14  ;;  %p6027_p1 = scmp.lt.u32.totalorder %s6023_s14, %s7331_s6 }
   0x9   :  { %p6029_p2 = pnand %p6027_p1, %p6024_p0 }
   0xb   :  { %6032 = shalt.err (!%p6029_p2)
}
   0xc   :  { %s6033_s19 = scalar_lea.vmem %s52_s26, 2048  ;;  %p6038_p4 = scmp.lt.s32.totalorder %s52_s26, %s52_s26 }
   0xd   :  { %p6034_p3 = scmp.ne.s32.totalorder %s52_s26, %s6033_s19  ;;  %p6039_p5 = scmp.lt.s32.totalorder %s6033_s19, %s6033_s19 }
   0xf   :  { %p6040_p6 = por %p6039_p5, %p6038_p4 }
  0x11   :  { %p6041_p7 = pnand %p6040_p6, %p6034_p3 }
  0x13   :  { %6044 = shalt.err (!%p6041_p7)
}
  0x14   :  { %s6167_s20 = smov 128   ;;  %s6168_s21 = smov 8  }
  0x15   :  { %57 = dma.hbm_to_vmem [thread:$0]  %s7331_s6, 2048, %s52_s26, [#allocation6], %s6167_s20, %s6167_s20, %s6168_s21  }
  0x16   :  { %s6045_s27 = scalar_lea.hbm %s7329_s4, 2048 }
  0x17   :  { %p6046_p8 = scmp.ne.s32.totalorder %s7329_s4, %s6045_s27  ;;  %p6049_p9 = scmp.lt.u32.totalorder %s6045_s27, %s7329_s4 }
  0x19   :  { %p6051_p10 = pnand %p6049_p9, %p6046_p8 }
  0x1b   :  { %6054 = shalt.err (!%p6051_p10)
}
  0x1c   :  { %s6055_s16 = scalar_lea.vmem %s6250_s28, 2048  ;;  %p6060_p12 = scmp.lt.s32.totalorder %s6250_s28, %s6250_s28 }
  0x1d   :  { %p6056_p11 = scmp.ne.s32.totalorder %s6250_s28, %s6055_s16  ;;  %p6061_p13 = scmp.lt.s32.totalorder %s6055_s16, %s6055_s16 }
  0x1f   :  { %p6062_p0 = por %p6061_p13, %p6060_p12 }
  0x21   :  { %p6063_p1 = pnand %p6062_p0, %p6056_p11 }
  0x23   :  { %6066 = shalt.err (!%p6063_p1)
}
  0x24   :  { %43 = dma.hbm_to_vmem [thread:$0]  %s7329_s4, 2048, %s6250_s28, [#allocation3], %s6167_s20, %s6167_s20, %s6168_s21  }
  0x25   :  { %s6169_s17 = smov [#allocation7]   ;;  %s6170_s19 = smov [#allocation8]  }
  0x26   :  { %s63_s18 = sshll.u32 %s6169_s17, 4  ;;  %s77_s22 = sshll.u32 %s6170_s19, 4  ;;  %s64_s18 = int_to_ptr.vmem [resolvable:$true] %s63_s18  ;;  %s6287_s22 = int_to_ptr.vmem [resolvable:$true] %s77_s22 }
  0x27   :  { %s6067_s25 = scalar_lea.hbm %s7332_s7, 2048 }
  0x28   :  { %p6068_p2 = scmp.ne.s32.totalorder %s7332_s7, %s6067_s25  ;;  %p6071_p3 = scmp.lt.u32.totalorder %s6067_s25, %s7332_s7 }
  0x2a   :  { %p6073_p4 = pnand %p6071_p3, %p6068_p2 }
  0x2c   :  { %6076 = shalt.err (!%p6073_p4)
}
  0x2d   :  { %s6077_s4 = scalar_lea.vmem %s64_s18, 2048  ;;  %p6082_p6 = scmp.lt.s32.totalorder %s64_s18, %s64_s18 }
  0x2e   :  { %p6078_p5 = scmp.ne.s32.totalorder %s64_s18, %s6077_s4  ;;  %p6083_p7 = scmp.lt.s32.totalorder %s6077_s4, %s6077_s4 }
  0x30   :  { %p6084_p8 = por %p6083_p7, %p6082_p6 }
  0x32   :  { %p6085_p9 = pnand %p6084_p8, %p6078_p5 }
  0x34   :  { %6088 = shalt.err (!%p6085_p9)
}
  0x35   :  { %69 = dma.hbm_to_vmem [thread:$0]  %s7332_s7, 2048, %s64_s18, [#allocation6], %s6167_s20, %s6167_s20, %s6168_s21  }
  0x36   :  { %s6089_s26 = scalar_lea.hbm %s7334_s9, 2048 }
  0x37   :  { %p6090_p10 = scmp.ne.s32.totalorder %s7334_s9, %s6089_s26  ;;  %p6093_p11 = scmp.lt.u32.totalorder %s6089_s26, %s7334_s9 }
  0x39   :  { %p6095_p12 = pnand %p6093_p11, %p6090_p10 }
  0x3b   :  { %6098 = shalt.err (!%p6095_p12)
}
  0x3c   :  { %s6099_s25 = scalar_lea.vmem %s6287_s22, 2048  ;;  %p6104_p0 = scmp.lt.s32.totalorder %s6287_s22, %s6287_s22 }
  0x3d   :  { %p6100_p13 = scmp.ne.s32.totalorder %s6287_s22, %s6099_s25  ;;  %p6105_p1 = scmp.lt.s32.totalorder %s6099_s25, %s6099_s25 }
  0x3f   :  { %p6106_p2 = por %p6105_p1, %p6104_p0 }
  0x41   :  { %p6107_p3 = pnand %p6106_p2, %p6100_p13 }
  0x43   :  { %6110 = shalt.err (!%p6107_p3)
}
  0x44   :  { %83 = dma.hbm_to_vmem [thread:$0]  %s7334_s9, 2048, %s6287_s22, [#allocation9], %s6167_s20, %s6167_s20, %s6168_s21  }
  0x45   :  { %6155 = dma.done.wait [#allocation3], 2048  }
  0x46   :  { %6156 = vsyncadd [#allocation3], 4294965248 }
  0x47   :  { %6157 = dma.done.wait [#allocation6], 4096  }
  0x48   :  { %6158 = vsyncadd [#allocation6], 4294963200 }
  0x49   :  { %6159 = dma.done.wait [#allocation9], 2048  }
  0x4a   :  { %6160 = vsyncadd [#allocation9], 4294965248  ;;  %v6171_v0 = vmov 0.0|0.0   ;;  %vm6172_vm0 = vmmov 0   ;;  %v6173_v1 = vmov 0.0   ;;  %v199_v2 = vld [vmem:[#allocation2] sm:$0xff] }
  0x4b   :  { %5110 = vmatprep.subr.bf16.mxu1 %v6171_v0  ;;  %4018 = vmatprep.mubr.msk.f32.mxu1 %vm6172_vm0, %v6173_v1  ;;  %v200_v3 = vld [vmem:[#allocation2 + $0x8] sm:$0xff]  ;;  %v201_v4 = vld [vmem:[#allocation2 + $0x10] sm:$0xff]  ;;  %v202_v6 = vld [vmem:[#allocation2 + $0x18] sm:$0xff]  ;;  %vm109_vm1 = vcmask 130048   ;;  %s6175_s15 = smov 96   ;;  %s6176_s16 = smov 64  }
  0x4c   :  { %v6327_v5 = vpack.c.bf16 %v200_v3, %v199_v2  ;;  %v6330_v7 = vpack.c.bf16 %v202_v6, %v201_v4  ;;  %v203_v8 = vld [vmem:[#allocation2 + $0x20] sm:$0xff]  ;;  %v204_v9 = vld [vmem:[#allocation2 + $0x28] sm:$0xff]  ;;  %v205_v15 = vld [vmem:[#allocation2 + $0x30] sm:$0xff] }
  0x4d   :  { %v100_v10 = vld [vmem:[%s7328_s3] sm:$0xff]  ;;  %v101_v11 = vld [vmem:[%s7328_s3 + $0x8] sm:$0xff]  ;;  %v6344_v14 = vpack.c.bf16 %v204_v9, %v203_v8  ;;  %v206_v16 = vld [vmem:[#allocation2 + $0x38] sm:$0xff] }
  0x4e   :  { %5112 = vmatpush3.bf16.msra.mxu1 %v6327_v5  ;;  %v5106_v12 = vpack.c.bf16 %v101_v11, %v100_v10  ;;  %v98_v13 = vld [vmem:[%s7325_s0] sm:$0xff]  ;;  %v99_v17 = vld [vmem:[%s7325_s0 + $0x8] sm:$0xff]  ;;  %v6352_v18 = vpack.c.bf16 %v206_v16, %v205_v15  ;;  %v209_v22 = vld [vmem:[#allocation2 + $0x50] sm:$0xff] }
  0x4f   :  { %5113 = vmatprep.subr.bf16.mxu1 %v6171_v0  ;;  %3983 = vmatprep.mubr.msk.f32.mxu0 %vm109_vm1, %v98_v13  ;;  %v207_v19 = vld [vmem:[#allocation2 + $0x40] sm:$0xff]  ;;  %v208_v20 = vld [vmem:[#allocation2 + $0x48] sm:$0xff]  ;;  %v210_v23 = vld [vmem:[#allocation2 + $0x58] sm:$0xff] }
  0x50   :  { %5107 = vmatprep.subr.bf16.mxu0 %v5106_v12  ;;  %v6359_v21 = vpack.c.bf16 %v208_v20, %v207_v19  ;;  %v6363_v24 = vpack.c.bf16 %v210_v23, %v209_v22  ;;  %v211_v25 = vld [vmem:[#allocation2 + $0x60] sm:$0xff]  ;;  %v212_v26 = vld [vmem:[#allocation2 + $0x68] sm:$0xff]  ;;  %v213_v28 = vld [vmem:[#allocation2 + $0x70] sm:$0xff] }
  0x51   :  { %5109 = vmatpush3.bf16.msra.mxu0 %v5106_v12  ;;  %v6367_v27 = vpack.c.bf16 %v212_v26, %v211_v25  ;;  %v214_v29 = vld [vmem:[#allocation2 + $0x78] sm:$0xff]  ;;  %v193_v31 = vld [vmem:[%s7326_s1] sm:$0x3]  ;;  %v305_v33 = vld [vmem:[#allocation5 + $0x8] sm:$0xff] }
  0x52   :  { %5115 = vmatpush3.bf16.msra.mxu1 %v6330_v7  ;;  %5134 = vmatprep.subr.bf16.mxu0 %v6171_v0  ;;  %v6371_v30 = vpack.c.bf16 %v214_v29, %v213_v28  ;;  %v304_v32 = vld [vmem:[#allocation5] sm:$0xff]  ;;  %v321_v36 = vld [vmem:[#allocation7 + $0x8] sm:$0xff]  ;;  %v306_v37 = vld [vmem:[#allocation5 + $0x10] sm:$0xff] }
  0x53   :  { %5116 = vmatprep.subr.bf16.mxu1 %v6171_v0  ;;  %v320_v34 = vld [vmem:[#allocation7] sm:$0xff]  ;;  %v6381_v35 = vpack.c.bf16 %v305_v33, %v304_v32  ;;  %v307_v38 = vld [vmem:[#allocation5 + $0x18] sm:$0xff]  ;;  %v322_v40 = vld [vmem:[#allocation7 + $0x10] sm:$0xff] }
  0x54   :  { %3984 = vmatmul.mubr.msk.f32.vlgmr.msra.gmra.mrb[0].mxu0 %vm109_vm1, %v99_v17  ;;  %v6383_v39 = vpack.c.bf16 %v321_v36, %v320_v34  ;;  %v323_v41 = vld [vmem:[#allocation7 + $0x18] sm:$0xff]  ;;  %v6386_v42 = vpack.c.bf16 %v307_v38, %v306_v37  ;;  %v308_v44 = vld [vmem:[#allocation5 + $0x20] sm:$0xff]  ;;  %v309_v45 = vld [vmem:[#allocation5 + $0x28] sm:$0xff] }
  0x55   :  { %4053 = vmatprep.mubr.msk.f32.mxu0 %vm6172_vm0, %v6173_v1  ;;  %v6390_v43 = vpack.c.bf16 %v323_v41, %v322_v40  ;;  %v324_v46 = vld [vmem:[#allocation7 + $0x20] sm:$0xff]  ;;  %v325_v47 = vld [vmem:[#allocation7 + $0x28] sm:$0xff]  ;;  %v6394_v48 = vpack.c.bf16 %v309_v45, %v308_v44  ;;  %v310_v59 = vld [vmem:[#allocation5 + $0x30] sm:$0xff] }
  0x56   :  { %5118 = vmatpush3.bf16.msra.mxu1 %v6344_v14  ;;  %5136 = vmatpush3.bf16.msra.mxu0 %v6383_v39  ;;  %v6398_v49 = vpack.c.bf16 %v325_v47, %v324_v46  ;;  %v3408_v50 = vld [vmem:[%s7330_s5] ss:$0 sm:$0xff]  ;;  %v311_v60 = vld [vmem:[#allocation5 + $0x38] sm:$0xff]  ;;  %v326_v63 = vld [vmem:[#allocation7 + $0x30] sm:$0xff]  ;;  %s6174_s5 = smov 32  }
  0x57   :  { %5119 = vmatprep.subr.bf16.mxu1 %v6171_v0  ;;  %5137 = vmatprep.subr.bf16.mxu0 %v6171_v0  ;;  %v6413_v62 = vpack.c.bf16 %v311_v60, %v310_v59  ;;  %v327_v2 = vld [vmem:[#allocation7 + $0x38] sm:$0xff]  ;;  %v312_v6 = vld [vmem:[#allocation5 + $0x40] sm:$0xff]  ;;  %v313_v8 = vld [vmem:[#allocation5 + $0x48] sm:$0xff] }
  0x58   :  { %v6415_v4 = vpack.c.bf16 %v327_v2, %v326_v63  ;;  %v6421_v9 = vpack.c.bf16 %v313_v8, %v312_v6  ;;  %v328_v10 = vld [vmem:[#allocation7 + $0x40] sm:$0xff]  ;;  %v329_v11 = vld [vmem:[#allocation7 + $0x48] sm:$0xff]  ;;  %v314_v13 = vld [vmem:[#allocation5 + $0x50] sm:$0xff] }
  0x59   :  { %v6423_v12 = vpack.c.bf16 %v329_v11, %v328_v10  ;;  %v315_v15 = vld [vmem:[#allocation5 + $0x58] sm:$0xff]  ;;  %v330_v17 = vld [vmem:[#allocation7 + $0x50] sm:$0xff]  ;;  %v316_v22 = vld [vmem:[#allocation5 + $0x60] sm:$0xff] }
  0x5a   :  { %5121 = vmatpush3.bf16.msra.mxu1 %v6352_v18  ;;  %5139 = vmatpush3.bf16.msra.mxu0 %v6390_v43  ;;  %v6429_v16 = vpack.c.bf16 %v315_v15, %v314_v13  ;;  %v331_v19 = vld [vmem:[#allocation7 + $0x58] sm:$0xff]  ;;  %v317_v23 = vld [vmem:[#allocation5 + $0x68] sm:$0xff]  ;;  %v332_v25 = vld [vmem:[#allocation7 + $0x60] sm:$0xff] }
  0x5b   :  { %5122 = vmatprep.subr.bf16.mxu1 %v6171_v0  ;;  %5140 = vmatprep.subr.bf16.mxu0 %v6171_v0  ;;  %v6431_v20 = vpack.c.bf16 %v331_v19, %v330_v17  ;;  %v333_v26 = vld [vmem:[#allocation7 + $0x68] sm:$0xff]  ;;  %v6436_v28 = vpack.c.bf16 %v317_v23, %v316_v22  ;;  %v319_v32 = vld [vmem:[#allocation5 + $0x78] sm:$0xff]  ;;  %v334_v33 = vld [vmem:[#allocation7 + $0x70] sm:$0xff] }
  0x5c   :  { %v6438_v29 = vpack.c.bf16 %v333_v26, %v332_v25  ;;  %v335_v34 = vld [vmem:[#allocation7 + $0x78] sm:$0xff]  ;;  %v3411_v41 = vld [vmem:[%s7326_s1 + $0x2] sm:$0x3]  ;;  %v194_v45 = vld [vmem:[%s7327_s2] sm:$0x3]  ;;  %s6178_s1 = smov [#allocation11]  }
  0x5d   :  { %v6447_v38 = vpack.c.bf16 %v335_v34, %v334_v33  ;;  %v6506_v59 = vld [vmem:[%s7333_s8] ss:$0 sm:$0xff]  ;;  %v503_v10 = vld [vmem:[#allocation8 + $0x10] sm:$0xff]  ;;  %v504_v11 = vld [vmem:[#allocation8 + $0x18] sm:$0xff]  ;;  %s3388_s23 = sshll.u32 %s6178_s1, 4  ;;  %s3389_s23 = int_to_ptr.vmem [resolvable:$true] %s3388_s23 }
  0x5e   :  { %5124 = vmatpush3.bf16.msra.mxu1 %v6359_v21  ;;  %5142 = vmatpush3.bf16.msra.mxu0 %v6398_v49  ;;  %v501_v2 = vld [vmem:[#allocation8] sm:$0xff]  ;;  %v6512_v13 = vpack.c.bf16 %v504_v11, %v503_v10  ;;  %v506_v19 = vld [vmem:[#allocation8 + $0x28] sm:$0xff]  ;;  %v507_v23 = vld [vmem:[#allocation8 + $0x30] sm:$0xff] }
  0x5f   :  { %5125 = vmatprep.subr.bf16.mxu1 %v6171_v0  ;;  %5143 = vmatprep.subr.bf16.mxu0 %v6171_v0  ;;  %v505_v17 = vld [vmem:[#allocation8 + $0x20] sm:$0xff]  ;;  %v508_v25 = vld [vmem:[#allocation8 + $0x38] sm:$0xff]  ;;  %v510_v34 = vld [vmem:[#allocation8 + $0x48] sm:$0xff] }
  0x60   :  { %v6516_v22 = vpack.c.bf16 %v506_v19, %v505_v17  ;;  %v6520_v26 = vpack.c.bf16 %v508_v25, %v507_v23  ;;  %v509_v33 = vld [vmem:[#allocation8 + $0x40] sm:$0xff] }
  0x61   :  { %v3412_v23 = vld [vmem:[%s7327_s2 + $0x2] sm:$0x3] }
  0x62   :  { %5127 = vmatpush3.bf16.msra.mxu1 %v6363_v24  ;;  %5145 = vmatpush3.bf16.msra.mxu0 %v6415_v4 }
  0x63   :  { %5128 = vmatprep.subr.bf16.mxu1 %v6171_v0  ;;  %5146 = vmatprep.subr.bf16.mxu0 %v6171_v0 }
  0x66   :  { %5130 = vmatpush3.bf16.msra.mxu1 %v6367_v27  ;;  %5148 = vmatpush3.bf16.msra.mxu0 %v6423_v12 }
  0x67   :  { %5131 = vmatprep.subr.bf16.mxu1 %v6171_v0  ;;  %5149 = vmatprep.subr.bf16.mxu0 %v6171_v0 }
  0x6a   :  { %5133 = vmatpush3.bf16.msra.mxu1 %v6371_v30  ;;  %5151 = vmatpush3.bf16.msra.mxu0 %v6431_v20 }
  0x6b   :  { %5158 = vmatprep.subr.bf16.mxu1 %v6171_v0  ;;  %5152 = vmatprep.subr.bf16.mxu0 %v6171_v0 }
  0x6d   :  { %4019 = vmatmul.mubr.f32.vlgmr.msra.gmra.mrb[0].mxu1 %v193_v31  ;;  %v318_v31 = vld [vmem:[#allocation5 + $0x70] sm:$0xff] }
  0x6e   :  { %4088 = vmatprep.mubr.msk.f32.mxu1 %vm6172_vm0, %v6173_v1  ;;  %5160 = vmatpush3.bf16.msra.mxu1 %v6381_v35  ;;  %v6445_v37 = vpack.c.bf16 %v319_v32, %v318_v31 }
  0x6f   :  { %5161 = vmatprep.subr.bf16.mxu1 %v6171_v0  ;;  %5154 = vmatpush3.bf16.msra.mxu0 %v6438_v29 }
  0x70   :  { %5155 = vmatprep.subr.bf16.mxu0 %v6171_v0 }
  0x72   :  { %5163 = vmatpush3.bf16.msra.mxu1 %v6386_v42 }
  0x73   :  { %5164 = vmatprep.subr.bf16.mxu1 %v6171_v0  ;;  %5157 = vmatpush3.bf16.msra.mxu0 %v6447_v38 }
  0x74   :  { %5182 = vmatprep.subr.bf16.mxu0 %v6171_v0 }
  0x76   :  { %5166 = vmatpush3.bf16.msra.mxu1 %v6394_v48  ;;  %4054 = vmatmul.mubr.f32.vlgmr.msra.gmra.mrb[2].mxu0 %v3411_v41  ;;  %v511_v41 = vld [vmem:[#allocation8 + $0x50] sm:$0xff] }
  0x77   :  { %5167 = vmatprep.subr.bf16.mxu1 %v6171_v0  ;;  %4123 = vmatprep.mubr.msk.f32.mxu0 %vm6172_vm0, %v6173_v1 }
  0x7a   :  { %5169 = vmatpush3.bf16.msra.mxu1 %v6413_v62 }
  0x7b   :  { %5170 = vmatprep.subr.bf16.mxu1 %v6171_v0 }
  0x7e   :  { %5172 = vmatpush3.bf16.msra.mxu1 %v6421_v9 }
  0x7f   :  { %5173 = vmatprep.subr.bf16.mxu1 %v6171_v0 }
  0x82   :  { %5175 = vmatpush3.bf16.msra.mxu1 %v6429_v16 }
  0x83   :  { %5176 = vmatprep.subr.bf16.mxu1 %v6171_v0 }
  0x86   :  { %5178 = vmatpush3.bf16.msra.mxu1 %v6436_v28 }
  0x87   :  { %5179 = vmatprep.subr.bf16.mxu1 %v6171_v0 }
  0x8a   :  { %5181 = vmatpush3.bf16.msra.mxu1 %v6445_v37 }
  0x8b   :  { %5206 = vmatprep.subr.bf16.mxu1 %v6171_v0 }
 0x127   :  { %v3985_v51 = vpop.f32.mrb[0].mxu0 }
 0x128   :  { %v6408_v52 = vadd.f32 %v3985_v51, %v3408_v50  ;;  %v182_v53 = vpop.f32.mrb[1].mxu0 }
 0x129   :  { %v6410_v54 = vadd.f32 %v3408_v50, %v182_v53 }
 0x140   :  { %v281_v55 = vpop.f32.mrb[0].mxu1 }
 0x141   :  { %v285_v56 = vadd.f32 %v281_v55, %v6410_v54  ;;  %v4020_v57 = vpop.f32.mrb[1].mxu1 }
 0x143   :  { %v3413_v58 = vmul.f32 -1.442695, %v285_v56 }
 0x145   :  { %5893 = vpow2.f32 %v3413_v58 }
 0x149   :  { %v402_v57 = vpop.f32.mrb[2].mxu0 }
 0x14a   :  { %v4055_v58 = vpop.f32.mrb[3].mxu0 }
 0x14f   :  { %v5894_v61 = vpop.eup %5893 }
 0x150   :  { %v289_v3 = vadd.f32 1.0, %v5894_v61 }
 0x152   :  { %5895 = vrcp.f32 %v289_v3  ;;  %v502_v3 = vld [vmem:[#allocation8 + $0x8] sm:$0xff] }
 0x153   :  { %5897 = vtanh.f32 %v285_v56  ;;  %v6508_v6 = vpack.c.bf16 %v502_v3, %v501_v2 }
 0x155   :  { %5184 = vmatpush3.bf16.msra.mxu0 %v6508_v6 }
 0x156   :  { %5185 = vmatprep.subr.bf16.mxu0 %v6171_v0 }
 0x159   :  { %5187 = vmatpush3.bf16.msra.mxu0 %v6512_v13 }
 0x15a   :  { %5188 = vmatprep.subr.bf16.mxu0 %v6171_v0 }
 0x15c   :  { %v5896_v36 = vpop.eup %5895 }
 0x15d   :  { %297 = vrot.lane.b32.xlu1 %v5896_v36, %s6174_s5  ;;  %293 = vrot.lane.b32.xlu0 %v5896_v36, %s6175_s15  ;;  %v5898_v40 = vpop.eup %5897 }
 0x15e   :  { %5190 = vmatpush3.bf16.msra.mxu0 %v6516_v22 }
 0x15f   :  { %5191 = vmatprep.subr.bf16.mxu0 %v6171_v0 }
 0x161   :  { %295 = vrot.lane.b32.xlu0 %v5898_v40, %s6176_s16  ;;  %v6526_v40 = vpack.c.bf16 %v510_v34, %v509_v33 }
 0x162   :  { %5193 = vmatpush3.bf16.msra.mxu0 %v6520_v26 }
 0x163   :  { %5194 = vmatprep.subr.bf16.mxu0 %v6171_v0 }
 0x166   :  { %5196 = vmatpush3.bf16.msra.mxu0 %v6526_v40 }
 0x167   :  { %5197 = vmatprep.subr.bf16.mxu0 %v6171_v0 }
 0x1cf   :  { %v294_v44 = vpop.permute.xlu0 %293  ;;  %v298_v55 = vpop.permute.xlu1 %297 }
 0x1d0   :  { %v299_v47 = vmul.f32 %v294_v44, %v194_v45  ;;  %v512_v44 = vld [vmem:[#allocation8 + $0x58] sm:$0xff] }
 0x1d1   :  { %v6530_v45 = vpack.c.bf16 %v512_v44, %v511_v41 }
 0x1d3   :  { %v296_v46 = vpop.permute.xlu0 %295  ;;  %5199 = vmatpush3.bf16.msra.mxu0 %v6530_v45 }
 0x1d4   :  { %v300_v50 = vmul.f32 %v5896_v36, %v296_v46  ;;  %5200 = vmatprep.subr.bf16.mxu0 %v6171_v0  ;;  %v513_v46 = vld [vmem:[#allocation8 + $0x60] sm:$0xff] }
 0x1d6   :  { %v6464_v51 = vadd.f32 %v300_v50, %v299_v47  ;;  %v514_v47 = vld [vmem:[#allocation8 + $0x68] sm:$0xff] }
 0x1d7   :  { %v6534_v50 = vpack.c.bf16 %v514_v47, %v513_v46 }
 0x1d8   :  { %5899 = vtanh.f32 %v6464_v51 }
 0x1d9   :  { %5202 = vmatpush3.bf16.msra.mxu0 %v6534_v50 }
 0x1da   :  { %5203 = vmatprep.subr.bf16.mxu0 %v6171_v0 }
 0x1e2   :  { %v5900_v53 = vpop.eup %5899 }
 0x1e3   :  { %v303_v56 = vmul.f32 %v5900_v53, %v298_v55  ;;  %v515_v53 = vld [vmem:[#allocation8 + $0x70] sm:$0xff]  ;;  %v516_v55 = vld [vmem:[#allocation8 + $0x78] sm:$0xff] }
 0x1e5   :  { %4089 = vmatmul.mubr.f32.vlgmr.msra.gmra.mrb[2].mxu1 %v303_v56 }
 0x1e6   :  { %5208 = vmatpush3.bf16.msra.mxu1 %v6327_v5  ;;  %4158 = vmatprep.mubr.msk.f32.mxu1 %vm6172_vm0, %v6173_v1 }
 0x1e7   :  { %5209 = vmatprep.subr.bf16.mxu1 %v6171_v0 }
 0x1ea   :  { %5211 = vmatpush3.bf16.msra.mxu1 %v6330_v7 }
 0x1eb   :  { %5212 = vmatprep.subr.bf16.mxu1 %v6171_v0 }
 0x1ee   :  { %5214 = vmatpush3.bf16.msra.mxu1 %v6344_v14 }
 0x1ef   :  { %5215 = vmatprep.subr.bf16.mxu1 %v6171_v0 }
 0x1f2   :  { %5217 = vmatpush3.bf16.msra.mxu1 %v6352_v18 }
 0x1f3   :  { %5218 = vmatprep.subr.bf16.mxu1 %v6171_v0 }
 0x1f6   :  { %5220 = vmatpush3.bf16.msra.mxu1 %v6359_v21 }
 0x1f7   :  { %5221 = vmatprep.subr.bf16.mxu1 %v6171_v0 }
 0x1fa   :  { %5223 = vmatpush3.bf16.msra.mxu1 %v6363_v24 }
 0x1fb   :  { %5224 = vmatprep.subr.bf16.mxu1 %v6171_v0 }
 0x1fe   :  { %5226 = vmatpush3.bf16.msra.mxu1 %v6367_v27 }
 0x1ff   :  { %5227 = vmatprep.subr.bf16.mxu1 %v6171_v0 }
 0x202   :  { %5229 = vmatpush3.bf16.msra.mxu1 %v6371_v30 }
 0x203   :  { %5254 = vmatprep.subr.bf16.mxu1 %v6171_v0 }
 0x205   :  { %4159 = vmatmul.mubr.f32.vlgmr.msra.gmra.mrb[4].mxu1 %v303_v56 }
 0x206   :  { %5256 = vmatpush3.bf16.msra.mxu1 %v6381_v35  ;;  %4228 = vmatprep.mubr.msk.f32.mxu1 %vm6172_vm0, %v6173_v1 }
 0x207   :  { %5257 = vmatprep.subr.bf16.mxu1 %v6171_v0 }
 0x20a   :  { %5259 = vmatpush3.bf16.msra.mxu1 %v6386_v42 }
 0x20b   :  { %5260 = vmatprep.subr.bf16.mxu1 %v6171_v0 }
 0x20e   :  { %5262 = vmatpush3.bf16.msra.mxu1 %v6394_v48 }
 0x20f   :  { %5263 = vmatprep.subr.bf16.mxu1 %v6171_v0 }
 0x212   :  { %5265 = vmatpush3.bf16.msra.mxu1 %v6413_v62 }
 0x213   :  { %5266 = vmatprep.subr.bf16.mxu1 %v6171_v0 }
 0x216   :  { %5268 = vmatpush3.bf16.msra.mxu1 %v6421_v9 }
 0x217   :  { %5269 = vmatprep.subr.bf16.mxu1 %v6171_v0 }
 0x21a   :  { %5271 = vmatpush3.bf16.msra.mxu1 %v6429_v16 }
 0x21b   :  { %5272 = vmatprep.subr.bf16.mxu1 %v6171_v0 }
 0x21e   :  { %5274 = vmatpush3.bf16.msra.mxu1 %v6436_v28 }
 0x21f   :  { %5275 = vmatprep.subr.bf16.mxu1 %v6171_v0 }
 0x222   :  { %5277 = vmatpush3.bf16.msra.mxu1 %v6445_v37 }
 0x223   :  { %5302 = vmatprep.subr.bf16.mxu1 %v6171_v0 }
 0x2b8   :  { %v472_v60 = vpop.f32.mrb[2].mxu1 }
 0x2b9   :  { %v473_v61 = vadd.f32 %v472_v60, %v402_v57  ;;  %v4090_v63 = vpop.f32.mrb[3].mxu1  ;;  %v6538_v57 = vpack.c.bf16 %v516_v55, %v515_v53 }
 0x2bb   :  { %v482_v8 = vadd.f32 %v6506_v59, %v473_v61  ;;  %5205 = vmatpush3.bf16.msra.mxu0 %v6538_v57 }
 0x2bc   :  { %5230 = vmatprep.subr.bf16.mxu0 %v6171_v0 }
 0x2bd   :  { %v3415_v15 = vmul.f32 -1.442695, %v482_v8  ;;  %5901 = vtanh.f32 %v482_v8 }
 0x2bf   :  { %5903 = vpow2.f32 %v3415_v15 }
 0x2c7   :  { %v5902_v31 = vpop.eup %5901 }
 0x2c8   :  { %492 = vrot.lane.b32.xlu0 %v5902_v31, %s6176_s16 }
 0x2c9   :  { %v5904_v32 = vpop.eup %5903 }
 0x2ca   :  { %v486_v36 = vadd.f32 1.0, %v5904_v32 }
 0x2cc   :  { %5905 = vrcp.f32 %v486_v36 }
 0x2d6   :  { %v5906_v56 = vpop.eup %5905 }
 0x2d7   :  { %490 = vrot.lane.b32.xlu1 %v5906_v56, %s6175_s15 }
 0x2d8   :  { %v676_v58 = vpop.f32.mrb[4].mxu1 }
 0x2d9   :  { %v681_v60 = vrot.slane %v676_v58, 6  ;;  %v4160_v61 = vpop.f32.mrb[5].mxu1 }
 0x2db   :  { %v683_v63 = vadd.f32 %v681_v60, %v6410_v54  ;;  %494 = vrot.lane.b32.xlu1 %v5906_v56, %s6174_s5 }
 0x2dd   :  { %v3417_v2 = vmul.f32 -1.442695, %v683_v63  ;;  %5907 = vtanh.f32 %v683_v63 }
 0x2df   :  { %5909 = vpow2.f32 %v3417_v2 }
 0x2e7   :  { %v5908_v3 = vpop.eup %5907 }
 0x2e8   :  { %v697_v8 = vrot.slane %v5908_v3, 2 }
 0x2e9   :  { %v5910_v10 = vpop.eup %5909 }
 0x2ea   :  { %v687_v11 = vadd.f32 1.0, %v5910_v10  ;;  %699 = vrot.lane.b32.xlu0 %v697_v8, %s6176_s16 }
 0x2ec   :  { %5911 = vrcp.f32 %v687_v11 }
 0x2f6   :  { %v5912_v15 = vpop.eup %5911 }
 0x2f7   :  { %v692_v17 = vrot.slane %v5912_v15, 2 }
 0x2f9   :  { %701 = vrot.lane.b32.xlu0 %v692_v17, %s6174_s5  ;;  %694 = vrot.lane.b32.xlu1 %v692_v17, %s6175_s15 }
 0x33a   :  { %v493_v19 = vpop.permute.xlu0 %492 }
 0x33b   :  { %v497_v31 = vmul.f32 %v5906_v56, %v493_v19 }
 0x349   :  { %v491_v25 = vpop.permute.xlu1 %490 }
 0x34a   :  { %v496_v32 = vmul.f32 %v3412_v23, %v491_v25 }
 0x34c   :  { %v6551_v33 = vadd.f32 %v497_v31, %v496_v32 }
 0x34d   :  { %v495_v36 = vpop.permute.xlu1 %494 }
 0x34e   :  { %5913 = vtanh.f32 %v6551_v33 }
 0x358   :  { %v5914_v34 = vpop.eup %5913 }
 0x359   :  { %v500_v41 = vmul.f32 %v5914_v34, %v495_v36 }
 0x35b   :  { %4124 = vmatmul.mubr.f32.vlgmr.msra.gmra.mrb[4].mxu0 %v500_v41 }
 0x35c   :  { %5232 = vmatpush3.bf16.msra.mxu0 %v6383_v39  ;;  %4193 = vmatprep.mubr.msk.f32.mxu0 %vm6172_vm0, %v6173_v1  ;;  %v700_v44 = vpop.permute.xlu0 %699 }
 0x35d   :  { %5233 = vmatprep.subr.bf16.mxu0 %v6171_v0  ;;  %v705_v46 = vrot.slane %v700_v44, 6 }
 0x35f   :  { %v707_v47 = vmul.f32 %v5912_v15, %v705_v46 }
 0x360   :  { %5235 = vmatpush3.bf16.msra.mxu0 %v6390_v43 }
 0x361   :  { %5236 = vmatprep.subr.bf16.mxu0 %v6171_v0  ;;  %v709_v55 = vrot.slane %v707_v47, 2 }
 0x364   :  { %5238 = vmatpush3.bf16.msra.mxu0 %v6398_v49 }
 0x365   :  { %5239 = vmatprep.subr.bf16.mxu0 %v6171_v0 }
 0x368   :  { %5241 = vmatpush3.bf16.msra.mxu0 %v6415_v4 }
 0x369   :  { %5242 = vmatprep.subr.bf16.mxu0 %v6171_v0 }
 0x36b   :  { %v695_v53 = vpop.permute.xlu1 %694  ;;  %v702_v60 = vpop.permute.xlu0 %701 }
 0x36c   :  { %v703_v56 = vmul.f32 %v695_v53, %v6464_v51  ;;  %5244 = vmatpush3.bf16.msra.mxu0 %v6423_v12 }
 0x36d   :  { %5245 = vmatprep.subr.bf16.mxu0 %v6171_v0 }
 0x36e   :  { %v6567_v58 = vadd.f32 %v709_v55, %v703_v56 }
 0x370   :  { %5915 = vtanh.f32 %v6567_v58  ;;  %5247 = vmatpush3.bf16.msra.mxu0 %v6431_v20 }
 0x371   :  { %5248 = vmatprep.subr.bf16.mxu0 %v6171_v0 }
 0x374   :  { %5250 = vmatpush3.bf16.msra.mxu0 %v6438_v29 }
 0x375   :  { %5251 = vmatprep.subr.bf16.mxu0 %v6171_v0 }
 0x378   :  { %5253 = vmatpush3.bf16.msra.mxu0 %v6447_v38 }
 0x379   :  { %5278 = vmatprep.subr.bf16.mxu0 %v6171_v0 }
 0x37a   :  { %v5916_v51 = vpop.eup %5915 }
 0x37b   :  { %4194 = vmatmul.mubr.f32.vlgmr.msra.gmra.mrb[6].mxu0 %v500_v41  ;;  %v713_v61 = vmul.f32 %v5916_v51, %v702_v60 }
 0x37c   :  { %5280 = vmatpush3.bf16.msra.mxu0 %v6508_v6  ;;  %4263 = vmatprep.mubr.msk.f32.mxu0 %vm6172_vm0, %v6173_v1 }
 0x37d   :  { %4229 = vmatmul.mubr.f32.vlgmr.msra.gmra.mrb[6].mxu1 %v713_v61  ;;  %5281 = vmatprep.subr.bf16.mxu0 %v6171_v0 }
 0x37e   :  { %5304 = vmatpush3.bf16.msra.mxu1 %v6327_v5  ;;  %4298 = vmatprep.mubr.msk.f32.mxu1 %vm6172_vm0, %v6173_v1  ;;  %v6633_v5 = vld [vmem:[%s7335_s10] ss:$0 sm:$0xff] }
 0x37f   :  { %5305 = vmatprep.subr.bf16.mxu1 %v6171_v0 }
 0x380   :  { %5283 = vmatpush3.bf16.msra.mxu0 %v6512_v13 }
 0x381   :  { %5284 = vmatprep.subr.bf16.mxu0 %v6171_v0 }
 0x382   :  { %5307 = vmatpush3.bf16.msra.mxu1 %v6330_v7 }
 0x383   :  { %5308 = vmatprep.subr.bf16.mxu1 %v6171_v0 }
 0x384   :  { %5286 = vmatpush3.bf16.msra.mxu0 %v6516_v22 }
 0x385   :  { %5287 = vmatprep.subr.bf16.mxu0 %v6171_v0 }
 0x386   :  { %5310 = vmatpush3.bf16.msra.mxu1 %v6344_v14 }
 0x387   :  { %5311 = vmatprep.subr.bf16.mxu1 %v6171_v0 }
 0x388   :  { %5289 = vmatpush3.bf16.msra.mxu0 %v6520_v26 }
 0x389   :  { %5290 = vmatprep.subr.bf16.mxu0 %v6171_v0 }
 0x38a   :  { %5313 = vmatpush3.bf16.msra.mxu1 %v6352_v18 }
 0x38b   :  { %5314 = vmatprep.subr.bf16.mxu1 %v6171_v0 }
 0x38c   :  { %5292 = vmatpush3.bf16.msra.mxu0 %v6526_v40 }
 0x38d   :  { %5293 = vmatprep.subr.bf16.mxu0 %v6171_v0 }
 0x38e   :  { %5316 = vmatpush3.bf16.msra.mxu1 %v6359_v21 }
 0x38f   :  { %5317 = vmatprep.subr.bf16.mxu1 %v6171_v0 }
 0x390   :  { %5295 = vmatpush3.bf16.msra.mxu0 %v6530_v45 }
 0x391   :  { %5296 = vmatprep.subr.bf16.mxu0 %v6171_v0 }
 0x392   :  { %5319 = vmatpush3.bf16.msra.mxu1 %v6363_v24 }
 0x393   :  { %5320 = vmatprep.subr.bf16.mxu1 %v6171_v0 }
 0x394   :  { %5298 = vmatpush3.bf16.msra.mxu0 %v6534_v50 }
 0x395   :  { %5299 = vmatprep.subr.bf16.mxu0 %v6171_v0 }
 0x396   :  { %5322 = vmatpush3.bf16.msra.mxu1 %v6367_v27 }
 0x397   :  { %5323 = vmatprep.subr.bf16.mxu1 %v6171_v0 }
 0x398   :  { %5301 = vmatpush3.bf16.msra.mxu0 %v6538_v57 }
 0x399   :  { %5326 = vmatprep.subr.bf16.mxu0 %v6171_v0 }
 0x39a   :  { %5325 = vmatpush3.bf16.msra.mxu1 %v6371_v30 }
 0x39b   :  { %5350 = vmatprep.subr.bf16.mxu1 %v6171_v0 }
 0x39d   :  { %4299 = vmatmul.mubr.f32.vlgmr.msra.gmra.mrb[8].mxu1 %v713_v61  ;;  %v1392_v61 = vld [vmem:[#allocation2 + $0x10] sm:$0xff] }
 0x39e   :  { %5352 = vmatpush3.bf16.msra.mxu1 %v6381_v35  ;;  %4368 = vmatprep.mubr.msk.f32.mxu1 %vm6172_vm0, %v6173_v1 }
 0x39f   :  { %5353 = vmatprep.subr.bf16.mxu1 %v6171_v0 }
 0x3a2   :  { %5355 = vmatpush3.bf16.msra.mxu1 %v6386_v42 }
 0x3a3   :  { %5356 = vmatprep.subr.bf16.mxu1 %v6171_v0 }
 0x3a6   :  { %5358 = vmatpush3.bf16.msra.mxu1 %v6394_v48 }
 0x3a7   :  { %5359 = vmatprep.subr.bf16.mxu1 %v6171_v0 }
 0x3aa   :  { %5361 = vmatpush3.bf16.msra.mxu1 %v6413_v62 }
 0x3ab   :  { %5362 = vmatprep.subr.bf16.mxu1 %v6171_v0 }
 0x3ae   :  { %5364 = vmatpush3.bf16.msra.mxu1 %v6421_v9 }
 0x3af   :  { %5365 = vmatprep.subr.bf16.mxu1 %v6171_v0 }
 0x3b2   :  { %5367 = vmatpush3.bf16.msra.mxu1 %v6429_v16 }
 0x3b3   :  { %5368 = vmatprep.subr.bf16.mxu1 %v6171_v0 }
 0x3b6   :  { %5370 = vmatpush3.bf16.msra.mxu1 %v6436_v28 }
 0x3b7   :  { %5371 = vmatprep.subr.bf16.mxu1 %v6171_v0 }
 0x3ba   :  { %5373 = vmatpush3.bf16.msra.mxu1 %v6445_v37 }
 0x3bb   :  { %5398 = vmatprep.subr.bf16.mxu1 %v6171_v0 }
 0x42e   :  { %v589_v7 = vpop.f32.mrb[4].mxu0 }
 0x42f   :  { %v590_v14 = vadd.f32 %v6633_v5, %v589_v7  ;;  %v4125_v18 = vpop.f32.mrb[5].mxu0  ;;  %v1395_v7 = vld [vmem:[#allocation2 + $0x28] sm:$0xff] }
 0x430   :  { %v1397_v18 = vld [vmem:[#allocation2 + $0x38] sm:$0xff] }
 0x431   :  { %593 = vst [vmem:[%s7336_s11] sm:$0x3] %v590_v14  ;;  %v1396_v14 = vld [vmem:[#allocation2 + $0x30] sm:$0xff] }
 0x44e   :  { %v812_v21 = vpop.f32.mrb[6].mxu0 }
 0x44f   :  { %v4195_v24 = vpop.f32.mrb[7].mxu0 }
 0x450   :  { %v882_v27 = vpop.f32.mrb[6].mxu1  ;;  %v1399_v24 = vld [vmem:[#allocation2 + $0x48] sm:$0xff] }
 0x451   :  { %v883_v30 = vadd.f32 %v882_v27, %v812_v21  ;;  %v4230_v35 = vpop.f32.mrb[7].mxu1  ;;  %v6694_v21 = vpack.c.bf16 %v1397_v18, %v1396_v14  ;;  %v1521_v14 = vld [vmem:[#allocation5 + $0x58] sm:$0xff] }
 0x453   :  { %v886_v42 = vadd.f32 %v6506_v59, %v883_v30  ;;  %v1401_v30 = vld [vmem:[#allocation2 + $0x58] sm:$0xff] }
 0x455   :  { %v3418_v48 = vmul.f32 -1.442695, %v886_v42  ;;  %5917 = vtanh.f32 %v886_v42  ;;  %v1403_v42 = vld [vmem:[#allocation2 + $0x68] sm:$0xff] }
 0x457   :  { %5919 = vpow2.f32 %v3418_v48 }
 0x45f   :  { %v5918_v62 = vpop.eup %5917 }
 0x460   :  { %896 = vrot.lane.b32.xlu0 %v5918_v62, %s6176_s16  ;;  %v1405_v62 = vld [vmem:[#allocation2 + $0x78] sm:$0xff] }
 0x461   :  { %v5920_v9 = vpop.eup %5919 }
 0x462   :  { %v890_v16 = vadd.f32 1.0, %v5920_v9 }
 0x464   :  { %5921 = vrcp.f32 %v890_v16 }
 0x46e   :  { %v5922_v28 = vpop.eup %5921 }
 0x46f   :  { %894 = vrot.lane.b32.xlu1 %v5922_v28, %s6175_s15 }
 0x470   :  { %v1074_v37 = vpop.f32.mrb[8].mxu1 }
 0x471   :  { %v1079_v63 = vrot.slane %v1074_v37, 4  ;;  %v4300_v2 = vpop.f32.mrb[9].mxu1 }
 0x473   :  { %v1081_v3 = vadd.f32 %v1079_v63, %v6410_v54  ;;  %898 = vrot.lane.b32.xlu1 %v5922_v28, %s6174_s5 }
 0x475   :  { %v3419_v8 = vmul.f32 -1.442695, %v1081_v3  ;;  %5923 = vtanh.f32 %v1081_v3 }
 0x477   :  { %5925 = vpow2.f32 %v3419_v8 }
 0x47f   :  { %v5924_v10 = vpop.eup %5923 }
 0x480   :  { %v1095_v11 = vrot.slane %v5924_v10, 4 }
 0x481   :  { %v5926_v15 = vpop.eup %5925 }
 0x482   :  { %v1085_v17 = vadd.f32 1.0, %v5926_v15  ;;  %1097 = vrot.lane.b32.xlu0 %v1095_v11, %s6176_s16 }
 0x484   :  { %5927 = vrcp.f32 %v1085_v17 }
 0x48e   :  { %v5928_v19 = vpop.eup %5927 }
 0x48f   :  { %v1090_v23 = vrot.slane %v5928_v19, 4 }
 0x491   :  { %1099 = vrot.lane.b32.xlu0 %v1090_v23, %s6174_s5  ;;  %1092 = vrot.lane.b32.xlu1 %v1090_v23, %s6175_s15 }
 0x4d2   :  { %v897_v25 = vpop.permute.xlu0 %896 }
 0x4d3   :  { %v901_v32 = vmul.f32 %v5922_v28, %v897_v25 }
 0x4e1   :  { %v895_v31 = vpop.permute.xlu1 %894 }
 0x4e2   :  { %v900_v34 = vmul.f32 %v895_v31, %v6551_v33  ;;  %v1510_v31 = vld [vmem:[#allocation5] sm:$0xff] }
 0x4e4   :  { %v6648_v36 = vadd.f32 %v901_v32, %v900_v34  ;;  %v1511_v32 = vld [vmem:[#allocation5 + $0x8] sm:$0xff] }
 0x4e5   :  { %v899_v44 = vpop.permute.xlu1 %898 }
 0x4e6   :  { %5929 = vtanh.f32 %v6648_v36 }
 0x4f0   :  { %v5930_v41 = vpop.eup %5929 }
 0x4f1   :  { %v904_v46 = vmul.f32 %v5930_v41, %v899_v44  ;;  %v6736_v41 = vpack.c.bf16 %v1511_v32, %v1510_v31  ;;  %v1532_v31 = vld [vmem:[#allocation7 + $0x30] sm:$0xff]  ;;  %v1533_v32 = vld [vmem:[#allocation7 + $0x38] sm:$0xff] }
 0x4f3   :  { %4264 = vmatmul.mubr.f32.vlgmr.msra.gmra.mrb[8].mxu0 %v904_v46 }
 0x4f4   :  { %5328 = vmatpush3.bf16.msra.mxu0 %v6383_v39  ;;  %4333 = vmatprep.mubr.msk.f32.mxu0 %vm6172_vm0, %v6173_v1  ;;  %v1098_v47 = vpop.permute.xlu0 %1097 }
 0x4f5   :  { %5329 = vmatprep.subr.bf16.mxu0 %v6171_v0  ;;  %v1103_v33 = vrot.slane %v1098_v47, 4  ;;  %v1513_v47 = vld [vmem:[#allocation5 + $0x18] sm:$0xff] }
 0x4f7   :  { %v1105_v53 = vmul.f32 %v5928_v19, %v1103_v33 }
 0x4f8   :  { %5331 = vmatpush3.bf16.msra.mxu0 %v6390_v43 }
 0x4f9   :  { %5332 = vmatprep.subr.bf16.mxu0 %v6171_v0  ;;  %v1107_v55 = vrot.slane %v1105_v53, 4  ;;  %v1515_v53 = vld [vmem:[#allocation5 + $0x28] sm:$0xff] }
 0x4fc   :  { %5334 = vmatpush3.bf16.msra.mxu0 %v6398_v49  ;;  %v1390_v49 = vld [vmem:[#allocation2] sm:$0xff] }
 0x4fd   :  { %5335 = vmatprep.subr.bf16.mxu0 %v6171_v0 }
 0x500   :  { %5337 = vmatpush3.bf16.msra.mxu0 %v6415_v4  ;;  %v1391_v4 = vld [vmem:[#allocation2 + $0x8] sm:$0xff] }
 0x501   :  { %5338 = vmatprep.subr.bf16.mxu0 %v6171_v0  ;;  %v6673_v51 = vpack.c.bf16 %v1391_v4, %v1390_v49 }
 0x503   :  { %v1093_v39 = vpop.permute.xlu1 %1092 }
 0x504   :  { %v1101_v56 = vmul.f32 %v1093_v39, %v6567_v58  ;;  %5340 = vmatpush3.bf16.msra.mxu0 %v6423_v12  ;;  %v1100_v58 = vpop.permute.xlu0 %1099 }
 0x505   :  { %5341 = vmatprep.subr.bf16.mxu0 %v6171_v0 }
 0x506   :  { %v6664_v43 = vadd.f32 %v1107_v55, %v1101_v56  ;;  %v1516_v55 = vld [vmem:[#allocation5 + $0x30] sm:$0xff]  ;;  %v1517_v56 = vld [vmem:[#allocation5 + $0x38] sm:$0xff] }
 0x507   :  { %v6748_v4 = vpack.c.bf16 %v1517_v56, %v1516_v55  ;;  %v1536_v55 = vld [vmem:[#allocation7 + $0x50] sm:$0xff]  ;;  %v1537_v56 = vld [vmem:[#allocation7 + $0x58] sm:$0xff] }
 0x508   :  { %5931 = vtanh.f32 %v6664_v43  ;;  %5343 = vmatpush3.bf16.msra.mxu0 %v6431_v20  ;;  %v1393_v20 = vld [vmem:[#allocation2 + $0x18] sm:$0xff] }
 0x509   :  { %5344 = vmatprep.subr.bf16.mxu0 %v6171_v0 }
 0x50c   :  { %5346 = vmatpush3.bf16.msra.mxu0 %v6438_v29  ;;  %v6680_v29 = vpack.c.bf16 %v1393_v20, %v1392_v61  ;;  %v1518_v61 = vld [vmem:[#allocation5 + $0x40] sm:$0xff]  ;;  %v1519_v20 = vld [vmem:[#allocation5 + $0x48] sm:$0xff] }
 0x50d   :  { %5347 = vmatprep.subr.bf16.mxu0 %v6171_v0 }
 0x510   :  { %5349 = vmatpush3.bf16.msra.mxu0 %v6447_v38  ;;  %v1394_v38 = vld [vmem:[#allocation2 + $0x20] sm:$0xff] }
 0x511   :  { %5374 = vmatprep.subr.bf16.mxu0 %v6171_v0 }
 0x512   :  { %v5932_v12 = vpop.eup %5931 }
 0x513   :  { %4334 = vmatmul.mubr.f32.vlgmr.msra.gmra.mrb[10].mxu0 %v904_v46  ;;  %v1111_v60 = vmul.f32 %v5932_v12, %v1100_v58  ;;  %v1512_v46 = vld [vmem:[#allocation5 + $0x10] sm:$0xff] }
 0x514   :  { %5376 = vmatpush3.bf16.msra.mxu0 %v6508_v6  ;;  %4403 = vmatprep.mubr.msk.f32.mxu0 %vm6172_vm0, %v6173_v1  ;;  %v6688_v6 = vpack.c.bf16 %v1395_v7, %v1394_v38  ;;  %v6740_v33 = vpack.c.bf16 %v1513_v47, %v1512_v46  ;;  %v6753_v38 = vpack.c.bf16 %v1519_v20, %v1518_v61  ;;  %v1520_v7 = vld [vmem:[#allocation5 + $0x50] sm:$0xff]  ;;  %v1534_v46 = vld [vmem:[#allocation7 + $0x40] sm:$0xff]  ;;  %v1535_v47 = vld [vmem:[#allocation7 + $0x48] sm:$0xff] }
 0x515   :  { %4369 = vmatmul.mubr.f32.vlgmr.msra.gmra.mrb[10].mxu1 %v1111_v60  ;;  %5377 = vmatprep.subr.bf16.mxu0 %v6171_v0  ;;  %v6757_v18 = vpack.c.bf16 %v1521_v14, %v1520_v7  ;;  %v1538_v61 = vld [vmem:[#allocation7 + $0x60] sm:$0xff]  ;;  %v1539_v20 = vld [vmem:[#allocation7 + $0x68] sm:$0xff] }
 0x516   :  { %5400 = vmatpush3.bf16.msra.mxu1 %v6673_v51  ;;  %4438 = vmatprep.mubr.msk.f32.mxu1 %vm6172_vm0, %v6173_v1  ;;  %v6804_v14 = vpack.c.bf16 %v1539_v20, %v1538_v61  ;;  %v1711_v20 = vld [vmem:[#allocation8 + $0x50] sm:$0xff] }
 0x517   :  { %5401 = vmatprep.subr.bf16.mxu1 %v6171_v0 }
 0x518   :  { %5379 = vmatpush3.bf16.msra.mxu0 %v6512_v13  ;;  %v1398_v13 = vld [vmem:[#allocation2 + $0x40] sm:$0xff] }
 0x519   :  { %5380 = vmatprep.subr.bf16.mxu0 %v6171_v0  ;;  %v6700_v27 = vpack.c.bf16 %v1399_v24, %v1398_v13  ;;  %v1522_v13 = vld [vmem:[#allocation5 + $0x60] sm:$0xff]  ;;  %v1523_v24 = vld [vmem:[#allocation5 + $0x68] sm:$0xff] }
 0x51a   :  { %5403 = vmatpush3.bf16.msra.mxu1 %v6680_v29 }
 0x51b   :  { %5404 = vmatprep.subr.bf16.mxu1 %v6171_v0 }
 0x51c   :  { %5382 = vmatpush3.bf16.msra.mxu0 %v6516_v22  ;;  %v1400_v22 = vld [vmem:[#allocation2 + $0x50] sm:$0xff] }
 0x51d   :  { %5383 = vmatprep.subr.bf16.mxu0 %v6171_v0  ;;  %v6706_v35 = vpack.c.bf16 %v1401_v30, %v1400_v22  ;;  %v6761_v22 = vpack.c.bf16 %v1523_v24, %v1522_v13  ;;  %v1540_v13 = vld [vmem:[#allocation7 + $0x70] sm:$0xff] }
 0x51e   :  { %5406 = vmatpush3.bf16.msra.mxu1 %v6688_v6 }
 0x51f   :  { %5407 = vmatprep.subr.bf16.mxu1 %v6171_v0 }
 0x520   :  { %5385 = vmatpush3.bf16.msra.mxu0 %v6520_v26  ;;  %v1402_v26 = vld [vmem:[#allocation2 + $0x60] sm:$0xff] }
 0x521   :  { %5386 = vmatprep.subr.bf16.mxu0 %v6171_v0  ;;  %v6712_v48 = vpack.c.bf16 %v1403_v42, %v1402_v26  ;;  %v1524_v26 = vld [vmem:[#allocation5 + $0x70] sm:$0xff]  ;;  %v1525_v42 = vld [vmem:[#allocation5 + $0x78] sm:$0xff] }
 0x522   :  { %5409 = vmatpush3.bf16.msra.mxu1 %v6694_v21 }
 0x523   :  { %5410 = vmatprep.subr.bf16.mxu1 %v6171_v0 }
 0x524   :  { %5388 = vmatpush3.bf16.msra.mxu0 %v6526_v40  ;;  %v1404_v40 = vld [vmem:[#allocation2 + $0x70] sm:$0xff] }
 0x525   :  { %5389 = vmatprep.subr.bf16.mxu0 %v6171_v0  ;;  %v6718_v9 = vpack.c.bf16 %v1405_v62, %v1404_v40  ;;  %v6765_v62 = vpack.c.bf16 %v1525_v42, %v1524_v26 }
 0x526   :  { %5412 = vmatpush3.bf16.msra.mxu1 %v6700_v27 }
 0x527   :  { %5413 = vmatprep.subr.bf16.mxu1 %v6171_v0 }
 0x528   :  { %5391 = vmatpush3.bf16.msra.mxu0 %v6530_v45 }
 0x529   :  { %5392 = vmatprep.subr.bf16.mxu0 %v6171_v0 }
 0x52a   :  { %5415 = vmatpush3.bf16.msra.mxu1 %v6706_v35 }
 0x52b   :  { %5416 = vmatprep.subr.bf16.mxu1 %v6171_v0 }
 0x52c   :  { %5394 = vmatpush3.bf16.msra.mxu0 %v6534_v50 }
 0x52d   :  { %5395 = vmatprep.subr.bf16.mxu0 %v6171_v0 }
 0x52e   :  { %5418 = vmatpush3.bf16.msra.mxu1 %v6712_v48 }
 0x52f   :  { %5419 = vmatprep.subr.bf16.mxu1 %v6171_v0 }
 0x530   :  { %5397 = vmatpush3.bf16.msra.mxu0 %v6538_v57 }
 0x531   :  { %5422 = vmatprep.subr.bf16.mxu0 %v6171_v0 }
 0x532   :  { %5421 = vmatpush3.bf16.msra.mxu1 %v6718_v9 }
 0x533   :  { %5446 = vmatprep.subr.bf16.mxu1 %v6171_v0 }
 0x535   :  { %4439 = vmatmul.mubr.f32.vlgmr.msra.gmra.mrb[12].mxu1 %v1111_v60 }
 0x536   :  { %4508 = vmatprep.mubr.msk.f32.mxu1 %vm6172_vm0, %v6173_v1  ;;  %5448 = vmatpush3.bf16.msra.mxu1 %v6736_v41 }
 0x537   :  { %5449 = vmatprep.subr.bf16.mxu1 %v6171_v0 }
 0x53a   :  { %5451 = vmatpush3.bf16.msra.mxu1 %v6740_v33 }
 0x53b   :  { %5452 = vmatprep.subr.bf16.mxu1 %v6171_v0 }
 0x5c6   :  { %v987_v45 = vpop.f32.mrb[8].mxu0 }
 0x5c7   :  { %v988_v50 = vadd.f32 %v6633_v5, %v987_v45  ;;  %v4265_v16 = vpop.f32.mrb[9].mxu0 }
 0x5c9   :  { %991 = vst [vmem:[%s7336_s11 + $0x2] sm:$0x3] %v988_v50 }
 0x5e6   :  { %v1210_v28 = vpop.f32.mrb[10].mxu0 }
 0x5e7   :  { %v4335_v57 = vpop.f32.mrb[11].mxu0 }
 0x5e8   :  { %v1280_v37 = vpop.f32.mrb[10].mxu1 }
 0x5e9   :  { %v1281_v63 = vadd.f32 %v1280_v37, %v1210_v28  ;;  %v4370_v2 = vpop.f32.mrb[11].mxu1  ;;  %v1526_v37 = vld [vmem:[#allocation7] sm:$0xff] }
 0x5eb   :  { %v1284_v3 = vadd.f32 %v6506_v59, %v1281_v63  ;;  %v1527_v63 = vld [vmem:[#allocation7 + $0x8] sm:$0xff] }
 0x5ed   :  { %v3420_v8 = vmul.f32 -1.442695, %v1284_v3  ;;  %5933 = vtanh.f32 %v1284_v3 }
 0x5ef   :  { %5935 = vpow2.f32 %v3420_v8  ;;  %v6775_v8 = vpack.c.bf16 %v1527_v63, %v1526_v37 }
 0x5f7   :  { %v5934_v10 = vpop.eup %5933 }
 0x5f8   :  { %1294 = vrot.lane.b32.xlu0 %v5934_v10, %s6176_s16 }
 0x5f9   :  { %v5936_v11 = vpop.eup %5935 }
 0x5fa   :  { %v1288_v15 = vadd.f32 1.0, %v5936_v11  ;;  %v1528_v11 = vld [vmem:[#allocation7 + $0x10] sm:$0xff] }
 0x5fc   :  { %5937 = vrcp.f32 %v1288_v15  ;;  %v1529_v15 = vld [vmem:[#allocation7 + $0x18] sm:$0xff] }
 0x606   :  { %v5938_v17 = vpop.eup %5937 }
 0x607   :  { %1292 = vrot.lane.b32.xlu1 %v5938_v17, %s6175_s15 }
 0x608   :  { %v1472_v19 = vpop.f32.mrb[12].mxu1 }
 0x609   :  { %v1477_v23 = vrot.slane %v1472_v19, 2  ;;  %v4440_v25 = vpop.f32.mrb[13].mxu1  ;;  %v6778_v19 = vpack.c.bf16 %v1529_v15, %v1528_v11 }
 0x60b   :  { %v1479_v34 = vadd.f32 %v1477_v23, %v6410_v54  ;;  %1296 = vrot.lane.b32.xlu1 %v5938_v17, %s6174_s5  ;;  %v1514_v54 = vld [vmem:[#allocation5 + $0x20] sm:$0xff] }
 0x60c   :  { %v6744_v39 = vpack.c.bf16 %v1515_v53, %v1514_v54  ;;  %v6792_v53 = vpack.c.bf16 %v1535_v47, %v1534_v46  ;;  %v1708_v47 = vld [vmem:[#allocation8 + $0x38] sm:$0xff] }
 0x60d   :  { %v3421_v44 = vmul.f32 -1.442695, %v1479_v34  ;;  %5939 = vtanh.f32 %v1479_v34 }
 0x60e   :  { %5454 = vmatpush3.bf16.msra.mxu1 %v6744_v39 }
 0x60f   :  { %5941 = vpow2.f32 %v3421_v44  ;;  %5455 = vmatprep.subr.bf16.mxu1 %v6171_v0  ;;  %v6788_v44 = vpack.c.bf16 %v1533_v32, %v1532_v31  ;;  %v1705_v32 = vld [vmem:[#allocation8 + $0x20] sm:$0xff] }
 0x612   :  { %5457 = vmatpush3.bf16.msra.mxu1 %v6748_v4 }
 0x613   :  { %5458 = vmatprep.subr.bf16.mxu1 %v6171_v0 }
 0x616   :  { %5460 = vmatpush3.bf16.msra.mxu1 %v6753_v38 }
 0x617   :  { %v5940_v49 = vpop.eup %5939  ;;  %5461 = vmatprep.subr.bf16.mxu1 %v6171_v0 }
 0x618   :  { %v1493_v12 = vrot.slane %v5940_v49, 6 }
 0x619   :  { %v5942_v58 = vpop.eup %5941 }
 0x61a   :  { %v1483_v60 = vadd.f32 1.0, %v5942_v58  ;;  %1495 = vrot.lane.b32.xlu0 %v1493_v12, %s6176_s16  ;;  %5463 = vmatpush3.bf16.msra.mxu1 %v6757_v18 }
 0x61b   :  { %5464 = vmatprep.subr.bf16.mxu1 %v6171_v0 }
 0x61c   :  { %5943 = vrcp.f32 %v1483_v60  ;;  %v6797_v60 = vpack.c.bf16 %v1537_v56, %v1536_v55 }
 0x61e   :  { %5466 = vmatpush3.bf16.msra.mxu1 %v6761_v22 }
 0x61f   :  { %5467 = vmatprep.subr.bf16.mxu1 %v6171_v0 }
 0x622   :  { %5469 = vmatpush3.bf16.msra.mxu1 %v6765_v62 }
 0x623   :  { %5494 = vmatprep.subr.bf16.mxu1 %v6171_v0 }
 0x626   :  { %v5944_v30 = vpop.eup %5943 }
 0x627   :  { %v1488_v40 = vrot.slane %v5944_v30, 6 }
 0x629   :  { %1497 = vrot.lane.b32.xlu0 %v1488_v40, %s6174_s5  ;;  %1490 = vrot.lane.b32.xlu1 %v1488_v40, %s6175_s15 }
 0x66a   :  { %v1295_v45 = vpop.permute.xlu0 %1294 }
 0x66b   :  { %v1299_v16 = vmul.f32 %v5938_v17, %v1295_v45  ;;  %v1531_v17 = vld [vmem:[#allocation7 + $0x28] sm:$0xff] }
 0x679   :  { %v1293_v50 = vpop.permute.xlu1 %1292 }
 0x67a   :  { %v1298_v28 = vmul.f32 %v1293_v50, %v6648_v36  ;;  %v1530_v36 = vld [vmem:[#allocation7 + $0x20] sm:$0xff] }
 0x67b   :  { %v6784_v23 = vpack.c.bf16 %v1531_v17, %v1530_v36  ;;  %v1703_v36 = vld [vmem:[#allocation8 + $0x10] sm:$0xff]  ;;  %v1704_v17 = vld [vmem:[#allocation8 + $0x18] sm:$0xff] }
 0x67c   :  { %v6772_v57 = vadd.f32 %v1299_v16, %v1298_v28 }
 0x67d   :  { %v1297_v3 = vpop.permute.xlu1 %1296 }
 0x67e   :  { %5945 = vtanh.f32 %v6772_v57 }
 0x688   :  { %v5946_v2 = vpop.eup %5945 }
 0x689   :  { %v1302_v10 = vmul.f32 %v5946_v2, %v1297_v3  ;;  %v1701_v3 = vld [vmem:[#allocation8] sm:$0xff] }
 0x68b   :  { %4404 = vmatmul.mubr.f32.vlgmr.msra.gmra.mrb[12].mxu0 %v1302_v10 }
 0x68c   :  { %5424 = vmatpush3.bf16.msra.mxu0 %v6775_v8  ;;  %4473 = vmatprep.mubr.msk.f32.mxu0 %vm6172_vm0, %v6173_v1  ;;  %v1496_v25 = vpop.permute.xlu0 %1495 }
 0x68d   :  { %5425 = vmatprep.subr.bf16.mxu0 %v6171_v0  ;;  %v1501_v34 = vrot.slane %v1496_v25, 2  ;;  %v6859_v25 = vpack.c.bf16 %v1704_v17, %v1703_v36 }
 0x68f   :  { %v1503_v54 = vmul.f32 %v5944_v30, %v1501_v34  ;;  %v1706_v34 = vld [vmem:[#allocation8 + $0x28] sm:$0xff] }
 0x690   :  { %5427 = vmatpush3.bf16.msra.mxu0 %v6778_v19  ;;  %v6863_v46 = vpack.c.bf16 %v1706_v34, %v1705_v32 }
 0x691   :  { %5428 = vmatprep.subr.bf16.mxu0 %v6171_v0  ;;  %v1505_v12 = vrot.slane %v1503_v54, 6 }
 0x694   :  { %5430 = vmatpush3.bf16.msra.mxu0 %v6784_v23 }
 0x695   :  { %5431 = vmatprep.subr.bf16.mxu0 %v6171_v0 }
 0x698   :  { %5433 = vmatpush3.bf16.msra.mxu0 %v6788_v44 }
 0x699   :  { %5434 = vmatprep.subr.bf16.mxu0 %v6171_v0 }
 0x69b   :  { %v1491_v49 = vpop.permute.xlu1 %1490  ;;  %v1498_v26 = vpop.permute.xlu0 %1497 }
 0x69c   :  { %v1499_v58 = vmul.f32 %v1491_v49, %v6664_v43  ;;  %5436 = vmatpush3.bf16.msra.mxu0 %v6792_v53  ;;  %v1541_v43 = vld [vmem:[#allocation7 + $0x78] sm:$0xff]  ;;  %v1709_v49 = vld [vmem:[#allocation8 + $0x40] sm:$0xff] }
 0x69d   :  { %5437 = vmatprep.subr.bf16.mxu0 %v6171_v0  ;;  %v6808_v24 = vpack.c.bf16 %v1541_v43, %v1540_v13  ;;  %v1712_v13 = vld [vmem:[#allocation8 + $0x58] sm:$0xff] }
 0x69e   :  { %v6800_v7 = vadd.f32 %v1505_v12, %v1499_v58  ;;  %v1710_v12 = vld [vmem:[#allocation8 + $0x48] sm:$0xff]  ;;  %v6877_v43 = vpack.c.bf16 %v1712_v13, %v1711_v20 }
 0x69f   :  { %v6873_v61 = vpack.c.bf16 %v1710_v12, %v1709_v49 }
 0x6a0   :  { %5947 = vtanh.f32 %v6800_v7  ;;  %5439 = vmatpush3.bf16.msra.mxu0 %v6797_v60 }
 0x6a1   :  { %5440 = vmatprep.subr.bf16.mxu0 %v6171_v0 }
 0x6a4   :  { %5442 = vmatpush3.bf16.msra.mxu0 %v6804_v14 }
 0x6a5   :  { %5443 = vmatprep.subr.bf16.mxu0 %v6171_v0 }
 0x6a8   :  { %5445 = vmatpush3.bf16.msra.mxu0 %v6808_v24 }
 0x6a9   :  { %5470 = vmatprep.subr.bf16.mxu0 %v6171_v0 }
 0x6aa   :  { %v5948_v30 = vpop.eup %5947 }
 0x6ab   :  { %4474 = vmatmul.mubr.f32.vlgmr.msra.gmra.mrb[14].mxu0 %v1302_v10  ;;  %v1509_v42 = vmul.f32 %v5948_v30, %v1498_v26  ;;  %v1702_v10 = vld [vmem:[#allocation8 + $0x8] sm:$0xff]  ;;  %v1713_v30 = vld [vmem:[#allocation8 + $0x60] sm:$0xff] }
 0x6ac   :  { %4543 = vmatprep.mubr.msk.f32.mxu0 %vm6172_vm0, %v6173_v1  ;;  %v6855_v11 = vpack.c.bf16 %v1702_v10, %v1701_v3  ;;  %v1714_v26 = vld [vmem:[#allocation8 + $0x68] sm:$0xff] }
 0x6ad   :  { %4509 = vmatmul.mubr.f32.vlgmr.msra.gmra.mrb[14].mxu1 %v1509_v42 }
 0x6ae   :  { %5496 = vmatpush3.bf16.msra.mxu1 %v6673_v51  ;;  %4578 = vmatprep.mubr.msk.f32.mxu1 %vm6172_vm0, %v6173_v1 }
 0x6af   :  { %5497 = vmatprep.subr.bf16.mxu1 %v6171_v0  ;;  %5472 = vmatpush3.bf16.msra.mxu0 %v6855_v11 }
 0x6b0   :  { %5473 = vmatprep.subr.bf16.mxu0 %v6171_v0 }
 0x6b2   :  { %5499 = vmatpush3.bf16.msra.mxu1 %v6680_v29 }
 0x6b3   :  { %5500 = vmatprep.subr.bf16.mxu1 %v6171_v0  ;;  %5475 = vmatpush3.bf16.msra.mxu0 %v6859_v25 }
 0x6b4   :  { %5476 = vmatprep.subr.bf16.mxu0 %v6171_v0 }
 0x6b6   :  { %5502 = vmatpush3.bf16.msra.mxu1 %v6688_v6 }
 0x6b7   :  { %5503 = vmatprep.subr.bf16.mxu1 %v6171_v0  ;;  %5478 = vmatpush3.bf16.msra.mxu0 %v6863_v46 }
 0x6b8   :  { %5479 = vmatprep.subr.bf16.mxu0 %v6171_v0 }
 0x6ba   :  { %5505 = vmatpush3.bf16.msra.mxu1 %v6694_v21 }
 0x6bb   :  { %5506 = vmatprep.subr.bf16.mxu1 %v6171_v0 }
 0x6be   :  { %5508 = vmatpush3.bf16.msra.mxu1 %v6700_v27 }
 0x6bf   :  { %5509 = vmatprep.subr.bf16.mxu1 %v6171_v0 }
 0x6c2   :  { %5511 = vmatpush3.bf16.msra.mxu1 %v6706_v35 }
 0x6c3   :  { %5512 = vmatprep.subr.bf16.mxu1 %v6171_v0 }
 0x6c6   :  { %5514 = vmatpush3.bf16.msra.mxu1 %v6712_v48 }
 0x6c7   :  { %5515 = vmatprep.subr.bf16.mxu1 %v6171_v0 }
 0x6ca   :  { %5517 = vmatpush3.bf16.msra.mxu1 %v6718_v9 }
 0x6cb   :  { %5542 = vmatprep.subr.bf16.mxu1 %v6171_v0 }
 0x6cd   :  { %4579 = vmatmul.mubr.f32.vlgmr.msra.gmra.mrb[16].mxu1 %v1509_v42  ;;  %v6881_v42 = vpack.c.bf16 %v1714_v26, %v1713_v30 }
 0x6ce   :  { %5544 = vmatpush3.bf16.msra.mxu1 %v6736_v41  ;;  %4648 = vmatprep.mubr.msk.f32.mxu1 %vm6172_vm0, %v6173_v1 }
 0x6cf   :  { %5545 = vmatprep.subr.bf16.mxu1 %v6171_v0 }
 0x6d2   :  { %5547 = vmatpush3.bf16.msra.mxu1 %v6740_v33 }
 0x6d3   :  { %5548 = vmatprep.subr.bf16.mxu1 %v6171_v0 }
 0x6d6   :  { %5550 = vmatpush3.bf16.msra.mxu1 %v6744_v39 }
 0x6d7   :  { %5551 = vmatprep.subr.bf16.mxu1 %v6171_v0 }
 0x6da   :  { %5553 = vmatpush3.bf16.msra.mxu1 %v6748_v4 }
 0x6db   :  { %5554 = vmatprep.subr.bf16.mxu1 %v6171_v0 }
 0x6de   :  { %5556 = vmatpush3.bf16.msra.mxu1 %v6753_v38 }
 0x6df   :  { %5557 = vmatprep.subr.bf16.mxu1 %v6171_v0 }
 0x6e2   :  { %5559 = vmatpush3.bf16.msra.mxu1 %v6757_v18 }
 0x6e3   :  { %5560 = vmatprep.subr.bf16.mxu1 %v6171_v0 }
 0x6e6   :  { %5562 = vmatpush3.bf16.msra.mxu1 %v6761_v22 }
 0x6e7   :  { %5563 = vmatprep.subr.bf16.mxu1 %v6171_v0 }
 0x6ea   :  { %5565 = vmatpush3.bf16.msra.mxu1 %v6765_v62 }
 0x6eb   :  { %5590 = vmatprep.subr.bf16.mxu1 %v6171_v0 }
 0x75e   :  { %v1385_v40 = vpop.f32.mrb[12].mxu0 }
 0x75f   :  { %v1386_v45 = vadd.f32 %v6633_v5, %v1385_v40  ;;  %v4405_v50 = vpop.f32.mrb[13].mxu0  ;;  %v1715_v40 = vld [vmem:[#allocation8 + $0x70] sm:$0xff] }
 0x761   :  { %1389 = vst [vmem:[%s7336_s11 + $0x4] sm:$0x3] %v1386_v45  ;;  %v1716_v45 = vld [vmem:[#allocation8 + $0x78] sm:$0xff] }
 0x77e   :  { %v1608_v16 = vpop.f32.mrb[14].mxu0 }
 0x77f   :  { %v4475_v28 = vpop.f32.mrb[15].mxu0 }
 0x780   :  { %v1678_v37 = vpop.f32.mrb[14].mxu1 }
 0x781   :  { %v1679_v63 = vadd.f32 %v1678_v37, %v1608_v16  ;;  %v4510_v2 = vpop.f32.mrb[15].mxu1  ;;  %v6885_v16 = vpack.c.bf16 %v1716_v45, %v1715_v40 }
 0x783   :  { %v1682_v15 = vadd.f32 %v6506_v59, %v1679_v63  ;;  %v1707_v59 = vld [vmem:[#allocation8 + $0x30] sm:$0xff] }
 0x784   :  { %v6867_v54 = vpack.c.bf16 %v1708_v47, %v1707_v59 }
 0x785   :  { %v3422_v31 = vmul.f32 -1.442695, %v1682_v15  ;;  %5949 = vtanh.f32 %v1682_v15 }
 0x786   :  { %5481 = vmatpush3.bf16.msra.mxu0 %v6867_v54 }
 0x787   :  { %5951 = vpow2.f32 %v3422_v31  ;;  %5482 = vmatprep.subr.bf16.mxu0 %v6171_v0 }
 0x78a   :  { %5484 = vmatpush3.bf16.msra.mxu0 %v6873_v61 }
 0x78b   :  { %5485 = vmatprep.subr.bf16.mxu0 %v6171_v0 }
 0x78e   :  { %5487 = vmatpush3.bf16.msra.mxu0 %v6877_v43 }
 0x78f   :  { %v5950_v55 = vpop.eup %5949  ;;  %5488 = vmatprep.subr.bf16.mxu0 %v6171_v0 }
 0x790   :  { %1692 = vrot.lane.b32.xlu0 %v5950_v55, %s6176_s16 }
 0x791   :  { %v5952_v56 = vpop.eup %5951 }
 0x792   :  { %v1686_v58 = vadd.f32 1.0, %v5952_v56  ;;  %5490 = vmatpush3.bf16.msra.mxu0 %v6881_v42 }
 0x793   :  { %5491 = vmatprep.subr.bf16.mxu0 %v6171_v0 }
 0x794   :  { %5953 = vrcp.f32 %v1686_v58 }
 0x796   :  { %5493 = vmatpush3.bf16.msra.mxu0 %v6885_v16 }
 0x797   :  { %5518 = vmatprep.subr.bf16.mxu0 %v6171_v0 }
 0x79e   :  { %v5954_v50 = vpop.eup %5953 }
 0x79f   :  { %1690 = vrot.lane.b32.xlu1 %v5954_v50, %s6175_s15 }
 0x7a0   :  { %v1870_v28 = vpop.f32.mrb[16].mxu1 }
 0x7a1   :  { %v1874_v37 = vadd.f32 %v1870_v28, %v6408_v52  ;;  %v4580_v63 = vpop.f32.mrb[17].mxu1 }
 0x7a3   :  { %v3423_v2 = vmul.f32 -1.442695, %v1874_v37  ;;  %5955 = vtanh.f32 %v1874_v37  ;;  %1694 = vrot.lane.b32.xlu1 %v5954_v50, %s6174_s5 }
 0x7a5   :  { %5957 = vpow2.f32 %v3423_v2 }
 0x7ad   :  { %v5956_v3 = vpop.eup %5955 }
 0x7ae   :  { %1884 = vrot.lane.b32.xlu1 %v5956_v3, %s6176_s16 }
 0x7af   :  { %v5958_v10 = vpop.eup %5957 }
 0x7b0   :  { %v1878_v15 = vadd.f32 1.0, %v5958_v10 }
 0x7b2   :  { %5959 = vrcp.f32 %v1878_v15 }
 0x7bc   :  { %v5960_v36 = vpop.eup %5959 }
 0x7bd   :  { %1882 = vrot.lane.b32.xlu0 %v5960_v36, %s6175_s15 }
 0x7c1   :  { %1886 = vrot.lane.b32.xlu0 %v5960_v36, %s6174_s5 }
 0x802   :  { %v1693_v17 = vpop.permute.xlu0 %1692 }
 0x803   :  { %v1697_v32 = vmul.f32 %v5954_v50, %v1693_v17 }
 0x811   :  { %v1691_v31 = vpop.permute.xlu1 %1690 }
 0x812   :  { %v1696_v34 = vmul.f32 %v1691_v31, %v6772_v57 }
 0x814   :  { %v6896_v59 = vadd.f32 %v1697_v32, %v1696_v34 }
 0x815   :  { %v1695_v55 = vpop.permute.xlu1 %1694 }
 0x816   :  { %5961 = vtanh.f32 %v6896_v59 }
 0x820   :  { %v5962_v47 = vpop.eup %5961  ;;  %v1885_v57 = vpop.permute.xlu1 %1884 }
 0x821   :  { %v1700_v56 = vmul.f32 %v5962_v47, %v1695_v55  ;;  %v1889_v12 = vmul.f32 %v5960_v36, %v1885_v57 }
 0x823   :  { %4544 = vmatmul.mubr.f32.vlgmr.msra.gmra.mrb[16].mxu0 %v1700_v56 }
 0x824   :  { %5520 = vmatpush3.bf16.msra.mxu0 %v6775_v8  ;;  %4613 = vmatprep.mubr.msk.f32.mxu0 %vm6172_vm0, %v6173_v1 }
 0x825   :  { %5521 = vmatprep.subr.bf16.mxu0 %v6171_v0 }
 0x828   :  { %5523 = vmatpush3.bf16.msra.mxu0 %v6778_v19 }
 0x829   :  { %5524 = vmatprep.subr.bf16.mxu0 %v6171_v0 }
 0x82c   :  { %5526 = vmatpush3.bf16.msra.mxu0 %v6784_v23 }
 0x82d   :  { %5527 = vmatprep.subr.bf16.mxu0 %v6171_v0 }
 0x82f   :  { %v1883_v49 = vpop.permute.xlu0 %1882 }
 0x830   :  { %v1888_v58 = vmul.f32 %v1883_v49, %v6800_v7  ;;  %5529 = vmatpush3.bf16.msra.mxu0 %v6788_v44 }
 0x831   :  { %5530 = vmatprep.subr.bf16.mxu0 %v6171_v0 }
 0x832   :  { %v6910_v20 = vadd.f32 %v1889_v12, %v1888_v58 }
 0x833   :  { %v1887_v13 = vpop.permute.xlu0 %1886 }
 0x834   :  { %5963 = vtanh.f32 %v6910_v20  ;;  %5532 = vmatpush3.bf16.msra.mxu0 %v6792_v53 }
 0x835   :  { %5533 = vmatprep.subr.bf16.mxu0 %v6171_v0 }
 0x838   :  { %5535 = vmatpush3.bf16.msra.mxu0 %v6797_v60 }
 0x839   :  { %5536 = vmatprep.subr.bf16.mxu0 %v6171_v0 }
 0x83c   :  { %5538 = vmatpush3.bf16.msra.mxu0 %v6804_v14 }
 0x83d   :  { %5539 = vmatprep.subr.bf16.mxu0 %v6171_v0 }
 0x83e   :  { %v5964_v7 = vpop.eup %5963 }
 0x83f   :  { %v1892_v30 = vmul.f32 %v5964_v7, %v1887_v13  ;;  %v2571_v7 = vld [vmem:[#allocation2 + $0x10] sm:$0xff]  ;;  %v2572_v13 = vld [vmem:[#allocation2 + $0x18] sm:$0xff] }
 0x840   :  { %5541 = vmatpush3.bf16.msra.mxu0 %v6808_v24 }
 0x841   :  { %4649 = vmatmul.mubr.f32.vlgmr.msra.gmra.mrb[18].mxu1 %v1892_v30  ;;  %5566 = vmatprep.subr.bf16.mxu0 %v6171_v0 }
 0x842   :  { %5592 = vmatpush3.bf16.msra.mxu1 %v6673_v51  ;;  %4718 = vmatprep.mubr.msk.f32.mxu1 %vm6172_vm0, %v6173_v1 }
 0x843   :  { %4614 = vmatmul.mubr.f32.vlgmr.msra.gmra.mrb[18].mxu0 %v1700_v56  ;;  %5593 = vmatprep.subr.bf16.mxu1 %v6171_v0 }
 0x844   :  { %5568 = vmatpush3.bf16.msra.mxu0 %v6855_v11  ;;  %4683 = vmatprep.mubr.msk.f32.mxu0 %vm6172_vm0, %v6173_v1 }
 0x845   :  { %5569 = vmatprep.subr.bf16.mxu0 %v6171_v0 }
 0x846   :  { %5595 = vmatpush3.bf16.msra.mxu1 %v6680_v29 }
 0x847   :  { %5596 = vmatprep.subr.bf16.mxu1 %v6171_v0 }
 0x848   :  { %5571 = vmatpush3.bf16.msra.mxu0 %v6859_v25 }
 0x849   :  { %5572 = vmatprep.subr.bf16.mxu0 %v6171_v0 }
 0x84a   :  { %5598 = vmatpush3.bf16.msra.mxu1 %v6688_v6 }
 0x84b   :  { %5599 = vmatprep.subr.bf16.mxu1 %v6171_v0 }
 0x84c   :  { %5574 = vmatpush3.bf16.msra.mxu0 %v6863_v46 }
 0x84d   :  { %5575 = vmatprep.subr.bf16.mxu0 %v6171_v0 }
 0x84e   :  { %5601 = vmatpush3.bf16.msra.mxu1 %v6694_v21 }
 0x84f   :  { %5602 = vmatprep.subr.bf16.mxu1 %v6171_v0 }
 0x850   :  { %5577 = vmatpush3.bf16.msra.mxu0 %v6867_v54 }
 0x851   :  { %5578 = vmatprep.subr.bf16.mxu0 %v6171_v0 }
 0x852   :  { %5604 = vmatpush3.bf16.msra.mxu1 %v6700_v27 }
 0x853   :  { %5605 = vmatprep.subr.bf16.mxu1 %v6171_v0 }
 0x854   :  { %5580 = vmatpush3.bf16.msra.mxu0 %v6873_v61 }
 0x855   :  { %5581 = vmatprep.subr.bf16.mxu0 %v6171_v0 }
 0x856   :  { %5607 = vmatpush3.bf16.msra.mxu1 %v6706_v35 }
 0x857   :  { %5608 = vmatprep.subr.bf16.mxu1 %v6171_v0 }
 0x858   :  { %5583 = vmatpush3.bf16.msra.mxu0 %v6877_v43 }
 0x859   :  { %5584 = vmatprep.subr.bf16.mxu0 %v6171_v0 }
 0x85a   :  { %5610 = vmatpush3.bf16.msra.mxu1 %v6712_v48 }
 0x85b   :  { %5611 = vmatprep.subr.bf16.mxu1 %v6171_v0 }
 0x85c   :  { %5586 = vmatpush3.bf16.msra.mxu0 %v6881_v42 }
 0x85d   :  { %5587 = vmatprep.subr.bf16.mxu0 %v6171_v0 }
 0x85e   :  { %5613 = vmatpush3.bf16.msra.mxu1 %v6718_v9 }
 0x85f   :  { %5638 = vmatprep.subr.bf16.mxu1 %v6171_v0 }
 0x860   :  { %5589 = vmatpush3.bf16.msra.mxu0 %v6885_v16 }
 0x861   :  { %4719 = vmatmul.mubr.f32.vlgmr.msra.gmra.mrb[20].mxu1 %v1892_v30  ;;  %5614 = vmatprep.subr.bf16.mxu0 %v6171_v0 }
 0x862   :  { %5640 = vmatpush3.bf16.msra.mxu1 %v6736_v41  ;;  %4788 = vmatprep.mubr.msk.f32.mxu1 %vm6172_vm0, %v6173_v1  ;;  %v6982_v41 = vld [vmem:[%s7333_s8] ss:$0 sm:$0xff] }
 0x863   :  { %5641 = vmatprep.subr.bf16.mxu1 %v6171_v0 }
 0x866   :  { %5643 = vmatpush3.bf16.msra.mxu1 %v6740_v33 }
 0x867   :  { %5644 = vmatprep.subr.bf16.mxu1 %v6171_v0 }
 0x86a   :  { %5646 = vmatpush3.bf16.msra.mxu1 %v6744_v39 }
 0x86b   :  { %5647 = vmatprep.subr.bf16.mxu1 %v6171_v0 }
 0x86e   :  { %5649 = vmatpush3.bf16.msra.mxu1 %v6748_v4 }
 0x86f   :  { %5650 = vmatprep.subr.bf16.mxu1 %v6171_v0 }
 0x872   :  { %5652 = vmatpush3.bf16.msra.mxu1 %v6753_v38 }
 0x873   :  { %5653 = vmatprep.subr.bf16.mxu1 %v6171_v0 }
 0x876   :  { %5655 = vmatpush3.bf16.msra.mxu1 %v6757_v18 }
 0x877   :  { %5656 = vmatprep.subr.bf16.mxu1 %v6171_v0 }
 0x87a   :  { %5658 = vmatpush3.bf16.msra.mxu1 %v6761_v22 }
 0x87b   :  { %5659 = vmatprep.subr.bf16.mxu1 %v6171_v0 }
 0x87e   :  { %5661 = vmatpush3.bf16.msra.mxu1 %v6765_v62 }
 0x87f   :  { %5686 = vmatprep.subr.bf16.mxu1 %v6171_v0 }
 0x8f6   :  { %v1783_v51 = vpop.f32.mrb[16].mxu0 }
 0x8f7   :  { %v1784_v29 = vadd.f32 %v6633_v5, %v1783_v51  ;;  %v4545_v6 = vpop.f32.mrb[17].mxu0  ;;  %v2575_v51 = vld [vmem:[#allocation2 + $0x30] sm:$0xff] }
 0x8f8   :  { %v2577_v6 = vld [vmem:[#allocation2 + $0x40] sm:$0xff] }
 0x8f9   :  { %1787 = vst [vmem:[%s7336_s11 + $0x6] sm:$0x3] %v1784_v29  ;;  %v2576_v29 = vld [vmem:[#allocation2 + $0x38] sm:$0xff] }
 0x914   :  { %v2061_v21 = vpop.f32.mrb[18].mxu1 }
 0x915   :  { %v4650_v27 = vpop.f32.mrb[19].mxu1 }
 0x916   :  { %v1991_v35 = vpop.f32.mrb[18].mxu0 }
 0x917   :  { %v2062_v48 = vadd.f32 %v2061_v21, %v1991_v35  ;;  %v4615_v9 = vpop.f32.mrb[19].mxu0  ;;  %v2578_v21 = vld [vmem:[#allocation2 + $0x48] sm:$0xff]  ;;  %v2580_v35 = vld [vmem:[#allocation2 + $0x58] sm:$0xff] }
 0x918   :  { %v7043_v27 = vpack.c.bf16 %v2578_v21, %v2577_v6  ;;  %v2582_v9 = vld [vmem:[#allocation2 + $0x68] sm:$0xff]  ;;  %v2701_v6 = vld [vmem:[#allocation5 + $0x60] sm:$0xff] }
 0x919   :  { %v2065_v33 = vadd.f32 %v6982_v41, %v2062_v48  ;;  %v2702_v21 = vld [vmem:[#allocation5 + $0x68] sm:$0xff] }
 0x91b   :  { %v3424_v39 = vmul.f32 -1.442695, %v2065_v33  ;;  %5965 = vtanh.f32 %v2065_v33 }
 0x91d   :  { %5967 = vpow2.f32 %v3424_v39  ;;  %v2584_v39 = vld [vmem:[#allocation2 + $0x78] sm:$0xff] }
 0x925   :  { %v5966_v5 = vpop.eup %5965 }
 0x926   :  { %2075 = vrot.lane.b32.xlu0 %v5966_v5, %s6176_s16 }
 0x927   :  { %v5968_v4 = vpop.eup %5967 }
 0x928   :  { %v2069_v38 = vadd.f32 1.0, %v5968_v4 }
 0x92a   :  { %5969 = vrcp.f32 %v2069_v38 }
 0x934   :  { %v5970_v18 = vpop.eup %5969  ;;  %v2253_v22 = vpop.f32.mrb[20].mxu1 }
 0x935   :  { %v2258_v62 = vrot.slane %v2253_v22, 6  ;;  %v4720_v26 = vpop.f32.mrb[21].mxu1  ;;  %2073 = vrot.lane.b32.xlu1 %v5970_v18, %s6175_s15 }
 0x937   :  { %v2260_v40 = vadd.f32 %v2258_v62, %v6408_v52 }
 0x939   :  { %v3425_v45 = vmul.f32 -1.442695, %v2260_v40  ;;  %5971 = vtanh.f32 %v2260_v40  ;;  %2077 = vrot.lane.b32.xlu1 %v5970_v18, %s6174_s5 }
 0x93b   :  { %5973 = vpow2.f32 %v3425_v45 }
 0x943   :  { %v5972_v50 = vpop.eup %5971 }
 0x944   :  { %v2274_v28 = vrot.slane %v5972_v50, 2 }
 0x945   :  { %v5974_v37 = vpop.eup %5973 }
 0x946   :  { %v2264_v63 = vadd.f32 1.0, %v5974_v37  ;;  %2276 = vrot.lane.b32.xlu0 %v2274_v28, %s6176_s16 }
 0x948   :  { %5975 = vrcp.f32 %v2264_v63 }
 0x952   :  { %v5976_v2 = vpop.eup %5975 }
 0x953   :  { %v2269_v3 = vrot.slane %v5976_v2, 2 }
 0x955   :  { %2278 = vrot.lane.b32.xlu0 %v2269_v3, %s6174_s5  ;;  %2271 = vrot.lane.b32.xlu1 %v2269_v3, %s6175_s15 }
 0x998   :  { %v2076_v10 = vpop.permute.xlu0 %2075 }
 0x999   :  { %v2080_v36 = vmul.f32 %v5970_v18, %v2076_v10  ;;  %v2689_v10 = vld [vmem:[#allocation5] sm:$0xff] }
 0x9a7   :  { %v2074_v15 = vpop.permute.xlu1 %2073 }
 0x9a8   :  { %v2079_v17 = vmul.f32 %v2074_v15, %v6896_v59  ;;  %v2690_v15 = vld [vmem:[#allocation5 + $0x8] sm:$0xff] }
 0x9aa   :  { %v6993_v31 = vadd.f32 %v2080_v36, %v2079_v17  ;;  %v7086_v17 = vpack.c.bf16 %v2690_v15, %v2689_v10  ;;  %v2711_v10 = vld [vmem:[#allocation7 + $0x30] sm:$0xff]  ;;  %v2712_v15 = vld [vmem:[#allocation7 + $0x38] sm:$0xff] }
 0x9ab   :  { %v2078_v34 = vpop.permute.xlu1 %2077 }
 0x9ac   :  { %5977 = vtanh.f32 %v6993_v31 }
 0x9b6   :  { %v5978_v32 = vpop.eup %5977 }
 0x9b7   :  { %v2083_v47 = vmul.f32 %v5978_v32, %v2078_v34  ;;  %v2691_v34 = vld [vmem:[#allocation5 + $0x10] sm:$0xff] }
 0x9b8   :  { %v2277_v55 = vpop.permute.xlu0 %2276 }
 0x9b9   :  { %4684 = vmatmul.mubr.f32.vlgmr.msra.gmra.mrb[20].mxu0 %v2083_v47  ;;  %v2282_v59 = vrot.slane %v2277_v55, 6 }
 0x9ba   :  { %5616 = vmatpush3.bf16.msra.mxu0 %v6775_v8  ;;  %4753 = vmatprep.mubr.msk.f32.mxu0 %vm6172_vm0, %v6173_v1 }
 0x9bb   :  { %5617 = vmatprep.subr.bf16.mxu0 %v6171_v0  ;;  %v2284_v56 = vmul.f32 %v5976_v2, %v2282_v59  ;;  %v2693_v59 = vld [vmem:[#allocation5 + $0x20] sm:$0xff] }
 0x9bd   :  { %v2286_v8 = vrot.slane %v2284_v56, 2  ;;  %v2694_v56 = vld [vmem:[#allocation5 + $0x28] sm:$0xff] }
 0x9be   :  { %5619 = vmatpush3.bf16.msra.mxu0 %v6778_v19  ;;  %v2569_v19 = vld [vmem:[#allocation2] sm:$0xff] }
 0x9bf   :  { %5620 = vmatprep.subr.bf16.mxu0 %v6171_v0 }
 0x9c2   :  { %5622 = vmatpush3.bf16.msra.mxu0 %v6784_v23  ;;  %v2570_v23 = vld [vmem:[#allocation2 + $0x8] sm:$0xff] }
 0x9c3   :  { %5623 = vmatprep.subr.bf16.mxu0 %v6171_v0 }
 0x9c6   :  { %5625 = vmatpush3.bf16.msra.mxu0 %v6788_v44 }
 0x9c7   :  { %v2272_v57 = vpop.permute.xlu1 %2271  ;;  %5626 = vmatprep.subr.bf16.mxu0 %v6171_v0  ;;  %v2279_v58 = vpop.permute.xlu0 %2278 }
 0x9c8   :  { %v2280_v49 = vmul.f32 %v2272_v57, %v6910_v20  ;;  %v7017_v20 = vpack.c.bf16 %v2570_v23, %v2569_v19  ;;  %v7094_v57 = vpack.c.bf16 %v2694_v56, %v2693_v59 }
 0x9ca   :  { %v7007_v12 = vadd.f32 %v2286_v8, %v2280_v49  ;;  %5628 = vmatpush3.bf16.msra.mxu0 %v6792_v53  ;;  %v2695_v8 = vld [vmem:[#allocation5 + $0x30] sm:$0xff]  ;;  %v2696_v49 = vld [vmem:[#allocation5 + $0x38] sm:$0xff] }
 0x9cb   :  { %5629 = vmatprep.subr.bf16.mxu0 %v6171_v0  ;;  %v7098_v23 = vpack.c.bf16 %v2696_v49, %v2695_v8  ;;  %v2715_v8 = vld [vmem:[#allocation7 + $0x50] sm:$0xff]  ;;  %v2716_v49 = vld [vmem:[#allocation7 + $0x58] sm:$0xff] }
 0x9cc   :  { %5979 = vtanh.f32 %v7007_v12 }
 0x9ce   :  { %5631 = vmatpush3.bf16.msra.mxu0 %v6797_v60  ;;  %v7021_v60 = vpack.c.bf16 %v2572_v13, %v2571_v7  ;;  %v2697_v7 = vld [vmem:[#allocation5 + $0x40] sm:$0xff]  ;;  %v2698_v13 = vld [vmem:[#allocation5 + $0x48] sm:$0xff] }
 0x9cf   :  { %5632 = vmatprep.subr.bf16.mxu0 %v6171_v0 }
 0x9d2   :  { %5634 = vmatpush3.bf16.msra.mxu0 %v6804_v14  ;;  %v2573_v14 = vld [vmem:[#allocation2 + $0x20] sm:$0xff] }
 0x9d3   :  { %5635 = vmatprep.subr.bf16.mxu0 %v6171_v0 }
 0x9d6   :  { %v5980_v44 = vpop.eup %5979  ;;  %5637 = vmatpush3.bf16.msra.mxu0 %v6808_v24  ;;  %v2574_v24 = vld [vmem:[#allocation2 + $0x28] sm:$0xff] }
 0x9d7   :  { %v2290_v53 = vmul.f32 %v5980_v44, %v2279_v58  ;;  %5662 = vmatprep.subr.bf16.mxu0 %v6171_v0  ;;  %v7031_v30 = vpack.c.bf16 %v2574_v24, %v2573_v14  ;;  %v7103_v14 = vpack.c.bf16 %v2698_v13, %v2697_v7  ;;  %v2699_v24 = vld [vmem:[#allocation5 + $0x50] sm:$0xff]  ;;  %v2717_v7 = vld [vmem:[#allocation7 + $0x60] sm:$0xff]  ;;  %v2718_v13 = vld [vmem:[#allocation7 + $0x68] sm:$0xff] }
 0x9d9   :  { %4754 = vmatmul.mubr.f32.vlgmr.msra.gmra.mrb[22].mxu0 %v2083_v47  ;;  %4789 = vmatmul.mubr.f32.vlgmr.msra.gmra.mrb[22].mxu1 %v2290_v53  ;;  %v2692_v47 = vld [vmem:[#allocation5 + $0x18] sm:$0xff] }
 0x9da   :  { %5688 = vmatpush3.bf16.msra.mxu1 %v7017_v20  ;;  %4858 = vmatprep.mubr.msk.f32.mxu1 %vm6172_vm0, %v6173_v1  ;;  %v7090_v55 = vpack.c.bf16 %v2692_v47, %v2691_v34  ;;  %v2713_v34 = vld [vmem:[#allocation7 + $0x40] sm:$0xff]  ;;  %v2714_v47 = vld [vmem:[#allocation7 + $0x48] sm:$0xff] }
 0x9db   :  { %5689 = vmatprep.subr.bf16.mxu1 %v6171_v0  ;;  %5664 = vmatpush3.bf16.msra.mxu0 %v6855_v11  ;;  %v7037_v11 = vpack.c.bf16 %v2576_v29, %v2575_v51  ;;  %v2700_v51 = vld [vmem:[#allocation5 + $0x58] sm:$0xff]  ;;  %v7142_v56 = vpack.c.bf16 %v2714_v47, %v2713_v34  ;;  %v2894_v34 = vld [vmem:[#allocation8 + $0x70] sm:$0xff] }
 0x9dc   :  { %5665 = vmatprep.subr.bf16.mxu0 %v6171_v0  ;;  %4823 = vmatprep.mubr.msk.f32.mxu0 %vm6172_vm0, %v6173_v1  ;;  %v7107_v29 = vpack.c.bf16 %v2700_v51, %v2699_v24  ;;  %v7154_v51 = vpack.c.bf16 %v2718_v13, %v2717_v7  ;;  %v2895_v47 = vld [vmem:[#allocation8 + $0x78] sm:$0xff] }
 0x9de   :  { %5691 = vmatpush3.bf16.msra.mxu1 %v7021_v60 }
 0x9df   :  { %5692 = vmatprep.subr.bf16.mxu1 %v6171_v0  ;;  %5667 = vmatpush3.bf16.msra.mxu0 %v6859_v25  ;;  %v2579_v25 = vld [vmem:[#allocation2 + $0x50] sm:$0xff] }
 0x9e0   :  { %5668 = vmatprep.subr.bf16.mxu0 %v6171_v0  ;;  %v7049_v48 = vpack.c.bf16 %v2580_v35, %v2579_v25  ;;  %v7111_v25 = vpack.c.bf16 %v2702_v21, %v2701_v6  ;;  %v2719_v6 = vld [vmem:[#allocation7 + $0x70] sm:$0xff] }
 0x9e2   :  { %5694 = vmatpush3.bf16.msra.mxu1 %v7031_v30 }
 0x9e3   :  { %5695 = vmatprep.subr.bf16.mxu1 %v6171_v0  ;;  %5670 = vmatpush3.bf16.msra.mxu0 %v6863_v46  ;;  %v2581_v46 = vld [vmem:[#allocation2 + $0x60] sm:$0xff] }
 0x9e4   :  { %5671 = vmatprep.subr.bf16.mxu0 %v6171_v0  ;;  %v7055_v33 = vpack.c.bf16 %v2582_v9, %v2581_v46  ;;  %v2703_v46 = vld [vmem:[#allocation5 + $0x70] sm:$0xff]  ;;  %v2704_v9 = vld [vmem:[#allocation5 + $0x78] sm:$0xff] }
 0x9e6   :  { %5697 = vmatpush3.bf16.msra.mxu1 %v7037_v11 }
 0x9e7   :  { %5698 = vmatprep.subr.bf16.mxu1 %v6171_v0  ;;  %5673 = vmatpush3.bf16.msra.mxu0 %v6867_v54  ;;  %v2583_v54 = vld [vmem:[#allocation2 + $0x70] sm:$0xff] }
 0x9e8   :  { %5674 = vmatprep.subr.bf16.mxu0 %v6171_v0  ;;  %v7061_v5 = vpack.c.bf16 %v2584_v39, %v2583_v54  ;;  %v7115_v39 = vpack.c.bf16 %v2704_v9, %v2703_v46 }
 0x9ea   :  { %5700 = vmatpush3.bf16.msra.mxu1 %v7043_v27 }
 0x9eb   :  { %5701 = vmatprep.subr.bf16.mxu1 %v6171_v0  ;;  %5676 = vmatpush3.bf16.msra.mxu0 %v6873_v61 }
 0x9ec   :  { %5677 = vmatprep.subr.bf16.mxu0 %v6171_v0 }
 0x9ee   :  { %5703 = vmatpush3.bf16.msra.mxu1 %v7049_v48 }
 0x9ef   :  { %5704 = vmatprep.subr.bf16.mxu1 %v6171_v0  ;;  %5679 = vmatpush3.bf16.msra.mxu0 %v6877_v43  ;;  %v7075_v43 = vld [vmem:[%s7335_s10] ss:$0 sm:$0xff] }
 0x9f0   :  { %5680 = vmatprep.subr.bf16.mxu0 %v6171_v0 }
 0x9f2   :  { %5706 = vmatpush3.bf16.msra.mxu1 %v7055_v33 }
 0x9f3   :  { %5707 = vmatprep.subr.bf16.mxu1 %v6171_v0  ;;  %5682 = vmatpush3.bf16.msra.mxu0 %v6881_v42 }
 0x9f4   :  { %5683 = vmatprep.subr.bf16.mxu0 %v6171_v0 }
 0x9f6   :  { %5709 = vmatpush3.bf16.msra.mxu1 %v7061_v5 }
 0x9f7   :  { %5685 = vmatpush3.bf16.msra.mxu0 %v6885_v16  ;;  %5734 = vmatprep.subr.bf16.mxu1 %v6171_v0 }
 0x9f8   :  { %5710 = vmatprep.subr.bf16.mxu0 %v6171_v0 }
 0x9f9   :  { %4859 = vmatmul.mubr.f32.vlgmr.msra.gmra.mrb[24].mxu1 %v2290_v53 }
 0x9fa   :  { %4928 = vmatprep.mubr.msk.f32.mxu1 %vm6172_vm0, %v6173_v1  ;;  %5736 = vmatpush3.bf16.msra.mxu1 %v7086_v17 }
 0x9fb   :  { %5737 = vmatprep.subr.bf16.mxu1 %v6171_v0 }
 0x9fe   :  { %5739 = vmatpush3.bf16.msra.mxu1 %v7090_v55 }
 0x9ff   :  { %5740 = vmatprep.subr.bf16.mxu1 %v6171_v0 }
 0xa02   :  { %5742 = vmatpush3.bf16.msra.mxu1 %v7094_v57 }
 0xa03   :  { %5743 = vmatprep.subr.bf16.mxu1 %v6171_v0 }
 0xa06   :  { %5745 = vmatpush3.bf16.msra.mxu1 %v7098_v23 }
 0xa07   :  { %5746 = vmatprep.subr.bf16.mxu1 %v6171_v0 }
 0xa0a   :  { %5748 = vmatpush3.bf16.msra.mxu1 %v7103_v14 }
 0xa0b   :  { %5749 = vmatprep.subr.bf16.mxu1 %v6171_v0 }
 0xa0e   :  { %5751 = vmatpush3.bf16.msra.mxu1 %v7107_v29 }
 0xa0f   :  { %5752 = vmatprep.subr.bf16.mxu1 %v6171_v0 }
 0xa12   :  { %5754 = vmatpush3.bf16.msra.mxu1 %v7111_v25 }
 0xa13   :  { %5755 = vmatprep.subr.bf16.mxu1 %v6171_v0 }
 0xa16   :  { %5757 = vmatpush3.bf16.msra.mxu1 %v7115_v39 }
 0xa17   :  { %5782 = vmatprep.subr.bf16.mxu1 %v6171_v0 }
 0xa8c   :  { %v2166_v61 = vpop.f32.mrb[20].mxu0 }
 0xa8d   :  { %v2167_v42 = vadd.f32 %v7075_v43, %v2166_v61  ;;  %v4685_v4 = vpop.f32.mrb[21].mxu0 }
 0xa8f   :  { %2170 = vst [vmem:[%s7336_s11 + $0x8] sm:$0x3] %v2167_v42 }
 0xaac   :  { %v2389_v16 = vpop.f32.mrb[22].mxu0  ;;  %v2459_v38 = vpop.f32.mrb[22].mxu1 }
 0xaad   :  { %v2460_v18 = vadd.f32 %v2459_v38, %v2389_v16  ;;  %v4755_v22 = vpop.f32.mrb[23].mxu0  ;;  %v4790_v62 = vpop.f32.mrb[23].mxu1 }
 0xaae   :  { %v2706_v22 = vld [vmem:[#allocation7 + $0x8] sm:$0xff] }
 0xaaf   :  { %v2463_v26 = vadd.f32 %v6982_v41, %v2460_v18  ;;  %v2705_v18 = vld [vmem:[#allocation7] sm:$0xff] }
 0xab1   :  { %v3426_v40 = vmul.f32 -1.442695, %v2463_v26  ;;  %5981 = vtanh.f32 %v2463_v26 }
 0xab3   :  { %5983 = vpow2.f32 %v3426_v40  ;;  %v7125_v40 = vpack.c.bf16 %v2706_v22, %v2705_v18 }
 0xabb   :  { %v5982_v45 = vpop.eup %5981 }
 0xabc   :  { %2473 = vrot.lane.b32.xlu0 %v5982_v45, %s6176_s16 }
 0xabd   :  { %v5984_v50 = vpop.eup %5983 }
 0xabe   :  { %v2467_v28 = vadd.f32 1.0, %v5984_v50  ;;  %v2707_v50 = vld [vmem:[#allocation7 + $0x10] sm:$0xff] }
 0xac0   :  { %5985 = vrcp.f32 %v2467_v28  ;;  %v2708_v28 = vld [vmem:[#allocation7 + $0x18] sm:$0xff] }
 0xaca   :  { %v5986_v37 = vpop.eup %5985 }
 0xacb   :  { %2471 = vrot.lane.b32.xlu1 %v5986_v37, %s6175_s15 }
 0xacc   :  { %v2651_v63 = vpop.f32.mrb[24].mxu1 }
 0xacd   :  { %v2656_v2 = vrot.slane %v2651_v63, 4  ;;  %v4860_v3 = vpop.f32.mrb[25].mxu1  ;;  %v7128_v63 = vpack.c.bf16 %v2708_v28, %v2707_v50 }
 0xacf   :  { %v2658_v36 = vadd.f32 %v2656_v2, %v6408_v52  ;;  %2475 = vrot.lane.b32.xlu1 %v5986_v37, %s6174_s5 }
 0xad1   :  { %v3427_v32 = vmul.f32 -1.442695, %v2658_v36  ;;  %5987 = vtanh.f32 %v2658_v36 }
 0xad3   :  { %5989 = vpow2.f32 %v3427_v32  ;;  %v7138_v32 = vpack.c.bf16 %v2712_v15, %v2711_v10  ;;  %v2892_v10 = vld [vmem:[#allocation8 + $0x60] sm:$0xff]  ;;  %v2893_v15 = vld [vmem:[#allocation8 + $0x68] sm:$0xff] }
 0xadb   :  { %v5988_v19 = vpop.eup %5987 }
 0xadc   :  { %v2672_v44 = vrot.slane %v5988_v19, 4 }
 0xadd   :  { %v5990_v58 = vpop.eup %5989 }
 0xade   :  { %v2662_v53 = vadd.f32 1.0, %v5990_v58  ;;  %2674 = vrot.lane.b32.xlu0 %v2672_v44, %s6176_s16 }
 0xae0   :  { %5991 = vrcp.f32 %v2662_v53  ;;  %v7147_v53 = vpack.c.bf16 %v2716_v49, %v2715_v8  ;;  %v7234_v8 = vpack.c.bf16 %v2895_v47, %v2894_v34 }
 0xaea   :  { %v5992_v35 = vpop.eup %5991 }
 0xaeb   :  { %v2667_v54 = vrot.slane %v5992_v35, 4 }
 0xaed   :  { %2676 = vrot.lane.b32.xlu0 %v2667_v54, %s6174_s5  ;;  %2669 = vrot.lane.b32.xlu1 %v2667_v54, %s6175_s15 }
 0xb2e   :  { %v2474_v61 = vpop.permute.xlu0 %2473 }
 0xb2f   :  { %v2478_v4 = vmul.f32 %v5986_v37, %v2474_v61  ;;  %v2710_v37 = vld [vmem:[#allocation7 + $0x28] sm:$0xff] }
 0xb30   :  { %v2885_v61 = vld [vmem:[#allocation8 + $0x28] sm:$0xff] }
 0xb3d   :  { %v2472_v42 = vpop.permute.xlu1 %2471 }
 0xb3e   :  { %v2477_v16 = vmul.f32 %v2472_v42, %v6993_v31  ;;  %v2709_v31 = vld [vmem:[#allocation7 + $0x20] sm:$0xff] }
 0xb3f   :  { %v7134_v2 = vpack.c.bf16 %v2710_v37, %v2709_v31  ;;  %v2890_v31 = vld [vmem:[#allocation8 + $0x50] sm:$0xff]  ;;  %v2891_v37 = vld [vmem:[#allocation8 + $0x58] sm:$0xff] }
 0xb40   :  { %v7122_v38 = vadd.f32 %v2478_v4, %v2477_v16  ;;  %v2886_v4 = vld [vmem:[#allocation8 + $0x30] sm:$0xff]  ;;  %v2887_v16 = vld [vmem:[#allocation8 + $0x38] sm:$0xff] }
 0xb41   :  { %v2476_v26 = vpop.permute.xlu1 %2475  ;;  %v7216_v18 = vpack.c.bf16 %v2887_v16, %v2886_v4 }
 0xb42   :  { %5993 = vtanh.f32 %v7122_v38 }
 0xb4c   :  { %v5994_v62 = vpop.eup %5993 }
 0xb4d   :  { %v2481_v45 = vmul.f32 %v5994_v62, %v2476_v26  ;;  %v2888_v26 = vld [vmem:[#allocation8 + $0x40] sm:$0xff] }
 0xb4f   :  { %4824 = vmatmul.mubr.f32.vlgmr.msra.gmra.mrb[24].mxu0 %v2481_v45 }
 0xb50   :  { %5712 = vmatpush3.bf16.msra.mxu0 %v7125_v40  ;;  %4893 = vmatprep.mubr.msk.f32.mxu0 %vm6172_vm0, %v6173_v1  ;;  %v2675_v3 = vpop.permute.xlu0 %2674 }
 0xb51   :  { %5713 = vmatprep.subr.bf16.mxu0 %v6171_v0  ;;  %v2680_v36 = vrot.slane %v2675_v3, 4  ;;  %v7226_v3 = vpack.c.bf16 %v2891_v37, %v2890_v31 }
 0xb53   :  { %v2682_v59 = vmul.f32 %v5992_v35, %v2680_v36  ;;  %v7230_v36 = vpack.c.bf16 %v2893_v15, %v2892_v10 }
 0xb54   :  { %5715 = vmatpush3.bf16.msra.mxu0 %v7128_v63 }
 0xb55   :  { %5716 = vmatprep.subr.bf16.mxu0 %v6171_v0  ;;  %v2684_v44 = vrot.slane %v2682_v59, 4 }
 0xb58   :  { %5718 = vmatpush3.bf16.msra.mxu0 %v7134_v2 }
 0xb59   :  { %5719 = vmatprep.subr.bf16.mxu0 %v6171_v0 }
 0xb5c   :  { %5721 = vmatpush3.bf16.msra.mxu0 %v7138_v32 }
 0xb5d   :  { %5722 = vmatprep.subr.bf16.mxu0 %v6171_v0 }
 0xb5f   :  { %v2670_v19 = vpop.permute.xlu1 %2669  ;;  %v2677_v46 = vpop.permute.xlu0 %2676 }
 0xb60   :  { %v2678_v58 = vmul.f32 %v2670_v19, %v7007_v12  ;;  %5724 = vmatpush3.bf16.msra.mxu0 %v7142_v56  ;;  %v2720_v12 = vld [vmem:[#allocation7 + $0x78] sm:$0xff] }
 0xb61   :  { %5725 = vmatprep.subr.bf16.mxu0 %v6171_v0  ;;  %v7158_v21 = vpack.c.bf16 %v2720_v12, %v2719_v6 }
 0xb62   :  { %v7150_v24 = vadd.f32 %v2684_v44, %v2678_v58 }
 0xb64   :  { %5995 = vtanh.f32 %v7150_v24  ;;  %5727 = vmatpush3.bf16.msra.mxu0 %v7147_v53 }
 0xb65   :  { %5728 = vmatprep.subr.bf16.mxu0 %v6171_v0 }
 0xb68   :  { %5730 = vmatpush3.bf16.msra.mxu0 %v7154_v51 }
 0xb69   :  { %5731 = vmatprep.subr.bf16.mxu0 %v6171_v0 }
 0xb6c   :  { %5733 = vmatpush3.bf16.msra.mxu0 %v7158_v21 }
 0xb6d   :  { %5758 = vmatprep.subr.bf16.mxu0 %v6171_v0 }
 0xb6e   :  { %v5996_v35 = vpop.eup %5995 }
 0xb6f   :  { %4894 = vmatmul.mubr.f32.vlgmr.msra.gmra.mrb[26].mxu0 %v2481_v45  ;;  %v2688_v9 = vmul.f32 %v5996_v35, %v2677_v46  ;;  %v2889_v45 = vld [vmem:[#allocation8 + $0x48] sm:$0xff] }
 0xb70   :  { %4963 = vmatprep.mubr.msk.f32.mxu0 %vm6172_vm0, %v6173_v1  ;;  %v7222_v28 = vpack.c.bf16 %v2889_v45, %v2888_v26 }
 0xb71   :  { %4929 = vmatmul.mubr.f32.vlgmr.msra.gmra.mrb[26].mxu1 %v2688_v9 }
 0xb72   :  { %5784 = vmatpush3.bf16.msra.mxu1 %v7017_v20  ;;  %4998 = vmatprep.mubr.msk.f32.mxu1 %vm6172_vm0, %v6173_v1 }
 0xb73   :  { %5785 = vmatprep.subr.bf16.mxu1 %v6171_v0 }
 0xb76   :  { %5787 = vmatpush3.bf16.msra.mxu1 %v7021_v60 }
 0xb77   :  { %5788 = vmatprep.subr.bf16.mxu1 %v6171_v0 }
 0xb7a   :  { %5790 = vmatpush3.bf16.msra.mxu1 %v7031_v30 }
 0xb7b   :  { %5791 = vmatprep.subr.bf16.mxu1 %v6171_v0 }
 0xb7e   :  { %5793 = vmatpush3.bf16.msra.mxu1 %v7037_v11 }
 0xb7f   :  { %5794 = vmatprep.subr.bf16.mxu1 %v6171_v0 }
 0xb82   :  { %5796 = vmatpush3.bf16.msra.mxu1 %v7043_v27 }
 0xb83   :  { %5797 = vmatprep.subr.bf16.mxu1 %v6171_v0 }
 0xb86   :  { %5799 = vmatpush3.bf16.msra.mxu1 %v7049_v48 }
 0xb87   :  { %5800 = vmatprep.subr.bf16.mxu1 %v6171_v0 }
 0xb8a   :  { %5802 = vmatpush3.bf16.msra.mxu1 %v7055_v33 }
 0xb8b   :  { %5803 = vmatprep.subr.bf16.mxu1 %v6171_v0 }
 0xb8e   :  { %5805 = vmatpush3.bf16.msra.mxu1 %v7061_v5 }
 0xb8f   :  { %5830 = vmatprep.subr.bf16.mxu1 %v6171_v0 }
 0xb91   :  { %4999 = vmatmul.mubr.f32.vlgmr.msra.gmra.mrb[28].mxu1 %v2688_v9 }
 0xb92   :  { %5832 = vmatpush3.bf16.msra.mxu1 %v7086_v17  ;;  %5068 = vmatprep.mubr.msk.f32.mxu1 %vm6172_vm0, %v6173_v1  ;;  %v2880_v17 = vld [vmem:[#allocation8] sm:$0xff] }
 0xb93   :  { %5833 = vmatprep.subr.bf16.mxu1 %v6171_v0 }
 0xb96   :  { %5835 = vmatpush3.bf16.msra.mxu1 %v7090_v55  ;;  %v2881_v55 = vld [vmem:[#allocation8 + $0x8] sm:$0xff] }
 0xb97   :  { %5836 = vmatprep.subr.bf16.mxu1 %v6171_v0 }
 0xb9a   :  { %5838 = vmatpush3.bf16.msra.mxu1 %v7094_v57  ;;  %v7204_v57 = vpack.c.bf16 %v2881_v55, %v2880_v17 }
 0xb9b   :  { %5839 = vmatprep.subr.bf16.mxu1 %v6171_v0 }
 0xb9c   :  { %5760 = vmatpush3.bf16.msra.mxu0 %v7204_v57 }
 0xb9d   :  { %5761 = vmatprep.subr.bf16.mxu0 %v6171_v0 }
 0xb9e   :  { %5841 = vmatpush3.bf16.msra.mxu1 %v7098_v23 }
 0xb9f   :  { %5842 = vmatprep.subr.bf16.mxu1 %v6171_v0 }
 0xba2   :  { %5844 = vmatpush3.bf16.msra.mxu1 %v7103_v14  ;;  %v2882_v14 = vld [vmem:[#allocation8 + $0x10] sm:$0xff] }
 0xba3   :  { %5845 = vmatprep.subr.bf16.mxu1 %v6171_v0 }
 0xba6   :  { %5847 = vmatpush3.bf16.msra.mxu1 %v7107_v29  ;;  %v2883_v29 = vld [vmem:[#allocation8 + $0x18] sm:$0xff] }
 0xba7   :  { %5848 = vmatprep.subr.bf16.mxu1 %v6171_v0 }
 0xbaa   :  { %5850 = vmatpush3.bf16.msra.mxu1 %v7111_v25  ;;  %v7208_v25 = vpack.c.bf16 %v2883_v29, %v2882_v14 }
 0xbab   :  { %5851 = vmatprep.subr.bf16.mxu1 %v6171_v0 }
 0xbac   :  { %5763 = vmatpush3.bf16.msra.mxu0 %v7208_v25 }
 0xbad   :  { %5764 = vmatprep.subr.bf16.mxu0 %v6171_v0 }
 0xbae   :  { %5853 = vmatpush3.bf16.msra.mxu1 %v7115_v39  ;;  %v2884_v39 = vld [vmem:[#allocation8 + $0x20] sm:$0xff] }
 0xbaf   :  { %v7212_v42 = vpack.c.bf16 %v2885_v61, %v2884_v39 }
 0xbb1   :  { %5766 = vmatpush3.bf16.msra.mxu0 %v7212_v42 }
 0xbb2   :  { %5767 = vmatprep.subr.bf16.mxu0 %v6171_v0 }
 0xbb5   :  { %5769 = vmatpush3.bf16.msra.mxu0 %v7216_v18 }
 0xbb6   :  { %5770 = vmatprep.subr.bf16.mxu0 %v6171_v0 }
 0xbb9   :  { %5772 = vmatpush3.bf16.msra.mxu0 %v7222_v28 }
 0xbba   :  { %5773 = vmatprep.subr.bf16.mxu0 %v6171_v0 }
 0xbbd   :  { %5775 = vmatpush3.bf16.msra.mxu0 %v7226_v3 }
 0xbbe   :  { %5776 = vmatprep.subr.bf16.mxu0 %v6171_v0 }
 0xbc1   :  { %5778 = vmatpush3.bf16.msra.mxu0 %v7230_v36 }
 0xbc2   :  { %5779 = vmatprep.subr.bf16.mxu0 %v6171_v0 }
 0xbc5   :  { %5781 = vmatpush3.bf16.msra.mxu0 %v7234_v8 }
 0xbc6   :  { %5806 = vmatprep.subr.bf16.mxu0 %v6171_v0 }
 0xc22   :  { %v2564_v20 = vpop.f32.mrb[24].mxu0 }
 0xc23   :  { %v2565_v60 = vadd.f32 %v7075_v43, %v2564_v20  ;;  %v4825_v30 = vpop.f32.mrb[25].mxu0 }
 0xc25   :  { %2568 = vst [vmem:[%s7336_s11 + $0xa] sm:$0x3] %v2565_v60 }
 0xc42   :  { %v2787_v11 = vpop.f32.mrb[26].mxu0 }
 0xc43   :  { %v4895_v27 = vpop.f32.mrb[27].mxu0 }
 0xc44   :  { %v2857_v48 = vpop.f32.mrb[26].mxu1 }
 0xc45   :  { %v2858_v33 = vadd.f32 %v2857_v48, %v2787_v11  ;;  %v4930_v5 = vpop.f32.mrb[27].mxu1 }
 0xc47   :  { %v2861_v23 = vadd.f32 %v6982_v41, %v2858_v33 }
 0xc49   :  { %v3428_v54 = vmul.f32 -1.442695, %v2861_v23  ;;  %5997 = vtanh.f32 %v2861_v23 }
 0xc4b   :  { %5999 = vpow2.f32 %v3428_v54 }
 0xc53   :  { %v5998_v22 = vpop.eup %5997 }
 0xc54   :  { %2871 = vrot.lane.b32.xlu0 %v5998_v22, %s6176_s16 }
 0xc55   :  { %v6000_v62 = vpop.eup %5999 }
 0xc56   :  { %v2865_v50 = vadd.f32 1.0, %v6000_v62 }
 0xc58   :  { %6001 = vrcp.f32 %v2865_v50 }
 0xc62   :  { %v6002_v59 = vpop.eup %6001 }
 0xc63   :  { %2869 = vrot.lane.b32.xlu1 %v6002_v59, %s6175_s15 }
 0xc64   :  { %v3049_v49 = vpop.f32.mrb[28].mxu1 }
 0xc65   :  { %v3054_v19 = vrot.slane %v3049_v49, 2  ;;  %v5000_v44 = vpop.f32.mrb[29].mxu1 }
 0xc67   :  { %v3056_v58 = vadd.f32 %v3054_v19, %v6408_v52  ;;  %2873 = vrot.lane.b32.xlu1 %v6002_v59, %s6174_s5 }
 0xc69   :  { %v3429_v7 = vmul.f32 -1.442695, %v3056_v58  ;;  %6003 = vtanh.f32 %v3056_v58 }
 0xc6b   :  { %6005 = vpow2.f32 %v3429_v7 }
 0xc73   :  { %v6004_v13 = vpop.eup %6003 }
 0xc74   :  { %v3070_v6 = vrot.slane %v6004_v13, 6 }
 0xc75   :  { %v6006_v12 = vpop.eup %6005 }
 0xc76   :  { %v3060_v35 = vadd.f32 1.0, %v6006_v12  ;;  %3072 = vrot.lane.b32.xlu0 %v3070_v6, %s6176_s16 }
 0xc78   :  { %6007 = vrcp.f32 %v3060_v35 }
 0xc82   :  { %v6008_v46 = vpop.eup %6007 }
 0xc83   :  { %v3065_v9 = vrot.slane %v6008_v46, 6 }
 0xc85   :  { %3074 = vrot.lane.b32.xlu0 %v3065_v9, %s6174_s5  ;;  %3067 = vrot.lane.b32.xlu1 %v3065_v9, %s6175_s15 }
 0xcc6   :  { %v2872_v20 = vpop.permute.xlu0 %2871 }
 0xcc7   :  { %v2876_v60 = vmul.f32 %v6002_v59, %v2872_v20 }
 0xcd5   :  { %v2870_v52 = vpop.permute.xlu1 %2869 }
 0xcd6   :  { %v2875_v30 = vmul.f32 %v2870_v52, %v7122_v38 }
 0xcd8   :  { %v7245_v11 = vadd.f32 %v2876_v60, %v2875_v30 }
 0xcd9   :  { %v2874_v48 = vpop.permute.xlu1 %2873 }
 0xcda   :  { %6009 = vtanh.f32 %v7245_v11 }
 0xce4   :  { %v6010_v27 = vpop.eup %6009 }
 0xce5   :  { %v2879_v33 = vmul.f32 %v6010_v27, %v2874_v48 }
 0xce7   :  { %4964 = vmatmul.mubr.f32.vlgmr.msra.gmra.mrb[28].mxu0 %v2879_v33 }
 0xce8   :  { %5808 = vmatpush3.bf16.msra.mxu0 %v7125_v40  ;;  %5033 = vmatprep.mubr.msk.f32.mxu0 %vm6172_vm0, %v6173_v1  ;;  %v3073_v5 = vpop.permute.xlu0 %3072 }
 0xce9   :  { %5809 = vmatprep.subr.bf16.mxu0 %v6171_v0  ;;  %v3078_v38 = vrot.slane %v3073_v5, 2 }
 0xceb   :  { %v3080_v17 = vmul.f32 %v6008_v46, %v3078_v38 }
 0xcec   :  { %5811 = vmatpush3.bf16.msra.mxu0 %v7128_v63 }
 0xced   :  { %5812 = vmatprep.subr.bf16.mxu0 %v6171_v0  ;;  %v3082_v55 = vrot.slane %v3080_v17, 6 }
 0xcf0   :  { %5814 = vmatpush3.bf16.msra.mxu0 %v7134_v2 }
 0xcf1   :  { %5815 = vmatprep.subr.bf16.mxu0 %v6171_v0 }
 0xcf4   :  { %5817 = vmatpush3.bf16.msra.mxu0 %v7138_v32 }
 0xcf5   :  { %5818 = vmatprep.subr.bf16.mxu0 %v6171_v0 }
 0xcf7   :  { %v3068_v40 = vpop.permute.xlu1 %3067  ;;  %v3075_v32 = vpop.permute.xlu0 %3074 }
 0xcf8   :  { %v3076_v23 = vmul.f32 %v3068_v40, %v7150_v24  ;;  %5820 = vmatpush3.bf16.msra.mxu0 %v7142_v56 }
 0xcf9   :  { %5821 = vmatprep.subr.bf16.mxu0 %v6171_v0 }
 0xcfa   :  { %v3084_v63 = vadd.f32 %v3082_v55, %v3076_v23 }
 0xcfc   :  { %6011 = vtanh.f32 %v3084_v63  ;;  %3367 = vst [vmem:[#allocation11] sm:$0x3] %v3084_v63  ;;  %5823 = vmatpush3.bf16.msra.mxu0 %v7147_v53 }
 0xcfd   :  { %5824 = vmatprep.subr.bf16.mxu0 %v6171_v0 }
 0xd00   :  { %5826 = vmatpush3.bf16.msra.mxu0 %v7154_v51 }
 0xd01   :  { %5827 = vmatprep.subr.bf16.mxu0 %v6171_v0 }
 0xd04   :  { %5829 = vmatpush3.bf16.msra.mxu0 %v7158_v21 }
 0xd05   :  { %5854 = vmatprep.subr.bf16.mxu0 %v6171_v0 }
 0xd06   :  { %v6012_v2 = vpop.eup %6011 }
 0xd07   :  { %5034 = vmatmul.mubr.f32.vlgmr.msra.gmra.mrb[30].mxu0 %v2879_v33  ;;  %v3086_v56 = vmul.f32 %v6012_v2, %v3075_v32 }
 0xd08   :  { %5856 = vmatpush3.bf16.msra.mxu0 %v7204_v57  ;;  %5103 = vmatprep.mubr.msk.f32.mxu0 %vm6172_vm0, %v6173_v1 }
 0xd09   :  { %5069 = vmatmul.mubr.f32.vlgmr.msra.gmra.mrb[30].mxu1 %v3086_v56  ;;  %3365 = vst [vmem:[#allocation10] sm:$0x3] %v3086_v56  ;;  %5857 = vmatprep.subr.bf16.mxu0 %v6171_v0 }
 0xd0c   :  { %5859 = vmatpush3.bf16.msra.mxu0 %v7208_v25 }
 0xd0d   :  { %5860 = vmatprep.subr.bf16.mxu0 %v6171_v0 }
 0xd10   :  { %5862 = vmatpush3.bf16.msra.mxu0 %v7212_v42 }
 0xd11   :  { %5863 = vmatprep.subr.bf16.mxu0 %v6171_v0 }
 0xd14   :  { %5865 = vmatpush3.bf16.msra.mxu0 %v7216_v18 }
 0xd15   :  { %5866 = vmatprep.subr.bf16.mxu0 %v6171_v0 }
 0xd18   :  { %5868 = vmatpush3.bf16.msra.mxu0 %v7222_v28 }
 0xd19   :  { %5869 = vmatprep.subr.bf16.mxu0 %v6171_v0 }
 0xd1c   :  { %5871 = vmatpush3.bf16.msra.mxu0 %v7226_v3 }
 0xd1d   :  { %5872 = vmatprep.subr.bf16.mxu0 %v6171_v0 }
 0xd20   :  { %5874 = vmatpush3.bf16.msra.mxu0 %v7230_v36 }
 0xd21   :  { %5875 = vmatprep.subr.bf16.mxu0 %v6171_v0 }
 0xd24   :  { %5877 = vmatpush3.bf16.msra.mxu0 %v7234_v8 }
 0xdba   :  { %v2962_v1 = vpop.f32.mrb[28].mxu0 }
 0xdbb   :  { %v2963_v53 = vadd.f32 %v7075_v43, %v2962_v1  ;;  %v4965_v24 = vpop.f32.mrb[29].mxu0 }
 0xdbd   :  { %2966 = vst [vmem:[%s7336_s11 + $0xc] sm:$0x3] %v2963_v53 }
 0xdda   :  { %v3185_v51 = vpop.f32.mrb[30].mxu0 }
 0xddb   :  { %v5035_v21 = vpop.f32.mrb[31].mxu0 }
 0xddc   :  { %v3255_v57 = vpop.f32.mrb[30].mxu1 }
 0xddd   :  { %v3256_v14 = vadd.f32 %v3255_v57, %v3185_v51  ;;  %v5070_v29 = vpop.f32.mrb[31].mxu1 }
 0xddf   :  { %v3259_v25 = vadd.f32 %v6982_v41, %v3256_v14 }
 0xde1   :  { %v3430_v54 = vmul.f32 -1.442695, %v3259_v25  ;;  %6013 = vtanh.f32 %v3259_v25 }
 0xde3   :  { %6015 = vpow2.f32 %v3430_v54 }
 0xdeb   :  { %v6014_v0 = vpop.eup %6013 }
 0xdec   :  { %3269 = vrot.lane.b32.xlu0 %v6014_v0, %s6176_s16  ;;  %s6177_s16 = smov [#allocation10]  }
 0xded   :  { %v6016_v39 = vpop.eup %6015  ;;  %s3376_s19 = sshll.u32 %s6177_s16, 4  ;;  %s3377_s19 = int_to_ptr.vmem [resolvable:$true] %s3376_s19 }
 0xdee   :  { %v3263_v61 = vadd.f32 1.0, %v6016_v39  ;;  %p6116_p5 = scmp.lt.s32.totalorder %s3377_s19, %s3377_s19 }
 0xdf0   :  { %6017 = vrcp.f32 %v3263_v61 }
 0xdfa   :  { %v6018_v42 = vpop.eup %6017 }
 0xdfb   :  { %3267 = vrot.lane.b32.xlu1 %v6018_v42, %s6175_s15  ;;  %s6111_s15 = scalar_lea.vmem %s3377_s19, 64 }
 0xdfc   :  { %p6112_p4 = scmp.ne.s32.totalorder %s3377_s19, %s6111_s15  ;;  %p6117_p6 = scmp.lt.s32.totalorder %s6111_s15, %s6111_s15 }
 0xdfe   :  { %p6118_p7 = por %p6117_p6, %p6116_p5 }
 0xdff   :  { %3271 = vrot.lane.b32.xlu1 %v6018_v42, %s6174_s5 }
 0xe00   :  { %p6119_p8 = pnand %p6118_p7, %p6112_p4 }
 0xe5e   :  { %v3270_v4 = vpop.permute.xlu0 %3269 }
 0xe5f   :  { %v3274_v18 = vmul.f32 %v6018_v42, %v3270_v4 }
 0xe6d   :  { %v3268_v16 = vpop.permute.xlu1 %3267 }
 0xe6e   :  { %v3273_v22 = vmul.f32 %v3268_v16, %v7245_v11 }
 0xe70   :  { %v3275_v41 = vadd.f32 %v3274_v18, %v3273_v22 }
 0xe71   :  { %v3272_v26 = vpop.permute.xlu1 %3271 }
 0xe72   :  { %6019 = vtanh.f32 %v3275_v41  ;;  %3368 = vst [vmem:[#allocation11 + $0x2] sm:$0x3] %v3275_v41 }
 0xe7c   :  { %v6020_v62 = vpop.eup %6019 }
 0xe7d   :  { %v3277_v45 = vmul.f32 %v6020_v62, %v3272_v26 }
 0xe7f   :  { %3366 = vst [vmem:[#allocation10 + $0x2] sm:$0x3] %v3277_v45  ;;  %5104 = vmatmul.mubr.f32.vlgmr.msra.gmra.mrb[32].mxu0 %v3277_v45 }
 0xe80   :  { %6122 = shalt.err (!%p6119_p8)
}
 0xe81   :  { %s6123_s2 = scalar_lea.hbm %s7337_s12, 64 }
 0xe82   :  { %p6124_p9 = scmp.ne.s32.totalorder %s7337_s12, %s6123_s2  ;;  %p6127_p10 = scmp.lt.u32.totalorder %s6123_s2, %s7337_s12 }
 0xe84   :  { %p6129_p11 = pnand %p6127_p10, %p6124_p9 }
 0xe86   :  { %6132 = shalt.err (!%p6129_p11)
}
 0xe87   :  { %s6179_s21 = smov 2   ;;  %s6133_s29 = scalar_lea.vmem %s3389_s23, 64 }
 0xe88   :  { %3382 = dma.vmem_to_hbm [thread:$0]  %s3377_s19, 64, %s7337_s12, [#allocation4], %s6174_s5, %s6174_s5, %s6179_s21  }
 0xe89   :  { %p6134_p12 = scmp.ne.s32.totalorder %s3389_s23, %s6133_s29  ;;  %p6138_p13 = scmp.lt.s32.totalorder %s3389_s23, %s3389_s23 }
 0xe8a   :  { %p6139_p0 = scmp.lt.s32.totalorder %s6133_s29, %s6133_s29 }
 0xe8c   :  { %p6140_p1 = por %p6139_p0, %p6138_p13 }
 0xe8e   :  { %p6141_p2 = pnand %p6140_p1, %p6134_p12 }
 0xe90   :  { %6144 = shalt.err (!%p6141_p2)
}
 0xe91   :  { %s6145_s0 = scalar_lea.hbm %s7338_s13, 64 }
 0xe92   :  { %p6146_p3 = scmp.ne.s32.totalorder %s7338_s13, %s6145_s0  ;;  %p6149_p4 = scmp.lt.u32.totalorder %s6145_s0, %s7338_s13 }
 0xe94   :  { %p6151_p5 = pnand %p6149_p4, %p6146_p3 }
 0xe96   :  { %6154 = shalt.err (!%p6151_p5)
}
 0xe97   :  { %3394 = dma.vmem_to_hbm [thread:$0]  %s3389_s23, 64, %s7338_s13, [#allocation12], %s6174_s5, %s6174_s5, %s6179_s21  }
 0xf52   :  { %v3360_v50 = vpop.f32.mrb[32].mxu0 }
 0xf53   :  { %v3361_v28 = vadd.f32 %v7075_v43, %v3360_v50  ;;  %v5105_v31 = vpop.f32.mrb[33].mxu0 }
 0xf55   :  { %3364 = vst [vmem:[%s7336_s11 + $0xe] sm:$0x3] %v3361_v28 }
 0xf56   :  { %6161 = dma.done.wait [#allocation4], 64  }
 0xf57   :  { %6162 = vsyncadd [#allocation4], 4294967232 }
 0xf58   :  { %6163 = dma.done.wait [#allocation12], 64  }
 0xf59   :  { %6164 = vsyncadd [#allocation12], 4294967232 }
 0xf5a   :  { %3403 = vsyncpa [#allocation3], 1 }
 0xf5b   :  { %3404 = vsyncpa [#allocation6], 1 }
 0xf5c   :  { %3405 = vsyncpa [#allocation9], 1 }
 0xf5d   :  { %3406 = vsyncpa [#allocation4], 1 }
 0xf5e   :  { %3407 = vsyncpa [#allocation12], 1 }

</bundles_post_ra>
